<compile_context>
chip_gen: v7x
topology: tpu7x:2x2x1
jax: 0.10.0
libtpu: 0.0.40
codegen_flags: <defaults>
</compile_context>

<pallas_src>
import math
from functools import partial

import jax
import jax.numpy as jnp
from jax.experimental import pallas as pl
from jax.experimental.pallas import tpu as pltpu

LOCAL_INFO_DIM = 16
GLOBAL_INFO_DIM = 16
HIDDEN = LOCAL_INFO_DIM + GLOBAL_INFO_DIM  # 32
NUM_LAYERS = 8


# ----------------------------- Pallas kernel -----------------------------
def risnet_kernel(ch_ref, wch_ref, wlg_ref, b_ref, out_ref, *, n_antennas):
    """ch_ref : (M, F)              flattened channel tile, M = TB * N
       wch_ref: (F, 8*32)           stacked, pre-transposed per-layer channel weights
       wlg_ref: (7, 32, 64)         packed local|global weights for conv2..conv8
       b_ref  : (8, 32)             packed biases (conv8 bias*pi in column 0)
       out_ref: (TB, N)             output tile (conv8 column, pi folded in)
    """
    m, _ = ch_ref.shape
    n = n_antennas
    tb = m // n
    H = HIDDEN

    ch = ch_ref[...]  # (M, F), compute dtype (f32 or bf16)

    # Every layer's channel projection in one wide MXU matmul: (M, F) @ (F, 256).
    ch_proj = jnp.dot(ch, wch_ref[...], preferred_element_type=jnp.float32)  # (M, 256) f32

    # ---- layer 1: channel-only input ----
    r = jnp.maximum(ch_proj[:, :H] + b_ref[0], 0.0)  # (M, 32) f32

    wdtype = wlg_ref.dtype
    # ---- layers 2..8 ----
    for l in range(1, NUM_LAYERS):
        # One (32, 64) RHS: columns [0,32) local part, [32,64) global part.
        # mean-over-antennas is moved AFTER the matmul (identical by linearity).
        y2 = jnp.dot(r.astype(wdtype), wlg_ref[l - 1],
                     preferred_element_type=jnp.float32)                 # (M, 64) f32
        gmean = jnp.mean(y2[:, H:].reshape(tb, n, H), axis=1)            # (TB, 32)
        y = ch_proj[:, l * H:(l + 1) * H] + y2[:, :H]                    # (M, 32)
        y = (y.reshape(tb, n, H) + gmean[:, None, :]).reshape(m, H) + b_ref[l]
        r = jnp.maximum(y, 0.0) if l < NUM_LAYERS - 1 else y             # no ReLU on conv8

    # conv8's single output channel (pi already folded in) lives in column 0.
    out_ref[...] = r.reshape(tb, n, H)[:, :, 0].astype(out_ref.dtype)


# ----------------------------- param packing -----------------------------
def pack_params(params, feature_dim, compute_dtype=jnp.float32):
    """Pack the 8 (weight, bias) pairs into:
         w_ch : (F, 8*32)      per-layer channel weights, transposed & stacked
         w_lg : (7, 32, 64)    [local | global] weights for conv2..conv8
         b_p  : (8, 32)        biases (f32)
       The final *pi of the model is folded into conv8's weights and bias."""
    F, H, L = feature_dim, HIDDEN, LOCAL_INFO_DIM
    w_ch = jnp.zeros((F, NUM_LAYERS * H), jnp.float32)
    w_lg = jnp.zeros((NUM_LAYERS - 1, H, 2 * H), jnp.float32)
    b_p = jnp.zeros((NUM_LAYERS, H), jnp.float32)
    for l, (w, b) in enumerate(params):
        scale = math.pi if l == NUM_LAYERS - 1 else 1.0
        w = jnp.asarray(w, jnp.float32) * scale
        b = jnp.asarray(b, jnp.float32) * scale
        o = w.shape[0]                                   # 32, or 1 for conv8
        w_ch = w_ch.at[:, l * H:l * H + o].set(w[:, :F].T)
        if l > 0:                                        # conv2..conv8 have local/global inputs
            w_lg = w_lg.at[l - 1, :L, :o].set(w[:, F:F + L].T)            # local half
            w_lg = w_lg.at[l - 1, L:H, H:H + o].set(w[:, F + L:F + H].T)  # global half
        b_p = b_p.at[l, :o].set(b)
    return w_ch.astype(compute_dtype), w_lg.astype(compute_dtype), b_p


def _bf16_matmul_default():
    """bf16 matmul operands are the MXU-native fast path on v6e / v7x."""
    try:
        kind = jax.devices()[0].device_kind.lower()
    except Exception:
        return False
    return any(tag in kind for tag in ("v6", "v7", "7x"))


# ------------------------------- wrappers ---------------------------------
def risnet_forward_nwc(x_nwc, params, *, batch_tile=None, use_bf16=None):
    """x_nwc: (B, N, F) float32 channel in NWC layout. Returns (B, 1, N)."""
    B, N, F = x_nwc.shape
    if use_bf16 is None:
        use_bf16 = _bf16_matmul_default()
    compute_dtype = jnp.bfloat16 if use_bf16 else jnp.float32
    w_ch, w_lg, b_p = pack_params(params, F, compute_dtype)

    # --- batch tiling: target M = TB*N ~ 1024, but keep >=2 (even) tiles so a
    # v7x dual-TensorCore chip shards the batch axis; keep TB 8-aligned so the
    # (TB*N, F) and (TB, N) blocks stay sublane-aligned. VMEM is not a
    # constraint at these sizes on any of v5e/v6e/v7x (< ~1 MiB per tile).
    if batch_tile is None:
        batch_tile = max(1, 1024 // max(N, 1))
        if B >= 2:
            batch_tile = min(batch_tile, pl.cdiv(B, 2))
    tb = max(1, min(batch_tile, B))
    if tb < B:                           # multiple tiles -> 8-align the tile
        tb = max(8, (tb + 7) // 8 * 8)
    num_tiles = pl.cdiv(B, tb)
    if num_tiles > 1 and num_tiles % 2:  # even tile count for v7x's two TCs
        num_tiles += 1
    b_pad = num_tiles * tb
    if b_pad != B:
        x_nwc = jnp.pad(x_nwc, ((0, b_pad - B), (0, 0), (0, 0)))

    m = tb * N
    x_flat = x_nwc.reshape(b_pad * N, F).astype(compute_dtype)   # free HBM reshape

    out = pl.pallas_call(
        partial(risnet_kernel, n_antennas=N),
        out_shape=jax.ShapeDtypeStruct((b_pad, N), jnp.float32),
        grid=(num_tiles,),
        in_specs=[
            pl.BlockSpec((m, F), lambda i: (i, 0)),          # flattened channel tile
            pl.BlockSpec(w_ch.shape, lambda i: (0, 0)),      # stacked channel weights (resident)
            pl.BlockSpec(w_lg.shape, lambda i: (0, 0, 0)),   # local|global weights (resident)
            pl.BlockSpec(b_p.shape, lambda i: (0, 0)),       # biases (resident)
        ],
        out_specs=pl.BlockSpec((tb, N), lambda i: (i, 0)),
        compiler_params=pltpu.CompilerParams(
            dimension_semantics=("parallel",)),
    )(x_flat, w_ch, w_lg, b_p)

    return out[:B][:, None, :]  # (B, 1, N), free reshape


def risnet_forward(channel_ncw, params, *, batch_tile=None, use_bf16=None):
    """channel_ncw: (B, F, N) float32 (PyTorch NCW). Returns (B, 1, N).

    Callers that already hold channels in NWC layout should call
    risnet_forward_nwc directly and skip this standalone HBM transpose."""
    x = jnp.transpose(channel_ncw, (0, 2, 1))  # (B, N, F)
    return risnet_forward_nwc(x, params, batch_tile=batch_tile, use_bf16=use_bf16)


# ----------------------- pure-JAX reference (check) -----------------------
def risnet_ref(channel, params):
    def conv1d(x, w, b):  # x: (B, C, N)
        return jnp.einsum("oc,bcn->bon", w, x) + b[None, :, None]

    def postprocess(ch, r, n):
        local = r[:, :LOCAL_INFO_DIM, :]
        glob = jnp.mean(r[:, -GLOBAL_INFO_DIM:, :], axis=2, keepdims=True)
        glob = jnp.repeat(glob, n, axis=2)
        return jnp.concatenate([ch, local, glob], axis=1)

    _, _, n = channel.shape
    r = jax.nn.relu(conv1d(channel, *params[0]))
    r = postprocess(channel, r, n)
    for li in range(1, 7):
        r = jax.nn.relu(conv1d(r, *params[li]))
        r = postprocess(channel, r, n)
    return conv1d(r, *params[7]) * math.pi


# ------------------------------ param init --------------------------------
def init_params(key, num_users):
    feature_dim = 4 * num_users
    dims = [(HIDDEN, feature_dim)]
    dims += [(HIDDEN, feature_dim + HIDDEN)] * 6
    dims += [(1, feature_dim + HIDDEN)]
    params = []
    for (o, c) in dims:
        key, kw, kb = jax.random.split(key, 3)
        bound = 1.0 / math.sqrt(c)  # PyTorch Conv default init range
        w = jax.random.uniform(kw, (o, c), jnp.float32, -bound, bound)
        b = jax.random.uniform(kb, (o,), jnp.float32, -bound, bound)
        params.append((w, b))
    return params


if __name__ == "__main__":
    num_users = 4          # feature_dim = 16
    batch = 32             # -> 2 batch tiles of TB=16 (M = 256 per tile)
    n_antennas = 16

    key = jax.random.PRNGKey(0)
    key, kx = jax.random.split(key)
    channel = jax.random.normal(kx, (batch, 4 * num_users, n_antennas), jnp.float32)
    params = init_params(key, num_users)

    # f32 path: strict check against the pure-JAX reference.
    out = jax.block_until_ready(risnet_forward(channel, params, use_bf16=False))
    ref = risnet_ref(channel, params)
    assert out.shape == (batch, 1, n_antennas)
    assert jnp.allclose(out, ref, atol=5e-4, rtol=5e-4), "f32 kernel mismatch vs reference"

    # Fast path (bf16 matmul operands auto-enabled on v6e/v7x): loose check.
    out_fast = jax.block_until_ready(risnet_forward(channel, params))
    assert out_fast.shape == (batch, 1, n_antennas)
    assert bool(jnp.all(jnp.isfinite(out_fast)))
    assert float(jnp.max(jnp.abs(out_fast - ref))) < 0.5, "fast path diverged"

    print("KERNEL_OK")
</pallas_src>

<mosaic_0001>
module attributes {stable_mosaic.version = 11 : i64} {
  func.func @risnet_kernel(%arg0: i32, %arg1: memref<256x16xf32, #tpu.memory_space<vmem>>, %arg2: memref<16x256xf32, #tpu.memory_space<vmem>>, %arg3: memref<7x32x64xf32, #tpu.memory_space<vmem>>, %arg4: memref<8x32xf32, #tpu.memory_space<vmem>>, %arg5: memref<16x16xf32, #tpu.memory_space<vmem>>) attributes {dimension_semantics = [#tpu.dimension_semantics<parallel>], iteration_bounds = array<i64: 2>, scalar_prefetch = 0 : i64, scratch_operands = 0 : i64, tpu.core_type = #tpu.core_type<tc>, window_params = [{transform_indices = @transform_0, window_bounds = array<i64: 256, 16>}, {pipeline_mode = #tpu.pipeline_mode<synchronous>, transform_indices = @transform_1, window_bounds = array<i64: 16, 256>}, {pipeline_mode = #tpu.pipeline_mode<synchronous>, transform_indices = @transform_2, window_bounds = array<i64: 7, 32, 64>}, {pipeline_mode = #tpu.pipeline_mode<synchronous>, transform_indices = @transform_3, window_bounds = array<i64: 8, 32>}, {transform_indices = @transform_4, window_bounds = array<i64: 16, 16>}]} {
    %c0 = arith.constant 0 : index
    %c0_0 = arith.constant 0 : index
    %0 = vector.load %arg1[%c0, %c0_0] : memref<256x16xf32, #tpu.memory_space<vmem>>, vector<256x16xf32>
    %c0_1 = arith.constant 0 : index
    %c0_2 = arith.constant 0 : index
    %1 = vector.load %arg2[%c0_1, %c0_2] : memref<16x256xf32, #tpu.memory_space<vmem>>, vector<16x256xf32>
    %cst = arith.constant dense<0.000000e+00> : vector<256x256xf32>
    %2 = tpu.matmul %0, %1, %cst {dimension_numbers = #tpu.dot_dimension_numbers<[1], [0], [0], [1], [0, 0, 1, 1], [], []>} : vector<256x16xf32>, vector<16x256xf32>, vector<256x256xf32> -> vector<256x256xf32>
    %3 = vector.extract_strided_slice %2 {offsets = [0, 0], sizes = [256, 32], strides = [1, 1]} : vector<256x256xf32> to vector<256x32xf32>
    %c0_3 = arith.constant 0 : index
    %c0_4 = arith.constant 0 : index
    %4 = vector.load %arg4[%c0_3, %c0_4] : memref<8x32xf32, #tpu.memory_space<vmem>>, vector<1x32xf32>
    %5 = vector.shape_cast %4 : vector<1x32xf32> to vector<32xf32>
    %6 = vector.shape_cast %5 : vector<32xf32> to vector<1x32xf32>
    %7 = vector.broadcast %6 : vector<1x32xf32> to vector<256x32xf32>
    %8 = arith.addf %3, %7 : vector<256x32xf32>
    %cst_5 = arith.constant 0.000000e+00 : f32
    %9 = vector.broadcast %cst_5 : f32 to vector<256x32xf32>
    %10 = arith.maximumf %8, %9 : vector<256x32xf32>
    %c0_6 = arith.constant 0 : index
    %c0_7 = arith.constant 0 : index
    %c0_8 = arith.constant 0 : index
    %11 = vector.load %arg3[%c0_6, %c0_7, %c0_8] : memref<7x32x64xf32, #tpu.memory_space<vmem>>, vector<1x32x64xf32>
    %12 = vector.shape_cast %11 : vector<1x32x64xf32> to vector<32x64xf32>
    %cst_9 = arith.constant dense<0.000000e+00> : vector<256x64xf32>
    %13 = tpu.matmul %10, %12, %cst_9 {dimension_numbers = #tpu.dot_dimension_numbers<[1], [0], [0], [1], [0, 0, 1, 1], [], []>} : vector<256x32xf32>, vector<32x64xf32>, vector<256x64xf32> -> vector<256x64xf32>
    %14 = vector.extract_strided_slice %13 {offsets = [0, 32], sizes = [256, 32], strides = [1, 1]} : vector<256x64xf32> to vector<256x32xf32>
    %15 = vector.shape_cast %14 : vector<256x32xf32> to vector<16x16x32xf32>
    %cst_10 = arith.constant dense<0.000000e+00> : vector<16x32xf32>
    %16 = vector.multi_reduction <add>, %15, %cst_10 [1] : vector<16x16x32xf32> to vector<16x32xf32>
    %cst_11 = arith.constant 1.600000e+01 : f32
    %17 = vector.broadcast %cst_11 : f32 to vector<16x32xf32>
    %18 = arith.divf %16, %17 : vector<16x32xf32>
    %19 = vector.extract_strided_slice %2 {offsets = [0, 32], sizes = [256, 32], strides = [1, 1]} : vector<256x256xf32> to vector<256x32xf32>
    %20 = vector.extract_strided_slice %13 {offsets = [0, 0], sizes = [256, 32], strides = [1, 1]} : vector<256x64xf32> to vector<256x32xf32>
    %21 = arith.addf %19, %20 : vector<256x32xf32>
    %22 = vector.shape_cast %21 : vector<256x32xf32> to vector<16x16x32xf32>
    %23 = vector.shape_cast %18 : vector<16x32xf32> to vector<16x1x32xf32>
    %24 = vector.broadcast %23 : vector<16x1x32xf32> to vector<16x16x32xf32>
    %25 = arith.addf %22, %24 : vector<16x16x32xf32>
    %26 = vector.shape_cast %25 : vector<16x16x32xf32> to vector<256x32xf32>
    %c1 = arith.constant 1 : index
    %c0_12 = arith.constant 0 : index
    %27 = vector.load %arg4[%c1, %c0_12] : memref<8x32xf32, #tpu.memory_space<vmem>>, vector<1x32xf32>
    %28 = vector.shape_cast %27 : vector<1x32xf32> to vector<32xf32>
    %29 = vector.shape_cast %28 : vector<32xf32> to vector<1x32xf32>
    %30 = vector.broadcast %29 : vector<1x32xf32> to vector<256x32xf32>
    %31 = arith.addf %26, %30 : vector<256x32xf32>
    %cst_13 = arith.constant 0.000000e+00 : f32
    %32 = vector.broadcast %cst_13 : f32 to vector<256x32xf32>
    %33 = arith.maximumf %31, %32 : vector<256x32xf32>
    %c1_14 = arith.constant 1 : index
    %c0_15 = arith.constant 0 : index
    %c0_16 = arith.constant 0 : index
    %34 = vector.load %arg3[%c1_14, %c0_15, %c0_16] : memref<7x32x64xf32, #tpu.memory_space<vmem>>, vector<1x32x64xf32>
    %35 = vector.shape_cast %34 : vector<1x32x64xf32> to vector<32x64xf32>
    %cst_17 = arith.constant dense<0.000000e+00> : vector<256x64xf32>
    %36 = tpu.matmul %33, %35, %cst_17 {dimension_numbers = #tpu.dot_dimension_numbers<[1], [0], [0], [1], [0, 0, 1, 1], [], []>} : vector<256x32xf32>, vector<32x64xf32>, vector<256x64xf32> -> vector<256x64xf32>
    %37 = vector.extract_strided_slice %36 {offsets = [0, 32], sizes = [256, 32], strides = [1, 1]} : vector<256x64xf32> to vector<256x32xf32>
    %38 = vector.shape_cast %37 : vector<256x32xf32> to vector<16x16x32xf32>
    %cst_18 = arith.constant dense<0.000000e+00> : vector<16x32xf32>
    %39 = vector.multi_reduction <add>, %38, %cst_18 [1] : vector<16x16x32xf32> to vector<16x32xf32>
    %cst_19 = arith.constant 1.600000e+01 : f32
    %40 = vector.broadcast %cst_19 : f32 to vector<16x32xf32>
    %41 = arith.divf %39, %40 : vector<16x32xf32>
    %42 = vector.extract_strided_slice %2 {offsets = [0, 64], sizes = [256, 32], strides = [1, 1]} : vector<256x256xf32> to vector<256x32xf32>
    %43 = vector.extract_strided_slice %36 {offsets = [0, 0], sizes = [256, 32], strides = [1, 1]} : vector<256x64xf32> to vector<256x32xf32>
    %44 = arith.addf %42, %43 : vector<256x32xf32>
    %45 = vector.shape_cast %44 : vector<256x32xf32> to vector<16x16x32xf32>
    %46 = vector.shape_cast %41 : vector<16x32xf32> to vector<16x1x32xf32>
    %47 = vector.broadcast %46 : vector<16x1x32xf32> to vector<16x16x32xf32>
    %48 = arith.addf %45, %47 : vector<16x16x32xf32>
    %49 = vector.shape_cast %48 : vector<16x16x32xf32> to vector<256x32xf32>
    %c2 = arith.constant 2 : index
    %c0_20 = arith.constant 0 : index
    %50 = vector.load %arg4[%c2, %c0_20] : memref<8x32xf32, #tpu.memory_space<vmem>>, vector<1x32xf32>
    %51 = vector.shape_cast %50 : vector<1x32xf32> to vector<32xf32>
    %52 = vector.shape_cast %51 : vector<32xf32> to vector<1x32xf32>
    %53 = vector.broadcast %52 : vector<1x32xf32> to vector<256x32xf32>
    %54 = arith.addf %49, %53 : vector<256x32xf32>
    %cst_21 = arith.constant 0.000000e+00 : f32
    %55 = vector.broadcast %cst_21 : f32 to vector<256x32xf32>
    %56 = arith.maximumf %54, %55 : vector<256x32xf32>
    %c2_22 = arith.constant 2 : index
    %c0_23 = arith.constant 0 : index
    %c0_24 = arith.constant 0 : index
    %57 = vector.load %arg3[%c2_22, %c0_23, %c0_24] : memref<7x32x64xf32, #tpu.memory_space<vmem>>, vector<1x32x64xf32>
    %58 = vector.shape_cast %57 : vector<1x32x64xf32> to vector<32x64xf32>
    %cst_25 = arith.constant dense<0.000000e+00> : vector<256x64xf32>
    %59 = tpu.matmul %56, %58, %cst_25 {dimension_numbers = #tpu.dot_dimension_numbers<[1], [0], [0], [1], [0, 0, 1, 1], [], []>} : vector<256x32xf32>, vector<32x64xf32>, vector<256x64xf32> -> vector<256x64xf32>
    %60 = vector.extract_strided_slice %59 {offsets = [0, 32], sizes = [256, 32], strides = [1, 1]} : vector<256x64xf32> to vector<256x32xf32>
    %61 = vector.shape_cast %60 : vector<256x32xf32> to vector<16x16x32xf32>
    %cst_26 = arith.constant dense<0.000000e+00> : vector<16x32xf32>
    %62 = vector.multi_reduction <add>, %61, %cst_26 [1] : vector<16x16x32xf32> to vector<16x32xf32>
    %cst_27 = arith.constant 1.600000e+01 : f32
    %63 = vector.broadcast %cst_27 : f32 to vector<16x32xf32>
    %64 = arith.divf %62, %63 : vector<16x32xf32>
    %65 = vector.extract_strided_slice %2 {offsets = [0, 96], sizes = [256, 32], strides = [1, 1]} : vector<256x256xf32> to vector<256x32xf32>
    %66 = vector.extract_strided_slice %59 {offsets = [0, 0], sizes = [256, 32], strides = [1, 1]} : vector<256x64xf32> to vector<256x32xf32>
    %67 = arith.addf %65, %66 : vector<256x32xf32>
    %68 = vector.shape_cast %67 : vector<256x32xf32> to vector<16x16x32xf32>
    %69 = vector.shape_cast %64 : vector<16x32xf32> to vector<16x1x32xf32>
    %70 = vector.broadcast %69 : vector<16x1x32xf32> to vector<16x16x32xf32>
    %71 = arith.addf %68, %70 : vector<16x16x32xf32>
    %72 = vector.shape_cast %71 : vector<16x16x32xf32> to vector<256x32xf32>
    %c3 = arith.constant 3 : index
    %c0_28 = arith.constant 0 : index
    %73 = vector.load %arg4[%c3, %c0_28] : memref<8x32xf32, #tpu.memory_space<vmem>>, vector<1x32xf32>
    %74 = vector.shape_cast %73 : vector<1x32xf32> to vector<32xf32>
    %75 = vector.shape_cast %74 : vector<32xf32> to vector<1x32xf32>
    %76 = vector.broadcast %75 : vector<1x32xf32> to vector<256x32xf32>
    %77 = arith.addf %72, %76 : vector<256x32xf32>
    %cst_29 = arith.constant 0.000000e+00 : f32
    %78 = vector.broadcast %cst_29 : f32 to vector<256x32xf32>
    %79 = arith.maximumf %77, %78 : vector<256x32xf32>
    %c3_30 = arith.constant 3 : index
    %c0_31 = arith.constant 0 : index
    %c0_32 = arith.constant 0 : index
    %80 = vector.load %arg3[%c3_30, %c0_31, %c0_32] : memref<7x32x64xf32, #tpu.memory_space<vmem>>, vector<1x32x64xf32>
    %81 = vector.shape_cast %80 : vector<1x32x64xf32> to vector<32x64xf32>
    %cst_33 = arith.constant dense<0.000000e+00> : vector<256x64xf32>
    %82 = tpu.matmul %79, %81, %cst_33 {dimension_numbers = #tpu.dot_dimension_numbers<[1], [0], [0], [1], [0, 0, 1, 1], [], []>} : vector<256x32xf32>, vector<32x64xf32>, vector<256x64xf32> -> vector<256x64xf32>
    %83 = vector.extract_strided_slice %82 {offsets = [0, 32], sizes = [256, 32], strides = [1, 1]} : vector<256x64xf32> to vector<256x32xf32>
    %84 = vector.shape_cast %83 : vector<256x32xf32> to vector<16x16x32xf32>
    %cst_34 = arith.constant dense<0.000000e+00> : vector<16x32xf32>
    %85 = vector.multi_reduction <add>, %84, %cst_34 [1] : vector<16x16x32xf32> to vector<16x32xf32>
    %cst_35 = arith.constant 1.600000e+01 : f32
    %86 = vector.broadcast %cst_35 : f32 to vector<16x32xf32>
    %87 = arith.divf %85, %86 : vector<16x32xf32>
    %88 = vector.extract_strided_slice %2 {offsets = [0, 128], sizes = [256, 32], strides = [1, 1]} : vector<256x256xf32> to vector<256x32xf32>
    %89 = vector.extract_strided_slice %82 {offsets = [0, 0], sizes = [256, 32], strides = [1, 1]} : vector<256x64xf32> to vector<256x32xf32>
    %90 = arith.addf %88, %89 : vector<256x32xf32>
    %91 = vector.shape_cast %90 : vector<256x32xf32> to vector<16x16x32xf32>
    %92 = vector.shape_cast %87 : vector<16x32xf32> to vector<16x1x32xf32>
    %93 = vector.broadcast %92 : vector<16x1x32xf32> to vector<16x16x32xf32>
    %94 = arith.addf %91, %93 : vector<16x16x32xf32>
    %95 = vector.shape_cast %94 : vector<16x16x32xf32> to vector<256x32xf32>
    %c4 = arith.constant 4 : index
    %c0_36 = arith.constant 0 : index
    %96 = vector.load %arg4[%c4, %c0_36] : memref<8x32xf32, #tpu.memory_space<vmem>>, vector<1x32xf32>
    %97 = vector.shape_cast %96 : vector<1x32xf32> to vector<32xf32>
    %98 = vector.shape_cast %97 : vector<32xf32> to vector<1x32xf32>
    %99 = vector.broadcast %98 : vector<1x32xf32> to vector<256x32xf32>
    %100 = arith.addf %95, %99 : vector<256x32xf32>
    %cst_37 = arith.constant 0.000000e+00 : f32
    %101 = vector.broadcast %cst_37 : f32 to vector<256x32xf32>
    %102 = arith.maximumf %100, %101 : vector<256x32xf32>
    %c4_38 = arith.constant 4 : index
    %c0_39 = arith.constant 0 : index
    %c0_40 = arith.constant 0 : index
    %103 = vector.load %arg3[%c4_38, %c0_39, %c0_40] : memref<7x32x64xf32, #tpu.memory_space<vmem>>, vector<1x32x64xf32>
    %104 = vector.shape_cast %103 : vector<1x32x64xf32> to vector<32x64xf32>
    %cst_41 = arith.constant dense<0.000000e+00> : vector<256x64xf32>
    %105 = tpu.matmul %102, %104, %cst_41 {dimension_numbers = #tpu.dot_dimension_numbers<[1], [0], [0], [1], [0, 0, 1, 1], [], []>} : vector<256x32xf32>, vector<32x64xf32>, vector<256x64xf32> -> vector<256x64xf32>
    %106 = vector.extract_strided_slice %105 {offsets = [0, 32], sizes = [256, 32], strides = [1, 1]} : vector<256x64xf32> to vector<256x32xf32>
    %107 = vector.shape_cast %106 : vector<256x32xf32> to vector<16x16x32xf32>
    %cst_42 = arith.constant dense<0.000000e+00> : vector<16x32xf32>
    %108 = vector.multi_reduction <add>, %107, %cst_42 [1] : vector<16x16x32xf32> to vector<16x32xf32>
    %cst_43 = arith.constant 1.600000e+01 : f32
    %109 = vector.broadcast %cst_43 : f32 to vector<16x32xf32>
    %110 = arith.divf %108, %109 : vector<16x32xf32>
    %111 = vector.extract_strided_slice %2 {offsets = [0, 160], sizes = [256, 32], strides = [1, 1]} : vector<256x256xf32> to vector<256x32xf32>
    %112 = vector.extract_strided_slice %105 {offsets = [0, 0], sizes = [256, 32], strides = [1, 1]} : vector<256x64xf32> to vector<256x32xf32>
    %113 = arith.addf %111, %112 : vector<256x32xf32>
    %114 = vector.shape_cast %113 : vector<256x32xf32> to vector<16x16x32xf32>
    %115 = vector.shape_cast %110 : vector<16x32xf32> to vector<16x1x32xf32>
    %116 = vector.broadcast %115 : vector<16x1x32xf32> to vector<16x16x32xf32>
    %117 = arith.addf %114, %116 : vector<16x16x32xf32>
    %118 = vector.shape_cast %117 : vector<16x16x32xf32> to vector<256x32xf32>
    %c5 = arith.constant 5 : index
    %c0_44 = arith.constant 0 : index
    %119 = vector.load %arg4[%c5, %c0_44] : memref<8x32xf32, #tpu.memory_space<vmem>>, vector<1x32xf32>
    %120 = vector.shape_cast %119 : vector<1x32xf32> to vector<32xf32>
    %121 = vector.shape_cast %120 : vector<32xf32> to vector<1x32xf32>
    %122 = vector.broadcast %121 : vector<1x32xf32> to vector<256x32xf32>
    %123 = arith.addf %118, %122 : vector<256x32xf32>
    %cst_45 = arith.constant 0.000000e+00 : f32
    %124 = vector.broadcast %cst_45 : f32 to vector<256x32xf32>
    %125 = arith.maximumf %123, %124 : vector<256x32xf32>
    %c5_46 = arith.constant 5 : index
    %c0_47 = arith.constant 0 : index
    %c0_48 = arith.constant 0 : index
    %126 = vector.load %arg3[%c5_46, %c0_47, %c0_48] : memref<7x32x64xf32, #tpu.memory_space<vmem>>, vector<1x32x64xf32>
    %127 = vector.shape_cast %126 : vector<1x32x64xf32> to vector<32x64xf32>
    %cst_49 = arith.constant dense<0.000000e+00> : vector<256x64xf32>
    %128 = tpu.matmul %125, %127, %cst_49 {dimension_numbers = #tpu.dot_dimension_numbers<[1], [0], [0], [1], [0, 0, 1, 1], [], []>} : vector<256x32xf32>, vector<32x64xf32>, vector<256x64xf32> -> vector<256x64xf32>
    %129 = vector.extract_strided_slice %128 {offsets = [0, 32], sizes = [256, 32], strides = [1, 1]} : vector<256x64xf32> to vector<256x32xf32>
    %130 = vector.shape_cast %129 : vector<256x32xf32> to vector<16x16x32xf32>
    %cst_50 = arith.constant dense<0.000000e+00> : vector<16x32xf32>
    %131 = vector.multi_reduction <add>, %130, %cst_50 [1] : vector<16x16x32xf32> to vector<16x32xf32>
    %cst_51 = arith.constant 1.600000e+01 : f32
    %132 = vector.broadcast %cst_51 : f32 to vector<16x32xf32>
    %133 = arith.divf %131, %132 : vector<16x32xf32>
    %134 = vector.extract_strided_slice %2 {offsets = [0, 192], sizes = [256, 32], strides = [1, 1]} : vector<256x256xf32> to vector<256x32xf32>
    %135 = vector.extract_strided_slice %128 {offsets = [0, 0], sizes = [256, 32], strides = [1, 1]} : vector<256x64xf32> to vector<256x32xf32>
    %136 = arith.addf %134, %135 : vector<256x32xf32>
    %137 = vector.shape_cast %136 : vector<256x32xf32> to vector<16x16x32xf32>
    %138 = vector.shape_cast %133 : vector<16x32xf32> to vector<16x1x32xf32>
    %139 = vector.broadcast %138 : vector<16x1x32xf32> to vector<16x16x32xf32>
    %140 = arith.addf %137, %139 : vector<16x16x32xf32>
    %141 = vector.shape_cast %140 : vector<16x16x32xf32> to vector<256x32xf32>
    %c6 = arith.constant 6 : index
    %c0_52 = arith.constant 0 : index
    %142 = vector.load %arg4[%c6, %c0_52] : memref<8x32xf32, #tpu.memory_space<vmem>>, vector<1x32xf32>
    %143 = vector.shape_cast %142 : vector<1x32xf32> to vector<32xf32>
    %144 = vector.shape_cast %143 : vector<32xf32> to vector<1x32xf32>
    %145 = vector.broadcast %144 : vector<1x32xf32> to vector<256x32xf32>
    %146 = arith.addf %141, %145 : vector<256x32xf32>
    %cst_53 = arith.constant 0.000000e+00 : f32
    %147 = vector.broadcast %cst_53 : f32 to vector<256x32xf32>
    %148 = arith.maximumf %146, %147 : vector<256x32xf32>
    %c6_54 = arith.constant 6 : index
    %c0_55 = arith.constant 0 : index
    %c0_56 = arith.constant 0 : index
    %149 = vector.load %arg3[%c6_54, %c0_55, %c0_56] : memref<7x32x64xf32, #tpu.memory_space<vmem>>, vector<1x32x64xf32>
    %150 = vector.shape_cast %149 : vector<1x32x64xf32> to vector<32x64xf32>
    %cst_57 = arith.constant dense<0.000000e+00> : vector<256x64xf32>
    %151 = tpu.matmul %148, %150, %cst_57 {dimension_numbers = #tpu.dot_dimension_numbers<[1], [0], [0], [1], [0, 0, 1, 1], [], []>} : vector<256x32xf32>, vector<32x64xf32>, vector<256x64xf32> -> vector<256x64xf32>
    %152 = vector.extract_strided_slice %151 {offsets = [0, 32], sizes = [256, 32], strides = [1, 1]} : vector<256x64xf32> to vector<256x32xf32>
    %153 = vector.shape_cast %152 : vector<256x32xf32> to vector<16x16x32xf32>
    %cst_58 = arith.constant dense<0.000000e+00> : vector<16x32xf32>
    %154 = vector.multi_reduction <add>, %153, %cst_58 [1] : vector<16x16x32xf32> to vector<16x32xf32>
    %cst_59 = arith.constant 1.600000e+01 : f32
    %155 = vector.broadcast %cst_59 : f32 to vector<16x32xf32>
    %156 = arith.divf %154, %155 : vector<16x32xf32>
    %157 = vector.extract_strided_slice %2 {offsets = [0, 224], sizes = [256, 32], strides = [1, 1]} : vector<256x256xf32> to vector<256x32xf32>
    %158 = vector.extract_strided_slice %151 {offsets = [0, 0], sizes = [256, 32], strides = [1, 1]} : vector<256x64xf32> to vector<256x32xf32>
    %159 = arith.addf %157, %158 : vector<256x32xf32>
    %160 = vector.shape_cast %159 : vector<256x32xf32> to vector<16x16x32xf32>
    %161 = vector.shape_cast %156 : vector<16x32xf32> to vector<16x1x32xf32>
    %162 = vector.broadcast %161 : vector<16x1x32xf32> to vector<16x16x32xf32>
    %163 = arith.addf %160, %162 : vector<16x16x32xf32>
    %164 = vector.shape_cast %163 : vector<16x16x32xf32> to vector<256x32xf32>
    %c7 = arith.constant 7 : index
    %c0_60 = arith.constant 0 : index
    %165 = vector.load %arg4[%c7, %c0_60] : memref<8x32xf32, #tpu.memory_space<vmem>>, vector<1x32xf32>
    %166 = vector.shape_cast %165 : vector<1x32xf32> to vector<32xf32>
    %167 = vector.shape_cast %166 : vector<32xf32> to vector<1x32xf32>
    %168 = vector.broadcast %167 : vector<1x32xf32> to vector<256x32xf32>
    %169 = arith.addf %164, %168 : vector<256x32xf32>
    %170 = vector.shape_cast %169 : vector<256x32xf32> to vector<16x16x32xf32>
    %171 = vector.extract_strided_slice %170 {offsets = [0, 0, 0], sizes = [16, 16, 1], strides = [1, 1, 1]} : vector<16x16x32xf32> to vector<16x16x1xf32>
    %172 = vector.shape_cast %171 : vector<16x16x1xf32> to vector<16x16xf32>
    %c0_61 = arith.constant 0 : index
    %c0_62 = arith.constant 0 : index
    %173 = vector.load %arg5[%c0_61, %c0_62] : memref<16x16xf32, #tpu.memory_space<vmem>>, vector<16x16xf32>
    tpu.vector_store %arg5[%c0_61, %c0_62], %172 {strides = array<i32>} : memref<16x16xf32, #tpu.memory_space<vmem>>, vector<16x16xf32>,
    return
  }
  func.func @transform_0(%arg0: i32) -> (i32, i32) {
    %c0_i32 = arith.constant 0 : i32
    %c0_i32_0 = arith.constant 0 : i32
    return %arg0, %c0_i32 : i32, i32
  }
  func.func @transform_1(%arg0: i32) -> (i32, i32) {
    %c0_i32 = arith.constant 0 : i32
    %c0_i32_0 = arith.constant 0 : i32
    %c0_i32_1 = arith.constant 0 : i32
    return %c0_i32, %c0_i32_0 : i32, i32
  }
  func.func @transform_2(%arg0: i32) -> (i32, i32, i32) {
    %c0_i32 = arith.constant 0 : i32
    %c0_i32_0 = arith.constant 0 : i32
    %c0_i32_1 = arith.constant 0 : i32
    %c0_i32_2 = arith.constant 0 : i32
    return %c0_i32, %c0_i32_0, %c0_i32_1 : i32, i32, i32
  }
  func.func @transform_3(%arg0: i32) -> (i32, i32) {
    %c0_i32 = arith.constant 0 : i32
    %c0_i32_0 = arith.constant 0 : i32
    %c0_i32_1 = arith.constant 0 : i32
    return %c0_i32, %c0_i32_0 : i32, i32
  }
  func.func @transform_4(%arg0: i32) -> (i32, i32) {
    %c0_i32 = arith.constant 0 : i32
    %c0_i32_0 = arith.constant 0 : i32
    return %arg0, %c0_i32 : i32, i32
  }
}

</mosaic_0001>

<bundles_post_ra>
// kernel: tpu_custom_call.1
= control target key start
LH: loop header
LB: loop body
LE: loop exit
PB: predicated region body
PF: predicated region fallthrough
CT: control target
= control target key end

     0   :  { %s7810_s15 = smov 0   ;;  %s9888_s0 = inlined_call_operand.vmem [shape: f32[512,16], index: 0, kind: input, shape index: {}]   ;;  %s9889_s1 = inlined_call_operand.vmem [shape: f32[16,256], index: 1, kind: input, shape index: {}]   ;;  %s9890_s2 = inlined_call_operand.vmem [shape: f32[7,32,64], index: 2, kind: input, shape index: {}]   ;;  %s9891_s3 = inlined_call_operand.vmem [shape: f32[8,32], index: 3, kind: input, shape index: {}]   ;;  %s9892_s4 = inlined_call_operand.vmem [shape: f32[32,16], index: 4, kind: output, shape index: {}]  }
   0x1 LB: > { %s6752_s16 = sadd.s32 4294967295, %s7778_s15   ;;  %p6756_p0 = scmp.ge.s32.totalorder %s7778_s15, 1  ;;  %s7778_s15 = sphi %s7810_s15, %s14_s15  }
   0x2   : > { %p163_p1 = scmp.lt.s32.totalorder %s7778_s15, 3 }
   0x4   : > { %p164_p2 = pnand %p6756_p0, %p163_p1 }
   0x6   : > { %167 = sbr.rel (%p164_p2) target bundleno = 3493 (0xda5), region = 36 }
   0xd   : > { %v234_v0 = vld [vmem:[%s9889_s1 + $0x8] sm:$0xff]  ;;  %v236_v1 = vld [vmem:[%s9889_s1 + $0x18] sm:$0xff]  ;;  %v233_v2 = vld [vmem:[%s9889_s1] sm:$0xff]  ;;  %s6757_s23 = sshll.u32 %s6752_s16, 5  ;;  %v7780_v5 = vmov 0.0   ;;  %vm237_vm0 = vcmask 130048  }
   0xe   : > { %v7695_v3 = vpack.c.bf16 %v236_v1, %v234_v0  ;;  %v235_v4 = vld [vmem:[%s9889_s1 + $0x10] sm:$0xff]  ;;  %398 = vmatprep.mubr.f32.mxu0 %v7780_v5  ;;  %p190_p3 = scmp.lt.s32.totalorder %s6757_s23, 63  ;;  %542 = vmatprep.mubr.f32.mxu1 %v7780_v5  ;;  %v660_v6 = vld [vmem:[%s9890_s2] sm:$0xff]  ;;  %v661_v7 = vld [vmem:[%s9890_s2 + $0x8] sm:$0xff]  ;;  %vm664_vm1 = vcmask 261120   ;;  %s7781_s18 = smov 32  }
   0xf   : > { %v7697_v8 = vpack.c.bf16 %v235_v4, %v233_v2  ;;  %v7699_v9 = vpack.c.bf16 %v661_v7, %v660_v6  ;;  %v662_v41 = vld [vmem:[%s9890_s2 + $0x10] sm:$0xff]  ;;  %v663_v42 = vld [vmem:[%s9890_s2 + $0x18] sm:$0xff]  ;;  %v7948_v45 = vld [vmem:[%s9891_s3] ss:$0 sm:$0xff]  ;;  %vm986_vm2 = vcmask 523520   ;;  %s7782_s27 = smov 96  }
  0x10   : > { %7696 = vmatprep.subr.bf16.mxu0 %v7695_v3  ;;  %s10031_s23 = smov (!%p190_p3, %s6757_s23), 63  ;;  %7755 = vmatprep.subr.bf16.mxu1 %v7695_v3  ;;  %v7703_v43 = vpack.c.bf16 %v663_v42, %v662_v41  ;;  %vm6534_vm3 = vcmask 130112   ;;  %vm6671_vm4 = vcmask 1041409   ;;  %vm6673_vm5 = vcmask 1042434  }
  0x11   : > { %7698 = vmatpush1.bf16.msra.mxu0 %v7697_v8  ;;  %7756 = vmatpush1.bf16.msra.mxu1 %v7697_v8  ;;  %s6758_s30 = sshll.u32 %s10031_s23, 3  ;;  %vm6675_vm6 = vcmask 1043459   ;;  %vm6677_vm7 = vcmask 1044484   ;;  %vm6679_vm8 = vcmask 1045509   ;;  %vm6681_vm9 = vcmask 1046534  }
  0x12   : > { %7700 = vmatprep.subr.bf16.mxu1 %v7699_v9  ;;  %s7843_s7 = scalar_lea.vmem %s9888_s0, %s6758_s30  ;;  %s7783_s30 = smov 64   ;;  %vm6683_vm10 = vcmask 1047559  }
  0x13   : > { %v201_v10 = vld [vmem:[%s7843_s7] sm:$0xff]  ;;  %v202_v11 = vld [vmem:[%s7843_s7 + $0x8] sm:$0xff]  ;;  %v203_v12 = vld [vmem:[%s7843_s7 + $0x10] sm:$0xff] }
  0x14   : > { %6761 = vmatmul.mubr.msk.f32.vlgmr.msra.gmra.mrb[0].mxu0 %vm237_vm0, %v201_v10  ;;  %v225_v13 = vld [vmem:[%s7843_s7 + $0xc0] sm:$0xff]  ;;  %v226_v14 = vld [vmem:[%s7843_s7 + $0xc8] sm:$0xff]  ;;  %v204_v15 = vld [vmem:[%s7843_s7 + $0x18] sm:$0xff] }
  0x15   : > { %404 = vmatprep.mubr.f32.mxu0 %v7780_v5  ;;  %6785 = vmatmul.mubr.msk.f32.vlgmr.msra.gmra.mrb[0].mxu1 %vm237_vm0, %v225_v13  ;;  %v227_v16 = vld [vmem:[%s7843_s7 + $0xd0] sm:$0xff]  ;;  %v205_v17 = vld [vmem:[%s7843_s7 + $0x20] sm:$0xff]  ;;  %v228_v18 = vld [vmem:[%s7843_s7 + $0xd8] sm:$0xff] }
  0x16   : > { %548 = vmatprep.mubr.f32.mxu1 %v7780_v5  ;;  %7702 = vmatpush3.bf16.msra.mxu1 %v7699_v9  ;;  %v206_v19 = vld [vmem:[%s7843_s7 + $0x28] sm:$0xff]  ;;  %v229_v20 = vld [vmem:[%s7843_s7 + $0xe0] sm:$0xff]  ;;  %v207_v21 = vld [vmem:[%s7843_s7 + $0x30] sm:$0xff] }
  0x17   : > { %v230_v22 = vld [vmem:[%s7843_s7 + $0xe8] sm:$0xff]  ;;  %v208_v23 = vld [vmem:[%s7843_s7 + $0x38] sm:$0xff]  ;;  %v231_v24 = vld [vmem:[%s7843_s7 + $0xf0] sm:$0xff]  ;;  %7704 = vmatprep.subr.bf16.mxu1 %v7703_v43 }
  0x18   : > { %6762 = vmatmul.mubr.msk.f32.gmra.mrb[2].mxu0 %vm237_vm0, %v202_v11  ;;  %v209_v25 = vld [vmem:[%s7843_s7 + $0x40] sm:$0xff]  ;;  %v232_v26 = vld [vmem:[%s7843_s7 + $0xf8] sm:$0xff]  ;;  %v210_v27 = vld [vmem:[%s7843_s7 + $0x48] sm:$0xff] }
  0x19   : > { %410 = vmatprep.mubr.f32.mxu0 %v7780_v5  ;;  %6786 = vmatmul.mubr.msk.f32.gmra.mrb[2].mxu1 %vm237_vm0, %v226_v14  ;;  %v211_v28 = vld [vmem:[%s7843_s7 + $0x50] sm:$0xff]  ;;  %v212_v29 = vld [vmem:[%s7843_s7 + $0x58] sm:$0xff]  ;;  %v213_v30 = vld [vmem:[%s7843_s7 + $0x60] sm:$0xff] }
  0x1a   : > { %554 = vmatprep.mubr.f32.mxu1 %v7780_v5  ;;  %v214_v31 = vld [vmem:[%s7843_s7 + $0x68] sm:$0xff]  ;;  %v215_v32 = vld [vmem:[%s7843_s7 + $0x70] sm:$0xff]  ;;  %v216_v33 = vld [vmem:[%s7843_s7 + $0x78] sm:$0xff]  ;;  %7706 = vmatpush3.bf16.msra.mxu1 %v7703_v43 }
  0x1b   : > { %v217_v34 = vld [vmem:[%s7843_s7 + $0x80] sm:$0xff]  ;;  %v218_v35 = vld [vmem:[%s7843_s7 + $0x88] sm:$0xff]  ;;  %v219_v36 = vld [vmem:[%s7843_s7 + $0x90] sm:$0xff] }
  0x1c   : > { %6763 = vmatmul.mubr.msk.f32.gmra.mrb[4].mxu0 %vm237_vm0, %v203_v12  ;;  %v220_v37 = vld [vmem:[%s7843_s7 + $0x98] sm:$0xff]  ;;  %v221_v38 = vld [vmem:[%s7843_s7 + $0xa0] sm:$0xff]  ;;  %v222_v39 = vld [vmem:[%s7843_s7 + $0xa8] sm:$0xff] }
  0x1d   : > { %416 = vmatprep.mubr.f32.mxu0 %v7780_v5  ;;  %6787 = vmatmul.mubr.msk.f32.gmra.mrb[4].mxu1 %vm237_vm0, %v227_v16  ;;  %v223_v40 = vld [vmem:[%s7843_s7 + $0xb0] sm:$0xff]  ;;  %v224_v44 = vld [vmem:[%s7843_s7 + $0xb8] sm:$0xff] }
  0x1e   : > { %560 = vmatprep.mubr.f32.mxu1 %v7780_v5 }
  0x20   : > { %6764 = vmatmul.mubr.msk.f32.gmra.mrb[6].mxu0 %vm237_vm0, %v204_v15 }
  0x21   : > { %422 = vmatprep.mubr.f32.mxu0 %v7780_v5  ;;  %6788 = vmatmul.mubr.msk.f32.gmra.mrb[6].mxu1 %vm237_vm0, %v228_v18 }
  0x22   : > { %566 = vmatprep.mubr.f32.mxu1 %v7780_v5 }
  0x24   : > { %6765 = vmatmul.mubr.msk.f32.gmra.mrb[8].mxu0 %vm237_vm0, %v205_v17 }
  0x25   : > { %428 = vmatprep.mubr.f32.mxu0 %v7780_v5  ;;  %6789 = vmatmul.mubr.msk.f32.gmra.mrb[8].mxu1 %vm237_vm0, %v229_v20 }
  0x26   : > { %572 = vmatprep.mubr.f32.mxu1 %v7780_v5 }
  0x28   : > { %6766 = vmatmul.mubr.msk.f32.gmra.mrb[10].mxu0 %vm237_vm0, %v206_v19 }
  0x29   : > { %434 = vmatprep.mubr.f32.mxu0 %v7780_v5  ;;  %6790 = vmatmul.mubr.msk.f32.gmra.mrb[10].mxu1 %vm237_vm0, %v230_v22 }
  0x2a   : > { %578 = vmatprep.mubr.f32.mxu1 %v7780_v5 }
  0x2c   : > { %6767 = vmatmul.mubr.msk.f32.gmra.mrb[12].mxu0 %vm237_vm0, %v207_v21 }
  0x2d   : > { %440 = vmatprep.mubr.f32.mxu0 %v7780_v5  ;;  %6791 = vmatmul.mubr.msk.f32.gmra.mrb[12].mxu1 %vm237_vm0, %v231_v24 }
  0x2e   : > { %584 = vmatprep.mubr.f32.mxu1 %v7780_v5 }
  0x30   : > { %6768 = vmatmul.mubr.msk.f32.gmra.mrb[14].mxu0 %vm237_vm0, %v208_v23 }
  0x31   : > { %446 = vmatprep.mubr.f32.mxu0 %v7780_v5  ;;  %6792 = vmatmul.mubr.msk.f32.gmra.mrb[14].mxu1 %vm237_vm0, %v232_v26 }
  0x34   : > { %6769 = vmatmul.mubr.msk.f32.gmra.mrb[16].mxu0 %vm237_vm0, %v209_v25 }
  0x35   : > { %452 = vmatprep.mubr.f32.mxu0 %v7780_v5 }
  0x38   : > { %6770 = vmatmul.mubr.msk.f32.gmra.mrb[18].mxu0 %vm237_vm0, %v210_v27 }
  0x39   : > { %458 = vmatprep.mubr.f32.mxu0 %v7780_v5 }
  0x3c   : > { %6771 = vmatmul.mubr.msk.f32.gmra.mrb[20].mxu0 %vm237_vm0, %v211_v28 }
  0x3d   : > { %464 = vmatprep.mubr.f32.mxu0 %v7780_v5 }
  0x40   : > { %6772 = vmatmul.mubr.msk.f32.gmra.mrb[22].mxu0 %vm237_vm0, %v212_v29 }
  0x41   : > { %470 = vmatprep.mubr.f32.mxu0 %v7780_v5 }
  0x44   : > { %6773 = vmatmul.mubr.msk.f32.gmra.mrb[24].mxu0 %vm237_vm0, %v213_v30 }
  0x45   : > { %476 = vmatprep.mubr.f32.mxu0 %v7780_v5 }
  0x48   : > { %6774 = vmatmul.mubr.msk.f32.gmra.mrb[26].mxu0 %vm237_vm0, %v214_v31 }
  0x49   : > { %482 = vmatprep.mubr.f32.mxu0 %v7780_v5 }
  0x4c   : > { %6775 = vmatmul.mubr.msk.f32.gmra.mrb[28].mxu0 %vm237_vm0, %v215_v32 }
  0x4d   : > { %488 = vmatprep.mubr.f32.mxu0 %v7780_v5 }
  0x50   : > { %6776 = vmatmul.mubr.msk.f32.gmra.mrb[30].mxu0 %vm237_vm0, %v216_v33 }
  0x51   : > { %494 = vmatprep.mubr.f32.mxu0 %v7780_v5 }
  0x54   : > { %6777 = vmatmul.mubr.msk.f32.gmra.mrb[32].mxu0 %vm237_vm0, %v217_v34 }
  0x55   : > { %500 = vmatprep.mubr.f32.mxu0 %v7780_v5 }
  0x58   : > { %6778 = vmatmul.mubr.msk.f32.gmra.mrb[34].mxu0 %vm237_vm0, %v218_v35 }
  0x59   : > { %506 = vmatprep.mubr.f32.mxu0 %v7780_v5 }
  0x5c   : > { %6779 = vmatmul.mubr.msk.f32.gmra.mrb[36].mxu0 %vm237_vm0, %v219_v36 }
  0x5d   : > { %512 = vmatprep.mubr.f32.mxu0 %v7780_v5 }
  0x60   : > { %6780 = vmatmul.mubr.msk.f32.gmra.mrb[38].mxu0 %vm237_vm0, %v220_v37 }
  0x61   : > { %518 = vmatprep.mubr.f32.mxu0 %v7780_v5 }
  0x64   : > { %6781 = vmatmul.mubr.msk.f32.gmra.mrb[40].mxu0 %vm237_vm0, %v221_v38 }
  0x65   : > { %524 = vmatprep.mubr.f32.mxu0 %v7780_v5 }
  0x68   : > { %6782 = vmatmul.mubr.msk.f32.gmra.mrb[42].mxu0 %vm237_vm0, %v222_v39 }
  0x69   : > { %530 = vmatprep.mubr.f32.mxu0 %v7780_v5 }
  0x6c   : > { %6783 = vmatmul.mubr.msk.f32.gmra.mrb[44].mxu0 %vm237_vm0, %v223_v40 }
  0x6d   : > { %536 = vmatprep.mubr.f32.mxu0 %v7780_v5 }
  0x70   : > { %6784 = vmatmul.mubr.msk.f32.gmra.mrb[46].mxu0 %vm237_vm0, %v224_v44 }
  0xe7   : > { %v7950_v46 = vpop.f32.mrb[0].mxu0 }
  0xe8   : > { %9933 = vst [vmem:[#allocation2_spill] sm:$0xff] %v7950_v46  ;;  %v596_v47 = vadd.f32 %v7948_v45, %v7950_v46  ;;  %v7954_v48 = vpop.f32.mrb[1].mxu0  ;;  %v7963_v54 = vpop.f32.mrb[0].mxu1 }
  0xe9   : > { %9934 = vst [vmem:[#allocation3_spill] sm:$0xff] %v7954_v48  ;;  %v7967_v56 = vpop.f32.mrb[1].mxu1 }
  0xea   : > { %v628_v49 = vmax.f32 %v596_v47, 0.0  ;;  %9936 = vst [vmem:[#allocation5_spill] sm:$0xff] %v7967_v56 }
  0xeb   : > { %v7956_v50 = vpop.f32.mrb[2].mxu0 }
  0xec   : > { %v597_v51 = vadd.f32 %v7948_v45, %v7956_v50  ;;  %v7960_v52 = vpop.f32.mrb[3].mxu0  ;;  %7311 = vmatprep.mubr.msk.f32.mxu1 %vm664_vm1, %v628_v49  ;;  %v7974_v60 = vpop.f32.mrb[2].mxu1 }
  0xed   : > { %9935 = vst [vmem:[#allocation4_spill] sm:$0xff] %v7960_v52  ;;  %v7978_v62 = vpop.f32.mrb[3].mxu1 }
  0xee   : > { %v629_v53 = vmax.f32 %v597_v51, 0.0  ;;  %9938 = vst [vmem:[#allocation7_spill] sm:$0xff] %v7978_v62 }
  0xef   : > { %v7965_v55 = vpop.f32.mrb[4].mxu0 }
  0xf0   : > { %v598_v57 = vadd.f32 %v7948_v45, %v7965_v55  ;;  %v7971_v58 = vpop.f32.mrb[5].mxu0  ;;  %7312 = vmatmul.mubr.msk.f32.vlgmr.msra.gmra.mrb[16].mxu1 %vm664_vm1, %v629_v53  ;;  %v7985_v2 = vpop.f32.mrb[4].mxu1 }
  0xf1   : > { %9937 = vst [vmem:[#allocation6_spill] sm:$0xff] %v7971_v58  ;;  %v7989_v4 = vpop.f32.mrb[5].mxu1 }
  0xf2   : > { %v630_v59 = vmax.f32 %v598_v57, 0.0  ;;  %9940 = vst [vmem:[#allocation9_spill] sm:$0xff] %v7989_v4 }
  0xf3   : > { %v7976_v61 = vpop.f32.mrb[6].mxu0 }
  0xf4   : > { %v599_v63 = vadd.f32 %v7948_v45, %v7976_v61  ;;  %v7982_v0 = vpop.f32.mrb[7].mxu0  ;;  %7314 = vmatprep.mubr.msk.f32.mxu1 %vm664_vm1, %v630_v59  ;;  %v7996_v8 = vpop.f32.mrb[6].mxu1 }
  0xf5   : > { %9939 = vst [vmem:[#allocation8_spill] sm:$0xff] %v7982_v0  ;;  %v8000_v10 = vpop.f32.mrb[7].mxu1 }
  0xf6   : > { %v631_v1 = vmax.f32 %v599_v63, 0.0  ;;  %9942 = vst [vmem:[#allocation11_spill] sm:$0xff] %v8000_v10 }
  0xf7   : > { %v7987_v3 = vpop.f32.mrb[8].mxu0 }
  0xf8   : > { %v600_v5 = vadd.f32 %v7948_v45, %v7987_v3  ;;  %v7993_v6 = vpop.f32.mrb[9].mxu0  ;;  %7315 = vmatmul.mubr.msk.f32.gmra.mrb[18].mxu1 %vm664_vm1, %v631_v1  ;;  %v8007_v14 = vpop.f32.mrb[8].mxu1 }
  0xf9   : > { %9941 = vst [vmem:[#allocation10_spill] sm:$0xff] %v7993_v6  ;;  %9944 = vst [vmem:[#allocation13_spill] sm:$0xff] %v8007_v14  ;;  %v8011_v16 = vpop.f32.mrb[9].mxu1 }
  0xfa   : > { %v632_v7 = vmax.f32 %v600_v5, 0.0  ;;  %9945 = vst [vmem:[#allocation14_spill] sm:$0xff] %v8011_v16 }
  0xfb   : > { %v7998_v9 = vpop.f32.mrb[10].mxu0 }
  0xfc   : > { %v601_v11 = vadd.f32 %v7948_v45, %v7998_v9  ;;  %v8004_v12 = vpop.f32.mrb[11].mxu0  ;;  %7317 = vmatprep.mubr.msk.f32.mxu1 %vm664_vm1, %v632_v7  ;;  %v8018_v20 = vpop.f32.mrb[10].mxu1 }
  0xfd   : > { %9943 = vst [vmem:[#allocation12_spill] sm:$0xff] %v8004_v12  ;;  %v8022_v22 = vpop.f32.mrb[11].mxu1 }
  0xfe   : > { %v633_v13 = vmax.f32 %v601_v11, 0.0  ;;  %9947 = vst [vmem:[#allocation16_spill] sm:$0xff] %v8022_v22 }
  0xff   : > { %v8009_v15 = vpop.f32.mrb[12].mxu0 }
 0x100   : > { %v602_v17 = vadd.f32 %v7948_v45, %v8009_v15  ;;  %v8015_v18 = vpop.f32.mrb[13].mxu0  ;;  %7318 = vmatmul.mubr.msk.f32.gmra.mrb[20].mxu1 %vm664_vm1, %v633_v13  ;;  %v8029_v26 = vpop.f32.mrb[12].mxu1 }
 0x101   : > { %9946 = vst [vmem:[#allocation15_spill] sm:$0xff] %v8015_v18  ;;  %9949 = vst [vmem:[#allocation18_spill] sm:$0xff] %v8029_v26  ;;  %v8033_v28 = vpop.f32.mrb[13].mxu1 }
 0x102   : > { %v634_v19 = vmax.f32 %v602_v17, 0.0  ;;  %9950 = vst [vmem:[#allocation19_spill] sm:$0xff] %v8033_v28 }
 0x103   : > { %v8020_v21 = vpop.f32.mrb[14].mxu0 }
 0x104   : > { %v603_v23 = vadd.f32 %v7948_v45, %v8020_v21  ;;  %v8026_v24 = vpop.f32.mrb[15].mxu0  ;;  %7320 = vmatprep.mubr.msk.f32.mxu1 %vm664_vm1, %v634_v19  ;;  %v8040_v32 = vpop.f32.mrb[14].mxu1 }
 0x105   : > { %9948 = vst [vmem:[#allocation17_spill] sm:$0xff] %v8026_v24  ;;  %9952 = vst [vmem:[#allocation21_spill] sm:$0xff] %v8040_v32  ;;  %v8044_v34 = vpop.f32.mrb[15].mxu1 }
 0x106   : > { %v635_v25 = vmax.f32 %v603_v23, 0.0  ;;  %9953 = vst [vmem:[#allocation22_spill] sm:$0xff] %v8044_v34 }
 0x107   : > { %v8031_v27 = vpop.f32.mrb[16].mxu0 }
 0x108   : > { %v604_v29 = vadd.f32 %v7948_v45, %v8031_v27  ;;  %v8037_v30 = vpop.f32.mrb[17].mxu0  ;;  %7321 = vmatmul.mubr.msk.f32.gmra.mrb[22].mxu1 %vm664_vm1, %v635_v25 }
 0x109   : > { %9951 = vst [vmem:[#allocation20_spill] sm:$0xff] %v8037_v30 }
 0x10a   : > { %v636_v31 = vmax.f32 %v604_v29, 0.0 }
 0x10b   : > { %v8042_v33 = vpop.f32.mrb[18].mxu0 }
 0x10c   : > { %v605_v35 = vadd.f32 %v7948_v45, %v8042_v33  ;;  %v8048_v36 = vpop.f32.mrb[19].mxu0  ;;  %7323 = vmatprep.mubr.msk.f32.mxu1 %vm664_vm1, %v636_v31 }
 0x10d   : > { %9954 = vst [vmem:[#allocation23_spill] sm:$0xff] %v8048_v36 }
 0x10e   : > { %v637_v37 = vmax.f32 %v605_v35, 0.0 }
 0x10f   : > { %v8051_v38 = vpop.f32.mrb[20].mxu0 }
 0x110   : > { %v606_v39 = vadd.f32 %v7948_v45, %v8051_v38  ;;  %v8055_v40 = vpop.f32.mrb[21].mxu0  ;;  %7324 = vmatmul.mubr.msk.f32.gmra.mrb[24].mxu1 %vm664_vm1, %v637_v37 }
 0x111   : > { %9955 = vst [vmem:[#allocation24_spill] sm:$0xff] %v8055_v40 }
 0x112   : > { %v638_v41 = vmax.f32 %v606_v39, 0.0 }
 0x113   : > { %v8058_v42 = vpop.f32.mrb[22].mxu0 }
 0x114   : > { %v607_v43 = vadd.f32 %v7948_v45, %v8058_v42  ;;  %v8062_v44 = vpop.f32.mrb[23].mxu0  ;;  %7326 = vmatprep.mubr.msk.f32.mxu1 %vm664_vm1, %v638_v41 }
 0x115   : > { %9956 = vst [vmem:[#allocation25_spill] sm:$0xff] %v8062_v44 }
 0x116   : > { %v639_v47 = vmax.f32 %v607_v43, 0.0 }
 0x117   : > { %v8065_v49 = vpop.f32.mrb[24].mxu0 }
 0x118   : > { %v608_v51 = vadd.f32 %v7948_v45, %v8065_v49  ;;  %v8069_v53 = vpop.f32.mrb[25].mxu0  ;;  %7327 = vmatmul.mubr.msk.f32.gmra.mrb[26].mxu1 %vm664_vm1, %v639_v47 }
 0x119   : > { %9957 = vst [vmem:[#allocation26_spill] sm:$0xff] %v8069_v53 }
 0x11a   : > { %v640_v57 = vmax.f32 %v608_v51, 0.0 }
 0x11b   : > { %v8072_v59 = vpop.f32.mrb[26].mxu0 }
 0x11c   : > { %v609_v63 = vadd.f32 %v7948_v45, %v8072_v59  ;;  %v8076_v1 = vpop.f32.mrb[27].mxu0  ;;  %7329 = vmatprep.mubr.msk.f32.mxu1 %vm664_vm1, %v640_v57 }
 0x11d   : > { %9958 = vst [vmem:[#allocation27_spill] sm:$0xff] %v8076_v1 }
 0x11e   : > { %v641_v5 = vmax.f32 %v609_v63, 0.0 }
 0x11f   : > { %v8079_v7 = vpop.f32.mrb[28].mxu0 }
 0x120   : > { %v610_v11 = vadd.f32 %v7948_v45, %v8079_v7  ;;  %v8083_v13 = vpop.f32.mrb[29].mxu0  ;;  %7330 = vmatmul.mubr.msk.f32.gmra.mrb[28].mxu1 %vm664_vm1, %v641_v5 }
 0x121   : > { %9959 = vst [vmem:[#allocation28_spill] sm:$0xff] %v8083_v13 }
 0x122   : > { %v642_v17 = vmax.f32 %v610_v11, 0.0 }
 0x123   : > { %v8086_v19 = vpop.f32.mrb[30].mxu0 }
 0x124   : > { %v611_v23 = vadd.f32 %v7948_v45, %v8086_v19  ;;  %v8090_v25 = vpop.f32.mrb[31].mxu0  ;;  %7332 = vmatprep.mubr.msk.f32.mxu1 %vm664_vm1, %v642_v17 }
 0x125   : > { %9960 = vst [vmem:[#allocation29_spill] sm:$0xff] %v8090_v25 }
 0x126   : > { %v643_v29 = vmax.f32 %v611_v23, 0.0 }
 0x127   : > { %v8093_v31 = vpop.f32.mrb[32].mxu0 }
 0x128   : > { %v612_v35 = vadd.f32 %v7948_v45, %v8093_v31  ;;  %v8097_v37 = vpop.f32.mrb[33].mxu0  ;;  %7333 = vmatmul.mubr.msk.f32.gmra.mrb[30].mxu1 %vm664_vm1, %v643_v29 }
 0x129   : > { %9961 = vst [vmem:[#allocation30_spill] sm:$0xff] %v8097_v37 }
 0x12a   : > { %v644_v39 = vmax.f32 %v612_v35, 0.0 }
 0x12b   : > { %v8100_v41 = vpop.f32.mrb[34].mxu0 }
 0x12c   : > { %v613_v43 = vadd.f32 %v7948_v45, %v8100_v41  ;;  %v8104_v47 = vpop.f32.mrb[35].mxu0  ;;  %7335 = vmatprep.mubr.msk.f32.mxu1 %vm664_vm1, %v644_v39 }
 0x12d   : > { %9962 = vst [vmem:[#allocation31_spill] sm:$0xff] %v8104_v47 }
 0x12e   : > { %v645_v51 = vmax.f32 %v613_v43, 0.0 }
 0x12f   : > { %v8107_v57 = vpop.f32.mrb[36].mxu0 }
 0x130   : > { %v614_v63 = vadd.f32 %v7948_v45, %v8107_v57  ;;  %v8111_v5 = vpop.f32.mrb[37].mxu0  ;;  %7336 = vmatmul.mubr.msk.f32.gmra.mrb[32].mxu1 %vm664_vm1, %v645_v51 }
 0x131   : > { %9963 = vst [vmem:[#allocation32_spill] sm:$0xff] %v8111_v5 }
 0x132   : > { %v646_v11 = vmax.f32 %v614_v63, 0.0 }
 0x133   : > { %v8114_v17 = vpop.f32.mrb[38].mxu0 }
 0x134   : > { %v615_v23 = vadd.f32 %v7948_v45, %v8114_v17  ;;  %v8118_v29 = vpop.f32.mrb[39].mxu0  ;;  %7338 = vmatprep.mubr.msk.f32.mxu1 %vm664_vm1, %v646_v11 }
 0x135   : > { %9964 = vst [vmem:[#allocation33_spill] sm:$0xff] %v8118_v29 }
 0x136   : > { %v647_v35 = vmax.f32 %v615_v23, 0.0 }
 0x137   : > { %v8121_v39 = vpop.f32.mrb[40].mxu0 }
 0x138   : > { %v616_v43 = vadd.f32 %v7948_v45, %v8121_v39  ;;  %v8125_v28 = vpop.f32.mrb[41].mxu0  ;;  %7339 = vmatmul.mubr.msk.f32.gmra.mrb[34].mxu1 %vm664_vm1, %v647_v35 }
 0x139   : > { %9965 = vst [vmem:[#allocation34_spill] sm:$0xff] %v8125_v28 }
 0x13a   : > { %v648_v51 = vmax.f32 %v616_v43, 0.0  ;;  %v620_v43 = vadd.f32 %v7948_v45, %v7963_v54 }
 0x13b   : > { %v8128_v63 = vpop.f32.mrb[42].mxu0 }
 0x13c   : > { %v617_v34 = vadd.f32 %v7948_v45, %v8128_v63  ;;  %v8132_v16 = vpop.f32.mrb[43].mxu0  ;;  %7341 = vmatprep.mubr.msk.f32.mxu1 %vm664_vm1, %v648_v51 }
 0x13d   : > { %9966 = vst [vmem:[#allocation35_spill] sm:$0xff] %v8132_v16 }
 0x13e   : > { %v649_v11 = vmax.f32 %v617_v34, 0.0  ;;  %v621_v34 = vadd.f32 %v7948_v45, %v7974_v60 }
 0x13f   : > { %v8135_v23 = vpop.f32.mrb[44].mxu0 }
 0x140   : > { %v618_v22 = vadd.f32 %v7948_v45, %v8135_v23  ;;  %v8139_v4 = vpop.f32.mrb[45].mxu0  ;;  %7342 = vmatmul.mubr.msk.f32.gmra.mrb[36].mxu1 %vm664_vm1, %v649_v11  ;;  %v6826_v11 = vld [vmem:[%s9891_s3 + $0x1] ss:$0 sm:$0xff] }
 0x141   : > { %9967 = vst [vmem:[#allocation36_spill] sm:$0xff] %v8139_v4  ;;  %v652_v4 = vmax.f32 %v620_v43, 0.0  ;;  %1346 = vrot.lane.b32.xlu1 %v6826_v11, %s7781_s18 }
 0x142   : > { %v650_v35 = vmax.f32 %v618_v22, 0.0  ;;  %v622_v22 = vadd.f32 %v7948_v45, %v7985_v2 }
 0x143   : > { %v8144_v10 = vpop.f32.mrb[46].mxu0 }
 0x144   : > { %v619_v56 = vadd.f32 %v7948_v45, %v8144_v10  ;;  %v8148_v51 = vpop.f32.mrb[47].mxu0  ;;  %7344 = vmatprep.mubr.msk.f32.mxu1 %vm664_vm1, %v650_v35  ;;  %v653_v35 = vmax.f32 %v621_v34, 0.0  ;;  %v654_v43 = vmax.f32 %v622_v22, 0.0  ;;  %v627_v34 = vadd.f32 %v7948_v45, %v8040_v32 }
 0x145   : > { %9968 = vst [vmem:[#allocation37_spill] sm:$0xff] %v8148_v51  ;;  %v624_v51 = vadd.f32 %v7948_v45, %v8007_v14 }
 0x146   : > { %v651_v62 = vmax.f32 %v619_v56, 0.0  ;;  %v623_v56 = vadd.f32 %v7948_v45, %v7996_v8  ;;  %v659_v22 = vmax.f32 %v627_v34, 0.0 }
 0x147   : > { %v656_v28 = vmax.f32 %v624_v51, 0.0 }
 0x148   : > { %7345 = vmatmul.mubr.msk.f32.gmra.mrb[38].mxu1 %vm664_vm1, %v651_v62  ;;  %v625_v62 = vadd.f32 %v7948_v45, %v8018_v20  ;;  %v655_v16 = vmax.f32 %v623_v56, 0.0 }
 0x149   : > { %7347 = vmatprep.mubr.msk.f32.mxu1 %vm664_vm1, %v652_v4  ;;  %v626_v4 = vadd.f32 %v7948_v45, %v8029_v26 }
 0x14a   : > { %v657_v5 = vmax.f32 %v625_v62, 0.0 }
 0x14b   : > { %v658_v11 = vmax.f32 %v626_v4, 0.0 }
 0x14c   : > { %7348 = vmatmul.mubr.msk.f32.gmra.mrb[40].mxu1 %vm664_vm1, %v653_v35 }
 0x14d   : > { %7350 = vmatprep.mubr.msk.f32.mxu1 %vm664_vm1, %v654_v43 }
 0x150   : > { %7351 = vmatmul.mubr.msk.f32.gmra.mrb[42].mxu1 %vm664_vm1, %v655_v16 }
 0x151   : > { %7353 = vmatprep.mubr.msk.f32.mxu1 %vm664_vm1, %v656_v28 }
 0x154   : > { %7354 = vmatmul.mubr.msk.f32.gmra.mrb[44].mxu1 %vm664_vm1, %v657_v5 }
 0x155   : > { %7356 = vmatprep.mubr.msk.f32.mxu1 %vm664_vm1, %v658_v11 }
 0x158   : > { %7357 = vmatmul.mubr.msk.f32.gmra.mrb[46].mxu1 %vm664_vm1, %v659_v22 }
 0x1b3   : > { %v8294_v52 = vpop.permute.xlu1 %1346 }
 0x1c3   : > { %v7313_v51 = vpop.f32.mrb[16].mxu1 }
 0x1c4   : > { %v988_v35 = vsel %vm986_vm2, %v7313_v51, 0.0  ;;  %v827_v56 = vpop.f32.mrb[17].mxu1 }
 0x1c5   : > { %v987_v16 = vsel %vm986_vm2, %v827_v56, 0.0  ;;  %1180 = vrot.lane.b32.xlu0 %v827_v56, %s7781_s18 }
 0x1c6   : > { %v8181_v45 = vadd.f32 %v988_v35, %v987_v16 }
 0x1c8   : > { %v990_v40 = vrot.slane %v8181_v45, 4 }
 0x1c9   : > { %1182 = vrot.lane.b32.xlu0 %v7313_v51, %s7781_s18 }
 0x1ca   : > { %v991_v30 = vadd.f32 %v990_v40, %v8181_v45 }
 0x1cb   : > { %v7316_v28 = vpop.f32.mrb[18].mxu1 }
 0x1cc   : > { %v997_v5 = vsel %vm986_vm2, %v7316_v28, 0.0  ;;  %v837_v43 = vpop.f32.mrb[19].mxu1  ;;  %v992_v18 = vrot.slane %v991_v30, 2 }
 0x1cd   : > { %v996_v62 = vsel %vm986_vm2, %v837_v43, 0.0  ;;  %1186 = vrot.lane.b32.xlu0 %v7316_v28, %s7781_s18  ;;  %1184 = vrot.lane.b32.xlu1 %v837_v43, %s7781_s18 }
 0x1ce   : > { %v8188_v4 = vadd.f32 %v997_v5, %v996_v62 }
 0x1d0   : > { %v999_v24 = vrot.slane %v8188_v4, 4 }
 0x1d3   : > { %v7319_v34 = vpop.f32.mrb[20].mxu1 }
 0x1d4   : > { %v1006_v11 = vsel %vm986_vm2, %v7319_v34, 0.0  ;;  %1190 = vrot.lane.b32.xlu0 %v7319_v34, %s7781_s18  ;;  %v847_v22 = vpop.f32.mrb[21].mxu1 }
 0x1d5   : > { %v1005_v51 = vsel %vm986_vm2, %v847_v22, 0.0  ;;  %1188 = vrot.lane.b32.xlu1 %v847_v22, %s7781_s18 }
 0x1d6   : > { %v8194_v35 = vadd.f32 %v1006_v11, %v1005_v51 }
 0x1db   : > { %v7322_v56 = vpop.f32.mrb[22].mxu1 }
 0x1dc   : > { %v1015_v16 = vsel %vm986_vm2, %v7322_v56, 0.0  ;;  %1194 = vrot.lane.b32.xlu0 %v7322_v56, %s7781_s18  ;;  %v857_v28 = vpop.f32.mrb[23].mxu1 }
 0x1dd   : > { %v1014_v5 = vsel %vm986_vm2, %v857_v28, 0.0  ;;  %1192 = vrot.lane.b32.xlu1 %v857_v28, %s7781_s18 }
 0x1de   : > { %v8200_v43 = vadd.f32 %v1015_v16, %v1014_v5 }
 0x1e3   : > { %v7325_v62 = vpop.f32.mrb[24].mxu1 }
 0x1e4   : > { %v1024_v34 = vsel %vm986_vm2, %v7325_v62, 0.0  ;;  %1198 = vrot.lane.b32.xlu0 %v7325_v62, %s7781_s18  ;;  %v867_v22 = vpop.f32.mrb[25].mxu1 }
 0x1e5   : > { %v1023_v11 = vsel %vm986_vm2, %v867_v22, 0.0  ;;  %1196 = vrot.lane.b32.xlu1 %v867_v22, %s7781_s18 }
 0x1e6   : > { %v8206_v51 = vadd.f32 %v1024_v34, %v1023_v11 }
 0x1eb   : > { %v7328_v56 = vpop.f32.mrb[26].mxu1 }
 0x1ec   : > { %v1033_v29 = vsel %vm986_vm2, %v7328_v56, 0.0  ;;  %1202 = vrot.lane.b32.xlu0 %v7328_v56, %s7781_s18  ;;  %v877_v28 = vpop.f32.mrb[27].mxu1 }
 0x1ed   : > { %v1032_v16 = vsel %vm986_vm2, %v877_v28, 0.0  ;;  %1200 = vrot.lane.b32.xlu1 %v877_v28, %s7781_s18 }
 0x1ee   : > { %v8212_v5 = vadd.f32 %v1033_v29, %v1032_v16 }
 0x1f3   : > { %v7331_v62 = vpop.f32.mrb[28].mxu1 }
 0x1f4   : > { %v1042_v37 = vsel %vm986_vm2, %v7331_v62, 0.0  ;;  %1206 = vrot.lane.b32.xlu0 %v7331_v62, %s7781_s18  ;;  %v887_v22 = vpop.f32.mrb[29].mxu1  ;;  %v6827_v62 = vld [vmem:[%s9890_s2 + $0x20] sm:$0xff] }
 0x1f5   : > { %v1041_v34 = vsel %vm986_vm2, %v887_v22, 0.0  ;;  %1204 = vrot.lane.b32.xlu1 %v887_v22, %s7781_s18 }
 0x1f6   : > { %v8218_v11 = vadd.f32 %v1042_v37, %v1041_v34  ;;  %v6828_v37 = vld [vmem:[%s9890_s2 + $0x28] sm:$0xff] }
 0x1f7   : > { %v7707_v34 = vpack.c.bf16 %v6828_v37, %v6827_v62 }
 0x1f9   : > { %7708 = vmatprep.subr.bf16.mxu1 %v7707_v34 }
 0x1fa   : > { %7710 = vmatpush3.bf16.msra.mxu1 %v7707_v34 }
 0x1fb   : > { %v7334_v56 = vpop.f32.mrb[30].mxu1 }
 0x1fc   : > { %v1051_v47 = vsel %vm986_vm2, %v7334_v56, 0.0  ;;  %1210 = vrot.lane.b32.xlu0 %v7334_v56, %s7781_s18  ;;  %v897_v28 = vpop.f32.mrb[31].mxu1 }
 0x1fd   : > { %v1050_v29 = vsel %vm986_vm2, %v897_v28, 0.0  ;;  %1208 = vrot.lane.b32.xlu1 %v897_v28, %s7781_s18 }
 0x1fe   : > { %v8224_v16 = vadd.f32 %v1051_v47, %v1050_v29 }
 0x203   : > { %v7337_v22 = vpop.f32.mrb[32].mxu1 }
 0x204   : > { %v1060_v13 = vsel %vm986_vm2, %v7337_v22, 0.0  ;;  %1214 = vrot.lane.b32.xlu0 %v7337_v22, %s7781_s18  ;;  %v907_v56 = vpop.f32.mrb[33].mxu1 }
 0x205   : > { %v1059_v25 = vsel %vm986_vm2, %v907_v56, 0.0  ;;  %1212 = vrot.lane.b32.xlu1 %v907_v56, %s7781_s18 }
 0x206   : > { %v8236_v47 = vadd.f32 %v1060_v13, %v1059_v25 }
 0x20b   : > { %v7340_v28 = vpop.f32.mrb[34].mxu1 }
 0x20c   : > { %v1069_v29 = vsel %vm986_vm2, %v7340_v28, 0.0  ;;  %1218 = vrot.lane.b32.xlu0 %v7340_v28, %s7781_s18  ;;  %v917_v53 = vpop.f32.mrb[35].mxu1 }
 0x20d   : > { %v1068_v62 = vsel %vm986_vm2, %v917_v53, 0.0  ;;  %1216 = vrot.lane.b32.xlu1 %v917_v53, %s7781_s18 }
 0x20e   : > { %v8242_v37 = vadd.f32 %v1069_v29, %v1068_v62 }
 0x213   : > { %v7343_v22 = vpop.f32.mrb[36].mxu1 }
 0x214   : > { %v1078_v1 = vsel %vm986_vm2, %v7343_v22, 0.0  ;;  %1222 = vrot.lane.b32.xlu0 %v7343_v22, %s7781_s18  ;;  %v927_v13 = vpop.f32.mrb[37].mxu1 }
 0x215   : > { %v1077_v25 = vsel %vm986_vm2, %v927_v13, 0.0  ;;  %1220 = vrot.lane.b32.xlu1 %v927_v13, %s7781_s18 }
 0x216   : > { %v8248_v34 = vadd.f32 %v1078_v1, %v1077_v25 }
 0x21b   : > { %v7346_v56 = vpop.f32.mrb[38].mxu1 }
 0x21c   : > { %v1087_v28 = vsel %vm986_vm2, %v7346_v56, 0.0  ;;  %1226 = vrot.lane.b32.xlu0 %v7346_v56, %s7781_s18  ;;  %v937_v53 = vpop.f32.mrb[39].mxu1  ;;  %v6829_v56 = vld [vmem:[%s9890_s2 + $0x30] sm:$0xff] }
 0x21d   : > { %v1086_v29 = vsel %vm986_vm2, %v937_v53, 0.0  ;;  %1224 = vrot.lane.b32.xlu1 %v937_v53, %s7781_s18 }
 0x21e   : > { %v8254_v62 = vadd.f32 %v1087_v28, %v1086_v29  ;;  %v6830_v28 = vld [vmem:[%s9890_s2 + $0x38] sm:$0xff] }
 0x21f   : > { %v7349_v22 = vpop.f32.mrb[40].mxu1  ;;  %v7711_v29 = vpack.c.bf16 %v6830_v28, %v6829_v56 }
 0x220   : > { %v1096_v44 = vsel %vm986_vm2, %v7349_v22, 0.0  ;;  %1230 = vrot.lane.b32.xlu0 %v7349_v22, %s7781_s18  ;;  %v947_v1 = vpop.f32.mrb[41].mxu1 }
 0x221   : > { %v1095_v13 = vsel %vm986_vm2, %v947_v1, 0.0  ;;  %1228 = vrot.lane.b32.xlu1 %v947_v1, %s7781_s18  ;;  %7712 = vmatprep.subr.bf16.mxu1 %v7711_v29 }
 0x222   : > { %v8261_v25 = vadd.f32 %v1096_v44, %v1095_v13  ;;  %7714 = vmatpush3.bf16.msra.mxu1 %v7711_v29 }
 0x223   : > { %v7352_v53 = vpop.f32.mrb[42].mxu1 }
 0x224   : > { %v1105_v22 = vsel %vm986_vm2, %v7352_v53, 0.0  ;;  %1234 = vrot.lane.b32.xlu0 %v7352_v53, %s7781_s18  ;;  %v957_v36 = vpop.f32.mrb[43].mxu1  ;;  %v993_v53 = vadd.f32 %v992_v18, %v991_v30 }
 0x225   : > { %v1104_v44 = vsel %vm986_vm2, %v957_v36, 0.0  ;;  %1232 = vrot.lane.b32.xlu1 %v957_v36, %s7781_s18 }
 0x226   : > { %v8274_v1 = vadd.f32 %v1105_v22, %v1104_v44  ;;  %v1000_v22 = vadd.f32 %v999_v24, %v8188_v4  ;;  %v1017_v4 = vrot.slane %v8200_v43, 4 }
 0x227   : > { %v7355_v13 = vpop.f32.mrb[44].mxu1 }
 0x228   : > { %v1114_v56 = vsel %vm986_vm2, %v7355_v13, 0.0  ;;  %1238 = vrot.lane.b32.xlu0 %v7355_v13, %s7781_s18  ;;  %v967_v40 = vpop.f32.mrb[45].mxu1  ;;  %v1008_v13 = vrot.slane %v8194_v35, 4 }
 0x229   : > { %v1113_v45 = vsel %vm986_vm2, %v967_v40, 0.0  ;;  %1236 = vrot.lane.b32.xlu1 %v967_v40, %s7781_s18  ;;  %v1001_v40 = vrot.slane %v1000_v22, 2 }
 0x22a   : > { %v8281_v28 = vadd.f32 %v1114_v56, %v1113_v45  ;;  %v994_v56 = vrot.slane %v993_v53, 1  ;;  %v1009_v45 = vadd.f32 %v1008_v13, %v8194_v35 }
 0x22b   : > { %v7358_v36 = vpop.f32.mrb[46].mxu1  ;;  %v1002_v18 = vadd.f32 %v1001_v40, %v1000_v22 }
 0x22c   : > { %v1123_v29 = vsel %vm986_vm2, %v7358_v36, 0.0  ;;  %1242 = vrot.lane.b32.xlu0 %v7358_v36, %s7781_s18  ;;  %v977_v44 = vpop.f32.mrb[47].mxu1  ;;  %v995_v30 = vadd.f32 %v994_v56, %v993_v53  ;;  %v1010_v24 = vrot.slane %v1009_v45, 2 }
 0x22d   : > { %v1122_v6 = vsel %vm986_vm2, %v977_v44, 0.0  ;;  %1240 = vrot.lane.b32.xlu1 %v977_v44, %s7781_s18  ;;  %v1003_v48 = vrot.slane %v1002_v18, 1 }
 0x22e   : > { %v8289_v12 = vadd.f32 %v1123_v29, %v1122_v6  ;;  %v1132_v36 = vmul.f32 0.0625, %v995_v30  ;;  %v1011_v44 = vadd.f32 %v1010_v24, %v1009_v45  ;;  %v1018_v6 = vadd.f32 %v1017_v4, %v8200_v43 }
 0x22f   : > { %v1004_v35 = vadd.f32 %v1003_v48, %v1002_v18  ;;  %v1026_v30 = vrot.slane %v8206_v51, 4 }
 0x230   : > { %v1012_v40 = vrot.slane %v1011_v44, 1  ;;  %v1019_v56 = vrot.slane %v1018_v6, 2 }
 0x231   : > { %v1133_v14 = vmul.f32 0.0625, %v1004_v35  ;;  %v1027_v4 = vadd.f32 %v1026_v30, %v8206_v51 }
 0x232   : > { %v1013_v18 = vadd.f32 %v1012_v40, %v1011_v44  ;;  %v1020_v24 = vadd.f32 %v1019_v56, %v1018_v6 }
 0x234   : > { %v1021_v44 = vrot.slane %v1020_v24, 1 }
 0x237   : > { %v1181_v58 = vpop.permute.xlu0 %1180 }
 0x238   : > { %v1276_v0 = vadd.f32 %v1181_v58, %v7950_v46 }
 0x23a   : > { %v1308_v26 = vadd.f32 %v1276_v0, %v1132_v36 }
 0x23b   : > { %v1183_v29 = vpop.permute.xlu0 %1182 }
 0x23c   : > { %v1277_v32 = vadd.f32 %v1183_v29, %v7956_v50  ;;  %v1349_v53 = vadd.f32 %v8294_v52, %v1308_v26 }
 0x23e   : > { %v1309_v22 = vadd.f32 %v1277_v32, %v1132_v36  ;;  %v1381_v13 = vmax.f32 %v1349_v53, 0.0 }
 0x23f   : > { %v1187_v58 = vpop.permute.xlu0 %1186  ;;  %v1185_v46 = vpop.permute.xlu1 %1184 }
 0x240   : > { %v1279_v45 = vadd.f32 %v1187_v58, %v7976_v61  ;;  %v1278_v0 = vadd.f32 %v1185_v46, %v7965_v55  ;;  %1450 = vrot.lane.b32.xlu1 %v1381_v13, %s7782_s27  ;;  %v1350_v48 = vadd.f32 %v8294_v52, %v1309_v22  ;;  %v1134_v46 = vmul.f32 0.0625, %v1013_v18 }
 0x241   : > { %v1028_v13 = vrot.slane %v1027_v4, 2  ;;  %v1035_v22 = vrot.slane %v8212_v5, 4 }
 0x242   : > { %v1311_v43 = vadd.f32 %v1279_v45, %v1133_v14  ;;  %v1310_v26 = vadd.f32 %v1278_v0, %v1133_v14  ;;  %v1382_v32 = vmax.f32 %v1350_v48, 0.0  ;;  %v1022_v0 = vadd.f32 %v1021_v44, %v1020_v24 }
 0x243   : > { %v1029_v56 = vadd.f32 %v1028_v13, %v1027_v4  ;;  %v1036_v30 = vadd.f32 %v1035_v22, %v8212_v5 }
 0x244   : > { %1452 = vrot.lane.b32.xlu0 %v1382_v32, %s7782_s27  ;;  %v1352_v36 = vadd.f32 %v8294_v52, %v1311_v43  ;;  %v1351_v29 = vadd.f32 %v8294_v52, %v1310_v26  ;;  %v1044_v32 = vrot.slane %v8218_v11, 4 }
 0x245   : > { %v1030_v4 = vrot.slane %v1029_v56, 1 }
 0x246   : > { %v1191_v35 = vpop.permute.xlu0 %1190  ;;  %v1384_v53 = vmax.f32 %v1352_v36, 0.0  ;;  %v1383_v58 = vmax.f32 %v1351_v29, 0.0  ;;  %v1037_v29 = vrot.slane %v1036_v30, 2 }
 0x247   : > { %v1281_v14 = vadd.f32 %v1191_v35, %v7998_v9  ;;  %v1189_v45 = vpop.permute.xlu1 %1188  ;;  %v1135_v35 = vmul.f32 0.0625, %v1022_v0 }
 0x248   : > { %v1280_v6 = vadd.f32 %v1189_v45, %v7987_v3  ;;  %1456 = vrot.lane.b32.xlu0 %v1384_v53, %s7782_s27  ;;  %1454 = vrot.lane.b32.xlu1 %v1383_v58, %s7782_s27  ;;  %v1038_v22 = vadd.f32 %v1037_v29, %v1036_v30 }
 0x249   : > { %v1313_v51 = vadd.f32 %v1281_v14, %v1134_v46  ;;  %v1031_v14 = vadd.f32 %v1030_v4, %v1029_v56 }
 0x24a   : > { %v1312_v40 = vadd.f32 %v1280_v6, %v1134_v46  ;;  %v1045_v46 = vadd.f32 %v1044_v32, %v8218_v11  ;;  %v1039_v11 = vrot.slane %v1038_v22, 1 }
 0x24b   : > { %v1354_v48 = vadd.f32 %v8294_v52, %v1313_v51 }
 0x24c   : > { %v1353_v43 = vadd.f32 %v8294_v52, %v1312_v40  ;;  %v1046_v51 = vrot.slane %v1045_v46, 2 }
 0x24d   : > { %v1386_v26 = vmax.f32 %v1354_v48, 0.0  ;;  %v1053_v48 = vrot.slane %v8224_v16, 4 }
 0x24e   : > { %v1195_v18 = vpop.permute.xlu0 %1194  ;;  %v1385_v36 = vmax.f32 %v1353_v43, 0.0  ;;  %v1136_v43 = vmul.f32 0.0625, %v1031_v14  ;;  %v1047_v32 = vadd.f32 %v1046_v51, %v1045_v46 }
 0x24f   : > { %v1283_v53 = vadd.f32 %v1195_v18, %v8020_v21  ;;  %v1193_v58 = vpop.permute.xlu1 %1192  ;;  %1460 = vrot.lane.b32.xlu0 %v1386_v26, %s7782_s27  ;;  %v1054_v29 = vadd.f32 %v1053_v48, %v8224_v16 }
 0x250   : > { %v1282_v5 = vadd.f32 %v1193_v58, %v8009_v15  ;;  %1458 = vrot.lane.b32.xlu1 %v1385_v36, %s7782_s27 }
 0x251   : > { %v1315_v24 = vadd.f32 %v1283_v53, %v1135_v35  ;;  %v1055_v14 = vrot.slane %v1054_v29, 2 }
 0x252   : > { %v1314_v13 = vadd.f32 %v1282_v5, %v1135_v35  ;;  %v1040_v35 = vadd.f32 %v1039_v11, %v1038_v22 }
 0x253   : > { %v1356_v45 = vadd.f32 %v8294_v52, %v1315_v24 }
 0x254   : > { %v1355_v44 = vadd.f32 %v8294_v52, %v1314_v13  ;;  %v1048_v13 = vrot.slane %v1047_v32, 1 }
 0x255   : > { %v1388_v6 = vmax.f32 %v1356_v45, 0.0  ;;  %v1062_v45 = vrot.slane %v8236_v47, 4 }
 0x256   : > { %v1199_v40 = vpop.permute.xlu0 %1198  ;;  %v1387_v0 = vmax.f32 %v1355_v44, 0.0  ;;  %v1137_v44 = vmul.f32 0.0625, %v1040_v35  ;;  %v1049_v51 = vadd.f32 %v1048_v13, %v1047_v32  ;;  %v1071_v35 = vrot.slane %v8242_v37, 4 }
 0x257   : > { %v1285_v26 = vadd.f32 %v1199_v40, %v8042_v33  ;;  %v1197_v18 = vpop.permute.xlu1 %1196  ;;  %1464 = vrot.lane.b32.xlu0 %v1388_v6, %s7782_s27  ;;  %v1063_v48 = vadd.f32 %v1062_v45, %v8236_v47 }
 0x258   : > { %v1284_v30 = vadd.f32 %v1197_v18, %v8031_v27  ;;  %1462 = vrot.lane.b32.xlu1 %v1387_v0, %s7782_s27  ;;  %v1056_v0 = vadd.f32 %v1055_v14, %v1054_v29 }
 0x259   : > { %v1317_v56 = vadd.f32 %v1285_v26, %v1136_v43 }
 0x25a   : > { %v1316_v36 = vadd.f32 %v1284_v30, %v1136_v43  ;;  %v1138_v30 = vmul.f32 0.0625, %v1049_v51  ;;  %v1057_v32 = vrot.slane %v1056_v0, 1 }
 0x25b   : > { %v1358_v53 = vadd.f32 %v8294_v52, %v1317_v56 }
 0x25c   : > { %v1357_v58 = vadd.f32 %v8294_v52, %v1316_v36  ;;  %v1064_v36 = vrot.slane %v1063_v48, 2  ;;  %v1058_v13 = vadd.f32 %v1057_v32, %v1056_v0 }
 0x25d   : > { %v1390_v4 = vmax.f32 %v1358_v53, 0.0 }
 0x25e   : > { %v1203_v5 = vpop.permute.xlu0 %1202  ;;  %v1389_v24 = vmax.f32 %v1357_v58, 0.0 }
 0x25f   : > { %v1287_v6 = vadd.f32 %v1203_v5, %v8058_v42  ;;  %v1201_v40 = vpop.permute.xlu1 %1200  ;;  %1468 = vrot.lane.b32.xlu0 %v1390_v4, %s7782_s27  ;;  %v1065_v5 = vadd.f32 %v1064_v36, %v1063_v48 }
 0x260   : > { %v1286_v16 = vadd.f32 %v1201_v40, %v8051_v38  ;;  %1466 = vrot.lane.b32.xlu1 %v1389_v24, %s7782_s27  ;;  %v1072_v24 = vadd.f32 %v1071_v35, %v8242_v37 }
 0x261   : > { %v1319_v46 = vadd.f32 %v1287_v6, %v1137_v44  ;;  %v1080_v6 = vrot.slane %v8248_v34, 4  ;;  %v1066_v48 = vrot.slane %v1065_v5, 1 }
 0x262   : > { %v1318_v22 = vadd.f32 %v1286_v16, %v1137_v44 }
 0x263   : > { %v1360_v43 = vadd.f32 %v8294_v52, %v1319_v46  ;;  %v1073_v46 = vrot.slane %v1072_v24, 2 }
 0x264   : > { %v1359_v26 = vadd.f32 %v8294_v52, %v1318_v22  ;;  %v1139_v22 = vmul.f32 0.0625, %v1058_v13 }
 0x265   : > { %v1392_v18 = vmax.f32 %v1360_v43, 0.0 }
 0x266   : > { %v1207_v11 = vpop.permute.xlu0 %1206  ;;  %v1391_v56 = vmax.f32 %v1359_v26, 0.0  ;;  %v1081_v26 = vadd.f32 %v1080_v6, %v8248_v34 }
 0x267   : > { %v1289_v53 = vadd.f32 %v1207_v11, %v8072_v59  ;;  %v1205_v58 = vpop.permute.xlu1 %1204  ;;  %1472 = vrot.lane.b32.xlu0 %v1392_v18, %s7782_s27  ;;  %v1074_v11 = vadd.f32 %v1073_v46, %v1072_v24 }
 0x268   : > { %v1288_v29 = vadd.f32 %v1205_v58, %v8065_v49  ;;  %1470 = vrot.lane.b32.xlu1 %v1391_v56, %s7782_s27 }
 0x269   : > { %v1321_v47 = vadd.f32 %v1289_v53, %v1138_v30  ;;  %v1082_v53 = vrot.slane %v1081_v26, 2  ;;  %v1075_v34 = vrot.slane %v1074_v11, 1 }
 0x26a   : > { %v1320_v4 = vadd.f32 %v1288_v29, %v1138_v30  ;;  %v1067_v30 = vadd.f32 %v1066_v48, %v1065_v5  ;;  %v1089_v29 = vrot.slane %v8254_v62, 4 }
 0x26b   : > { %v1362_v14 = vadd.f32 %v8294_v52, %v1321_v47 }
 0x26c   : > { %v1361_v45 = vadd.f32 %v8294_v52, %v1320_v4  ;;  %v1140_v47 = vmul.f32 0.0625, %v1067_v30  ;;  %v1090_v6 = vadd.f32 %v1089_v29, %v8254_v62 }
 0x26d   : > { %v1394_v44 = vmax.f32 %v1362_v14, 0.0  ;;  %v1083_v14 = vadd.f32 %v1082_v53, %v1081_v26 }
 0x26e   : > { %v1211_v40 = vpop.permute.xlu0 %1210  ;;  %v1393_v16 = vmax.f32 %v1361_v45, 0.0  ;;  %v1098_v45 = vrot.slane %v8261_v25, 4 }
 0x26f   : > { %v1291_v51 = vadd.f32 %v1211_v40, %v8086_v19  ;;  %v1209_v43 = vpop.permute.xlu1 %1208  ;;  %1476 = vrot.lane.b32.xlu0 %v1394_v44, %s7782_s27  ;;  %v1076_v40 = vadd.f32 %v1075_v34, %v1074_v11 }
 0x270   : > { %v1290_v37 = vadd.f32 %v1209_v43, %v8079_v7  ;;  %1474 = vrot.lane.b32.xlu1 %v1393_v16, %s7782_s27  ;;  %v1107_v43 = vrot.slane %v8274_v1, 4 }
 0x271   : > { %v1323_v0 = vadd.f32 %v1291_v51, %v1139_v22  ;;  %v1099_v51 = vadd.f32 %v1098_v45, %v8261_v25  ;;  %v1141_v26 = vmul.f32 0.0625, %v1076_v40  ;;  %v1125_v40 = vrot.slane %v8289_v12, 4 }
 0x272   : > { %v1322_v18 = vadd.f32 %v1290_v37, %v1139_v22  ;;  %v1108_v25 = vadd.f32 %v1107_v43, %v8274_v1 }
 0x273   : > { %v1364_v56 = vadd.f32 %v8294_v52, %v1323_v0  ;;  %v1084_v0 = vrot.slane %v1083_v14, 1 }
 0x274   : > { %v1363_v36 = vadd.f32 %v8294_v52, %v1322_v18  ;;  %v1091_v18 = vrot.slane %v1090_v6, 2  ;;  %v1109_v34 = vrot.slane %v1108_v25, 2 }
 0x275   : > { %v1396_v35 = vmax.f32 %v1364_v56, 0.0  ;;  %v1085_v53 = vadd.f32 %v1084_v0, %v1083_v14 }
 0x276   : > { %v1215_v58 = vpop.permute.xlu0 %1214  ;;  %v1395_v32 = vmax.f32 %v1363_v36, 0.0  ;;  %v1100_v36 = vrot.slane %v1099_v51, 2 }
 0x277   : > { %v1293_v4 = vadd.f32 %v1215_v58, %v8100_v41  ;;  %v1213_v13 = vpop.permute.xlu1 %1212  ;;  %1480 = vrot.lane.b32.xlu0 %v1396_v35, %s7782_s27  ;;  %v1092_v58 = vadd.f32 %v1091_v18, %v1090_v6 }
 0x278   : > { %v1292_v24 = vadd.f32 %v1213_v13, %v8093_v31  ;;  %1478 = vrot.lane.b32.xlu1 %v1395_v32, %s7782_s27  ;;  %v1116_v32 = vrot.slane %v8281_v28, 4  ;;  %v1101_v13 = vadd.f32 %v1100_v36, %v1099_v51 }
 0x279   : > { %v1325_v5 = vadd.f32 %v1293_v4, %v1140_v47  ;;  %v1093_v6 = vrot.slane %v1092_v58, 1 }
 0x27a   : > { %v1324_v44 = vadd.f32 %v1292_v24, %v1140_v47  ;;  %v1102_v43 = vrot.slane %v1101_v13, 1 }
 0x27b   : > { %v1366_v16 = vadd.f32 %v8294_v52, %v1325_v5  ;;  %v1142_v5 = vmul.f32 0.0625, %v1085_v53 }
 0x27c   : > { %v1365_v46 = vadd.f32 %v8294_v52, %v1324_v44  ;;  %v1117_v44 = vadd.f32 %v1116_v32, %v8281_v28  ;;  %v1094_v28 = vadd.f32 %v1093_v6, %v1092_v58 }
 0x27d   : > { %v1398_v22 = vmax.f32 %v1366_v16, 0.0 }
 0x27e   : > { %v1219_v48 = vpop.permute.xlu0 %1218  ;;  %v1397_v37 = vmax.f32 %v1365_v46, 0.0  ;;  %v1143_v53 = vmul.f32 0.0625, %v1094_v28 }
 0x27f   : > { %v1295_v30 = vadd.f32 %v1219_v48, %v8114_v17  ;;  %v1217_v56 = vpop.permute.xlu1 %1216  ;;  %1484 = vrot.lane.b32.xlu0 %v1398_v22, %s7782_s27  ;;  %v1110_v22 = vadd.f32 %v1109_v34, %v1108_v25  ;;  %v1118_v48 = vrot.slane %v1117_v44, 2 }
 0x280   : > { %v1294_v62 = vadd.f32 %v1217_v56, %v8107_v57  ;;  %1482 = vrot.lane.b32.xlu1 %v1397_v37, %s7782_s27  ;;  %v1126_v37 = vadd.f32 %v1125_v40, %v8289_v12 }
 0x281   : > { %v1327_v11 = vadd.f32 %v1295_v30, %v1141_v26  ;;  %v1119_v36 = vadd.f32 %v1118_v48, %v1117_v44 }
 0x282   : > { %v1326_v35 = vadd.f32 %v1294_v62, %v1141_v26  ;;  %v1103_v62 = vadd.f32 %v1102_v43, %v1101_v13 }
 0x283   : > { %v1368_v29 = vadd.f32 %v8294_v52, %v1327_v11  ;;  %v1111_v11 = vrot.slane %v1110_v22, 1  ;;  %v1120_v44 = vrot.slane %v1119_v36, 1 }
 0x284   : > { %v1367_v47 = vadd.f32 %v8294_v52, %v1326_v35  ;;  %v1127_v35 = vrot.slane %v1126_v37, 2 }
 0x285   : > { %v1400_v4 = vmax.f32 %v1368_v29, 0.0  ;;  %v1112_v34 = vadd.f32 %v1111_v11, %v1110_v22 }
 0x286   : > { %v1223_v24 = vpop.permute.xlu0 %1222  ;;  %v1399_v45 = vmax.f32 %v1367_v47, 0.0 }
 0x287   : > { %v1297_v1 = vadd.f32 %v1223_v24, %v8128_v63  ;;  %v1221_v14 = vpop.permute.xlu1 %1220  ;;  %1488 = vrot.lane.b32.xlu0 %v1400_v4, %s7782_s27  ;;  %v1144_v4 = vmul.f32 0.0625, %v1103_v62  ;;  %v1128_v24 = vadd.f32 %v1127_v35, %v1126_v37  ;;  %v1121_v37 = vadd.f32 %v1120_v44, %v1119_v36 }
 0x288   : > { %v1296_v16 = vadd.f32 %v1221_v14, %v8121_v39  ;;  %1486 = vrot.lane.b32.xlu1 %v1399_v45, %s7782_s27 }
 0x289   : > { %v1329_v46 = vadd.f32 %v1297_v1, %v1142_v5 }
 0x28a   : > { %v1328_v51 = vadd.f32 %v1296_v16, %v1142_v5 }
 0x28b   : > { %v1370_v0 = vadd.f32 %v8294_v52, %v1329_v46 }
 0x28c   : > { %v1369_v18 = vadd.f32 %v8294_v52, %v1328_v51  ;;  %v1145_v51 = vmul.f32 0.0625, %v1112_v34 }
 0x28d   : > { %v1402_v26 = vmax.f32 %v1370_v0, 0.0  ;;  %v1129_v0 = vrot.slane %v1128_v24, 1 }
 0x28e   : > { %v1227_v30 = vpop.permute.xlu0 %1226  ;;  %v1401_v56 = vmax.f32 %v1369_v18, 0.0 }
 0x28f   : > { %v1299_v25 = vadd.f32 %v1227_v30, %v8144_v10  ;;  %v1225_v32 = vpop.permute.xlu1 %1224  ;;  %1492 = vrot.lane.b32.xlu0 %v1402_v26, %s7782_s27  ;;  %v1130_v36 = vadd.f32 %v1129_v0, %v1128_v24 }
 0x290   : > { %v1298_v12 = vadd.f32 %v1225_v32, %v8135_v23  ;;  %1490 = vrot.lane.b32.xlu1 %v1401_v56, %s7782_s27 }
 0x291   : > { %v1331_v58 = vadd.f32 %v1299_v25, %v1143_v53  ;;  %v1147_v44 = vmul.f32 0.0625, %v1130_v36 }
 0x292   : > { %v1330_v29 = vadd.f32 %v1298_v12, %v1143_v53  ;;  %v1231_v47 = vpop.permute.xlu0 %1230  ;;  %v1146_v53 = vmul.f32 0.0625, %v1121_v37 }
 0x293   : > { %v1301_v13 = vadd.f32 %v1231_v47, %v7974_v60  ;;  %v1229_v5 = vpop.permute.xlu1 %1228  ;;  %v1372_v45 = vadd.f32 %v8294_v52, %v1331_v58  ;;  %v9969_v58 = vld [vmem:[#allocation13_spill] sm:$0xff] }
 0x294   : > { %v1300_v40 = vadd.f32 %v1229_v5, %v7963_v54  ;;  %v1371_v1 = vadd.f32 %v8294_v52, %v1330_v29 }
 0x295   : > { %v1333_v14 = vadd.f32 %v1301_v13, %v1144_v4  ;;  %v1404_v6 = vmax.f32 %v1372_v45, 0.0 }
 0x296   : > { %v1332_v16 = vadd.f32 %v1300_v40, %v1144_v4  ;;  %v1235_v46 = vpop.permute.xlu0 %1234  ;;  %v1403_v43 = vmax.f32 %v1371_v1, 0.0  ;;  %v9970_v40 = vld [vmem:[#allocation21_spill] sm:$0xff] }
 0x297   : > { %v1303_v48 = vadd.f32 %v1235_v46, %v7996_v8  ;;  %v1233_v22 = vpop.permute.xlu1 %1232  ;;  %1496 = vrot.lane.b32.xlu0 %v1404_v6, %s7782_s27  ;;  %v1374_v28 = vadd.f32 %v8294_v52, %v1333_v14  ;;  %v9971_v6 = vld [vmem:[#allocation18_spill] sm:$0xff] }
 0x298   : > { %v1302_v18 = vadd.f32 %v1233_v22, %v7985_v2  ;;  %1494 = vrot.lane.b32.xlu1 %v1403_v43, %s7782_s27  ;;  %v1373_v26 = vadd.f32 %v8294_v52, %v1332_v16 }
 0x299   : > { %v1335_v30 = vadd.f32 %v1303_v48, %v1145_v51  ;;  %v1406_v56 = vmax.f32 %v1374_v28, 0.0 }
 0x29a   : > { %v1334_v62 = vadd.f32 %v1302_v18, %v1145_v51  ;;  %v1239_v11 = vpop.permute.xlu0 %1238  ;;  %v1405_v35 = vmax.f32 %v1373_v26, 0.0  ;;  %v6863_v26 = vld [vmem:[%s9891_s3 + $0x2] ss:$0 sm:$0xff] }
 0x29b   : > { %v1305_v25 = vadd.f32 %v1239_v11, %v8018_v20  ;;  %v1237_v32 = vpop.permute.xlu1 %1236  ;;  %1500 = vrot.lane.b32.xlu0 %v1406_v56, %s7782_s27  ;;  %v1376_v12 = vadd.f32 %v8294_v52, %v1335_v30 }
 0x29c   : > { %v1304_v29 = vadd.f32 %v1237_v32, %v9969_v58  ;;  %1498 = vrot.lane.b32.xlu1 %v1405_v35, %s7782_s27  ;;  %v1375_v47 = vadd.f32 %v8294_v52, %v1334_v62 }
 0x29d   : > { %v1337_v4 = vadd.f32 %v1305_v25, %v1146_v53  ;;  %v1408_v34 = vmax.f32 %v1376_v12, 0.0 }
 0x29e   : > { %v1336_v13 = vadd.f32 %v1304_v29, %v1146_v53  ;;  %v1243_v5 = vpop.permute.xlu0 %1242  ;;  %v1407_v45 = vmax.f32 %v1375_v47, 0.0 }
 0x29f   : > { %v1307_v1 = vadd.f32 %v1243_v5, %v9970_v40  ;;  %1504 = vrot.lane.b32.xlu0 %v1408_v34, %s7782_s27  ;;  %v1241_v14 = vpop.permute.xlu1 %1240  ;;  %v1378_v24 = vadd.f32 %v8294_v52, %v1337_v4 }
 0x2a0   : > { %v1306_v16 = vadd.f32 %v1241_v14, %v9971_v6  ;;  %1502 = vrot.lane.b32.xlu1 %v1407_v45, %s7782_s27  ;;  %v1377_v46 = vadd.f32 %v8294_v52, %v1336_v13 }
 0x2a1   : > { %v1339_v51 = vadd.f32 %v1307_v1, %v1147_v44  ;;  %v1410_v43 = vmax.f32 %v1378_v24, 0.0 }
 0x2a2   : > { %v1338_v48 = vadd.f32 %v1306_v16, %v1147_v44  ;;  %v1409_v22 = vmax.f32 %v1377_v46, 0.0 }
 0x2a3   : > { %1508 = vrot.lane.b32.xlu0 %v1410_v43, %s7782_s27  ;;  %v1380_v37 = vadd.f32 %v8294_v52, %v1339_v51 }
 0x2a4   : > { %1506 = vrot.lane.b32.xlu1 %v1409_v22, %s7782_s27  ;;  %v1379_v28 = vadd.f32 %v8294_v52, %v1338_v48 }
 0x2a5   : > { %v1412_v0 = vmax.f32 %v1380_v37, 0.0 }
 0x2a6   : > { %v1411_v18 = vmax.f32 %v1379_v28, 0.0 }
 0x2a7   : > { %1512 = vrot.lane.b32.xlu0 %v1412_v0, %s7782_s27 }
 0x2a8   : > { %1510 = vrot.lane.b32.xlu1 %v1411_v18, %s7782_s27 }
 0x2ac   : > { %2225 = vrot.lane.b32.xlu1 %v6863_v26, %s7783_s30 }
 0x2b2   : > { %v1451_v30 = vpop.permute.xlu1 %1450 }
 0x2b3   : > { %7367 = vmatprep.mubr.msk.f32.mxu1 %vm664_vm1, %v1451_v30 }
 0x2b6   : > { %v1453_v56 = vpop.permute.xlu0 %1452 }
 0x2b7   : > { %7368 = vmatmul.mubr.msk.f32.vlgmr.msra.gmra.mrb[48].mxu1 %vm664_vm1, %v1453_v56 }
 0x2ba   : > { %v1457_v52 = vpop.permute.xlu0 %1456  ;;  %v1455_v62 = vpop.permute.xlu1 %1454 }
 0x2bb   : > { %7370 = vmatprep.mubr.msk.f32.mxu1 %vm664_vm1, %v1455_v62 }
 0x2bc   : > { %7371 = vmatmul.mubr.msk.f32.gmra.mrb[50].mxu1 %vm664_vm1, %v1457_v52 }
 0x2c1   : > { %v1461_v35 = vpop.permute.xlu0 %1460 }
 0x2c2   : > { %v1459_v11 = vpop.permute.xlu1 %1458 }
 0x2c3   : > { %7373 = vmatprep.mubr.msk.f32.mxu1 %vm664_vm1, %v1459_v11 }
 0x2c4   : > { %7374 = vmatmul.mubr.msk.f32.gmra.mrb[52].mxu1 %vm664_vm1, %v1461_v35 }
 0x2c9   : > { %v1465_v25 = vpop.permute.xlu0 %1464 }
 0x2ca   : > { %v1463_v53 = vpop.permute.xlu1 %1462 }
 0x2cb   : > { %7376 = vmatprep.mubr.msk.f32.mxu1 %vm664_vm1, %v1463_v53 }
 0x2cc   : > { %7377 = vmatmul.mubr.msk.f32.gmra.mrb[54].mxu1 %vm664_vm1, %v1465_v25 }
 0x2d1   : > { %v1469_v36 = vpop.permute.xlu0 %1468 }
 0x2d2   : > { %v1467_v32 = vpop.permute.xlu1 %1466 }
 0x2d3   : > { %7379 = vmatprep.mubr.msk.f32.mxu1 %vm664_vm1, %v1467_v32 }
 0x2d4   : > { %7380 = vmatmul.mubr.msk.f32.gmra.mrb[56].mxu1 %vm664_vm1, %v1469_v36 }
 0x2d9   : > { %v1473_v29 = vpop.permute.xlu0 %1472 }
 0x2da   : > { %v1471_v12 = vpop.permute.xlu1 %1470 }
 0x2db   : > { %7382 = vmatprep.mubr.msk.f32.mxu1 %vm664_vm1, %v1471_v12 }
 0x2dc   : > { %7383 = vmatmul.mubr.msk.f32.gmra.mrb[58].mxu1 %vm664_vm1, %v1473_v29 }
 0x2e1   : > { %v1477_v4 = vpop.permute.xlu0 %1476 }
 0x2e2   : > { %v1475_v47 = vpop.permute.xlu1 %1474 }
 0x2e3   : > { %7385 = vmatprep.mubr.msk.f32.mxu1 %vm664_vm1, %v1475_v47 }
 0x2e4   : > { %7386 = vmatmul.mubr.msk.f32.gmra.mrb[60].mxu1 %vm664_vm1, %v1477_v4 }
 0x2e9   : > { %v1481_v13 = vpop.permute.xlu0 %1480 }
 0x2ea   : > { %v1479_v34 = vpop.permute.xlu1 %1478 }
 0x2eb   : > { %7388 = vmatprep.mubr.msk.f32.mxu1 %vm664_vm1, %v1479_v34 }
 0x2ec   : > { %7389 = vmatmul.mubr.msk.f32.gmra.mrb[62].mxu1 %vm664_vm1, %v1481_v13 }
 0x2f1   : > { %v1485_v45 = vpop.permute.xlu0 %1484 }
 0x2f2   : > { %v1483_v5 = vpop.permute.xlu1 %1482 }
 0x2f3   : > { %7391 = vmatprep.mubr.msk.f32.mxu1 %vm664_vm1, %v1483_v5 }
 0x2f4   : > { %7392 = vmatmul.mubr.msk.f32.gmra.mrb[64].mxu1 %vm664_vm1, %v1485_v45 }
 0x2f9   : > { %v1489_v1 = vpop.permute.xlu0 %1488 }
 0x2fa   : > { %v1487_v44 = vpop.permute.xlu1 %1486 }
 0x2fb   : > { %7394 = vmatprep.mubr.msk.f32.mxu1 %vm664_vm1, %v1487_v44 }
 0x2fc   : > { %7395 = vmatmul.mubr.msk.f32.gmra.mrb[66].mxu1 %vm664_vm1, %v1489_v1 }
 0x301   : > { %v1493_v24 = vpop.permute.xlu0 %1492 }
 0x302   : > { %v1491_v14 = vpop.permute.xlu1 %1490 }
 0x303   : > { %7397 = vmatprep.mubr.msk.f32.mxu1 %vm664_vm1, %v1491_v14 }
 0x304   : > { %7398 = vmatmul.mubr.msk.f32.gmra.mrb[68].mxu1 %vm664_vm1, %v1493_v24 }
 0x309   : > { %v1497_v16 = vpop.permute.xlu0 %1496 }
 0x30a   : > { %v1495_v46 = vpop.permute.xlu1 %1494 }
 0x30b   : > { %7400 = vmatprep.mubr.msk.f32.mxu1 %vm664_vm1, %v1495_v46 }
 0x30c   : > { %7401 = vmatmul.mubr.msk.f32.gmra.mrb[70].mxu1 %vm664_vm1, %v1497_v16 }
 0x30d   : > { %v1501_v51 = vpop.permute.xlu0 %1500 }
 0x30e   : > { %v1499_v43 = vpop.permute.xlu1 %1498 }
 0x30f   : > { %7403 = vmatprep.mubr.msk.f32.mxu1 %vm664_vm1, %v1499_v43 }
 0x310   : > { %7404 = vmatmul.mubr.msk.f32.gmra.mrb[72].mxu1 %vm664_vm1, %v1501_v51 }
 0x311   : > { %v1505_v48 = vpop.permute.xlu0 %1504 }
 0x312   : > { %v1503_v22 = vpop.permute.xlu1 %1502 }
 0x313   : > { %7406 = vmatprep.mubr.msk.f32.mxu1 %vm664_vm1, %v1503_v22 }
 0x314   : > { %7407 = vmatmul.mubr.msk.f32.gmra.mrb[74].mxu1 %vm664_vm1, %v1505_v48 }
 0x315   : > { %v1509_v37 = vpop.permute.xlu0 %1508 }
 0x316   : > { %v1507_v28 = vpop.permute.xlu1 %1506 }
 0x317   : > { %7409 = vmatprep.mubr.msk.f32.mxu1 %vm664_vm1, %v1507_v28 }
 0x318   : > { %7410 = vmatmul.mubr.msk.f32.gmra.mrb[76].mxu1 %vm664_vm1, %v1509_v37 }
 0x319   : > { %v1513_v18 = vpop.permute.xlu0 %1512 }
 0x31a   : > { %v1511_v0 = vpop.permute.xlu1 %1510 }
 0x31b   : > { %7412 = vmatprep.mubr.msk.f32.mxu1 %vm664_vm1, %v1511_v0 }
 0x31c   : > { %7413 = vmatmul.mubr.msk.f32.gmra.mrb[78].mxu1 %vm664_vm1, %v1513_v18 }
 0x38a   : > { %v7369_v26 = vpop.f32.mrb[48].mxu1 }
 0x38b   : > { %v1804_v30 = vsel %vm986_vm2, %v7369_v26, 0.0  ;;  %v1644_v56 = vpop.f32.mrb[49].mxu1  ;;  %1997 = vrot.lane.b32.xlu0 %v7369_v26, %s7783_s30 }
 0x38c   : > { %v1803_v52 = vsel %vm986_vm2, %v1644_v56, 0.0  ;;  %1995 = vrot.lane.b32.xlu1 %v1644_v56, %s7783_s30 }
 0x38d   : > { %v1805_v62 = vadd.f32 %v1804_v30, %v1803_v52 }
 0x38f   : > { %v1806_v11 = vrot.slane %v1805_v62, 4  ;;  %v7372_v35 = vpop.f32.mrb[50].mxu1 }
 0x390   : > { %v1813_v53 = vsel %vm986_vm2, %v7372_v35, 0.0  ;;  %v1654_v25 = vpop.f32.mrb[51].mxu1  ;;  %2001 = vrot.lane.b32.xlu0 %v7372_v35, %s7783_s30 }
 0x391   : > { %v1807_v32 = vadd.f32 %v1806_v11, %v1805_v62  ;;  %v1812_v36 = vsel %vm986_vm2, %v1654_v25, 0.0 }
 0x392   : > { %v1814_v12 = vadd.f32 %v1813_v53, %v1812_v36 }
 0x393   : > { %v1808_v29 = vrot.slane %v1807_v32, 2 }
 0x394   : > { %v1815_v47 = vrot.slane %v1814_v12, 4  ;;  %1999 = vrot.lane.b32.xlu0 %v1654_v25, %s7783_s30 }
 0x395   : > { %v1809_v4 = vadd.f32 %v1808_v29, %v1807_v32 }
 0x396   : > { %v1816_v34 = vadd.f32 %v1815_v47, %v1814_v12 }
 0x397   : > { %v7375_v13 = vpop.f32.mrb[52].mxu1  ;;  %v1810_v5 = vrot.slane %v1809_v4, 1 }
 0x398   : > { %v1817_v45 = vrot.slane %v1816_v34, 2  ;;  %v1822_v44 = vsel %vm986_vm2, %v7375_v13, 0.0  ;;  %v1664_v1 = vpop.f32.mrb[53].mxu1  ;;  %2005 = vrot.lane.b32.xlu1 %v7375_v13, %s7783_s30 }
 0x399   : > { %v1821_v14 = vsel %vm986_vm2, %v1664_v1, 0.0  ;;  %2003 = vrot.lane.b32.xlu0 %v1664_v1, %s7783_s30  ;;  %v1811_v24 = vadd.f32 %v1810_v5, %v1809_v4 }
 0x39a   : > { %v1823_v16 = vadd.f32 %v1822_v44, %v1821_v14  ;;  %v1818_v46 = vadd.f32 %v1817_v45, %v1816_v34 }
 0x39b   : > { %v1947_v51 = vmul.f32 0.0625, %v1811_v24 }
 0x39c   : > { %v1824_v43 = vrot.slane %v1823_v16, 4  ;;  %v1819_v48 = vrot.slane %v1818_v46, 1 }
 0x39d   : > { %2139 = vrot.lane.b32.xlu1 %v1947_v51, %s7781_s18 }
 0x39e   : > { %v1825_v22 = vadd.f32 %v1824_v43, %v1823_v16  ;;  %v1820_v28 = vadd.f32 %v1819_v48, %v1818_v46 }
 0x39f   : > { %v7378_v37 = vpop.f32.mrb[54].mxu1 }
 0x3a0   : > { %v1826_v0 = vrot.slane %v1825_v22, 2  ;;  %v1831_v18 = vsel %vm986_vm2, %v7378_v37, 0.0  ;;  %v1674_v26 = vpop.f32.mrb[55].mxu1  ;;  %2009 = vrot.lane.b32.xlu0 %v7378_v37, %s7783_s30  ;;  %v1948_v62 = vmul.f32 0.0625, %v1820_v28 }
 0x3a1   : > { %v1830_v30 = vsel %vm986_vm2, %v1674_v26, 0.0  ;;  %2007 = vrot.lane.b32.xlu1 %v1674_v26, %s7783_s30 }
 0x3a2   : > { %v1832_v56 = vadd.f32 %v1831_v18, %v1830_v30  ;;  %v1827_v52 = vadd.f32 %v1826_v0, %v1825_v22  ;;  %v6864_v0 = vld [vmem:[%s9890_s2 + $0x40] sm:$0xff]  ;;  %v6865_v18 = vld [vmem:[%s9890_s2 + $0x48] sm:$0xff] }
 0x3a3   : > { %v7715_v26 = vpack.c.bf16 %v6865_v18, %v6864_v0 }
 0x3a4   : > { %v1833_v11 = vrot.slane %v1832_v56, 4  ;;  %v1828_v35 = vrot.slane %v1827_v52, 1 }
 0x3a5   : > { %2141 = vrot.lane.b32.xlu1 %v1948_v62, %s7781_s18  ;;  %7716 = vmatprep.subr.bf16.mxu0 %v7715_v26 }
 0x3a6   : > { %v1834_v53 = vadd.f32 %v1833_v11, %v1832_v56  ;;  %v1829_v32 = vadd.f32 %v1828_v35, %v1827_v52  ;;  %7718 = vmatpush3.bf16.msra.mxu0 %v7715_v26 }
 0x3a7   : > { %v7381_v25 = vpop.f32.mrb[56].mxu1 }
 0x3a8   : > { %v1835_v36 = vrot.slane %v1834_v53, 2  ;;  %v1840_v12 = vsel %vm986_vm2, %v7381_v25, 0.0  ;;  %v1684_v29 = vpop.f32.mrb[57].mxu1  ;;  %v1949_v13 = vmul.f32 0.0625, %v1829_v32 }
 0x3a9   : > { %v1839_v47 = vsel %vm986_vm2, %v1684_v29, 0.0  ;;  %2011 = vrot.lane.b32.xlu0 %v1684_v29, %s7783_s30  ;;  %2013 = vrot.lane.b32.xlu1 %v7381_v25, %s7783_s30 }
 0x3aa   : > { %v1841_v4 = vadd.f32 %v1840_v12, %v1839_v47  ;;  %v1836_v34 = vadd.f32 %v1835_v36, %v1834_v53 }
 0x3ac   : > { %v1842_v5 = vrot.slane %v1841_v4, 4  ;;  %v1837_v45 = vrot.slane %v1836_v34, 1 }
 0x3ad   : > { %2143 = vrot.lane.b32.xlu0 %v1949_v13, %s7781_s18 }
 0x3ae   : > { %v1843_v44 = vadd.f32 %v1842_v5, %v1841_v4  ;;  %v1838_v14 = vadd.f32 %v1837_v45, %v1836_v34 }
 0x3af   : > { %v7384_v1 = vpop.f32.mrb[58].mxu1 }
 0x3b0   : > { %v1844_v24 = vrot.slane %v1843_v44, 2  ;;  %v1849_v16 = vsel %vm986_vm2, %v7384_v1, 0.0  ;;  %v1694_v46 = vpop.f32.mrb[59].mxu1  ;;  %v1950_v22 = vmul.f32 0.0625, %v1838_v14 }
 0x3b1   : > { %v1848_v51 = vsel %vm986_vm2, %v1694_v46, 0.0  ;;  %2017 = vrot.lane.b32.xlu0 %v7384_v1, %s7783_s30  ;;  %2015 = vrot.lane.b32.xlu1 %v1694_v46, %s7783_s30 }
 0x3b2   : > { %v1850_v43 = vadd.f32 %v1849_v16, %v1848_v51  ;;  %v1845_v48 = vadd.f32 %v1844_v24, %v1843_v44 }
 0x3b4   : > { %v1851_v37 = vrot.slane %v1850_v43, 4  ;;  %v1846_v28 = vrot.slane %v1845_v48, 1 }
 0x3b5   : > { %2145 = vrot.lane.b32.xlu1 %v1950_v22, %s7781_s18 }
 0x3b6   : > { %v1852_v30 = vadd.f32 %v1851_v37, %v1850_v43  ;;  %v1847_v52 = vadd.f32 %v1846_v28, %v1845_v48 }
 0x3b7   : > { %v7387_v56 = vpop.f32.mrb[60].mxu1 }
 0x3b8   : > { %v1853_v62 = vrot.slane %v1852_v30, 2  ;;  %v1858_v11 = vsel %vm986_vm2, %v7387_v56, 0.0  ;;  %v1704_v35 = vpop.f32.mrb[61].mxu1  ;;  %v1951_v36 = vmul.f32 0.0625, %v1847_v52 }
 0x3b9   : > { %v1857_v53 = vsel %vm986_vm2, %v1704_v35, 0.0  ;;  %2019 = vrot.lane.b32.xlu0 %v1704_v35, %s7783_s30  ;;  %2021 = vrot.lane.b32.xlu1 %v7387_v56, %s7783_s30 }
 0x3ba   : > { %v1859_v25 = vadd.f32 %v1858_v11, %v1857_v53  ;;  %v1854_v32 = vadd.f32 %v1853_v62, %v1852_v30 }
 0x3bc   : > { %v1860_v12 = vrot.slane %v1859_v25, 4  ;;  %v1855_v29 = vrot.slane %v1854_v32, 1 }
 0x3bd   : > { %2147 = vrot.lane.b32.xlu0 %v1951_v36, %s7781_s18 }
 0x3be   : > { %v1861_v47 = vadd.f32 %v1860_v12, %v1859_v25  ;;  %v1856_v34 = vadd.f32 %v1855_v29, %v1854_v32 }
 0x3bf   : > { %v7390_v4 = vpop.f32.mrb[62].mxu1 }
 0x3c0   : > { %v1862_v13 = vrot.slane %v1861_v47, 2  ;;  %v1867_v5 = vsel %vm986_vm2, %v7390_v4, 0.0  ;;  %v1714_v45 = vpop.f32.mrb[63].mxu1  ;;  %v1952_v24 = vmul.f32 0.0625, %v1856_v34 }
 0x3c1   : > { %v1866_v44 = vsel %vm986_vm2, %v1714_v45, 0.0  ;;  %2025 = vrot.lane.b32.xlu0 %v7390_v4, %s7783_s30  ;;  %2023 = vrot.lane.b32.xlu1 %v1714_v45, %s7783_s30 }
 0x3c2   : > { %v1868_v1 = vadd.f32 %v1867_v5, %v1866_v44  ;;  %v1863_v14 = vadd.f32 %v1862_v13, %v1861_v47 }
 0x3c4   : > { %v1869_v16 = vrot.slane %v1868_v1, 4  ;;  %v1864_v46 = vrot.slane %v1863_v14, 1 }
 0x3c5   : > { %2149 = vrot.lane.b32.xlu1 %v1952_v24, %s7781_s18 }
 0x3c6   : > { %v1870_v51 = vadd.f32 %v1869_v16, %v1868_v1  ;;  %v1865_v48 = vadd.f32 %v1864_v46, %v1863_v14 }
 0x3c7   : > { %v7393_v43 = vpop.f32.mrb[64].mxu1 }
 0x3c8   : > { %v1871_v22 = vrot.slane %v1870_v51, 2  ;;  %v1876_v37 = vsel %vm986_vm2, %v7393_v43, 0.0  ;;  %v1724_v28 = vpop.f32.mrb[65].mxu1  ;;  %v1953_v30 = vmul.f32 0.0625, %v1865_v48 }
 0x3c9   : > { %v1875_v0 = vsel %vm986_vm2, %v1724_v28, 0.0  ;;  %2027 = vrot.lane.b32.xlu0 %v1724_v28, %s7783_s30  ;;  %2029 = vrot.lane.b32.xlu1 %v7393_v43, %s7783_s30 }
 0x3ca   : > { %v1877_v18 = vadd.f32 %v1876_v37, %v1875_v0  ;;  %v1872_v26 = vadd.f32 %v1871_v22, %v1870_v51 }
 0x3cc   : > { %v1878_v56 = vrot.slane %v1877_v18, 4  ;;  %v1873_v52 = vrot.slane %v1872_v26, 1 }
 0x3cd   : > { %2151 = vrot.lane.b32.xlu0 %v1953_v30, %s7781_s18 }
 0x3ce   : > { %v1879_v62 = vadd.f32 %v1878_v56, %v1877_v18  ;;  %v1874_v35 = vadd.f32 %v1873_v52, %v1872_v26 }
 0x3cf   : > { %v7396_v11 = vpop.f32.mrb[66].mxu1 }
 0x3d0   : > { %v1880_v53 = vrot.slane %v1879_v62, 2  ;;  %v1885_v25 = vsel %vm986_vm2, %v7396_v11, 0.0  ;;  %v1734_v32 = vpop.f32.mrb[67].mxu1  ;;  %v1954_v47 = vmul.f32 0.0625, %v1874_v35 }
 0x3d1   : > { %v1884_v36 = vsel %vm986_vm2, %v1734_v32, 0.0  ;;  %2033 = vrot.lane.b32.xlu0 %v7396_v11, %s7783_s30  ;;  %2031 = vrot.lane.b32.xlu1 %v1734_v32, %s7783_s30 }
 0x3d2   : > { %v1886_v12 = vadd.f32 %v1885_v25, %v1884_v36  ;;  %v1881_v29 = vadd.f32 %v1880_v53, %v1879_v62 }
 0x3d4   : > { %v1887_v4 = vrot.slane %v1886_v12, 4  ;;  %v1882_v34 = vrot.slane %v1881_v29, 1 }
 0x3d5   : > { %2153 = vrot.lane.b32.xlu1 %v1954_v47, %s7781_s18 }
 0x3d6   : > { %v1888_v13 = vadd.f32 %v1887_v4, %v1886_v12  ;;  %v1883_v45 = vadd.f32 %v1882_v34, %v1881_v29 }
 0x3d7   : > { %v7399_v5 = vpop.f32.mrb[68].mxu1 }
 0x3d8   : > { %v1889_v44 = vrot.slane %v1888_v13, 2  ;;  %v1894_v1 = vsel %vm986_vm2, %v7399_v5, 0.0  ;;  %v1744_v14 = vpop.f32.mrb[69].mxu1  ;;  %v1955_v51 = vmul.f32 0.0625, %v1883_v45 }
 0x3d9   : > { %v1893_v24 = vsel %vm986_vm2, %v1744_v14, 0.0  ;;  %2035 = vrot.lane.b32.xlu0 %v1744_v14, %s7783_s30  ;;  %2037 = vrot.lane.b32.xlu1 %v7399_v5, %s7783_s30 }
 0x3da   : > { %v1890_v16 = vadd.f32 %v1889_v44, %v1888_v13  ;;  %v1895_v46 = vadd.f32 %v1894_v1, %v1893_v24 }
 0x3dc   : > { %v1891_v43 = vrot.slane %v1890_v16, 1  ;;  %v1896_v48 = vrot.slane %v1895_v46, 4 }
 0x3dd   : > { %2155 = vrot.lane.b32.xlu0 %v1955_v51, %s7781_s18  ;;  %v6867_v51 = vld [vmem:[%s9890_s2 + $0x58] sm:$0xff] }
 0x3de   : > { %v1897_v22 = vadd.f32 %v1896_v48, %v1895_v46  ;;  %v1892_v28 = vadd.f32 %v1891_v43, %v1890_v16  ;;  %v6866_v46 = vld [vmem:[%s9890_s2 + $0x50] sm:$0xff] }
 0x3df   : > { %v7402_v37 = vpop.f32.mrb[70].mxu1  ;;  %v7719_v48 = vpack.c.bf16 %v6867_v51, %v6866_v46 }
 0x3e0   : > { %v1898_v0 = vrot.slane %v1897_v22, 2  ;;  %v1903_v18 = vsel %vm986_vm2, %v7402_v37, 0.0  ;;  %v1754_v26 = vpop.f32.mrb[71].mxu1  ;;  %v1956_v11 = vmul.f32 0.0625, %v1892_v28 }
 0x3e1   : > { %v1902_v30 = vsel %vm986_vm2, %v1754_v26, 0.0  ;;  %2041 = vrot.lane.b32.xlu0 %v7402_v37, %s7783_s30  ;;  %2039 = vrot.lane.b32.xlu1 %v1754_v26, %s7783_s30 }
 0x3e2   : > { %v1899_v56 = vadd.f32 %v1898_v0, %v1897_v22  ;;  %v1904_v52 = vadd.f32 %v1903_v18, %v1902_v30  ;;  %7720 = vmatprep.subr.bf16.mxu0 %v7719_v48 }
 0x3e3   : > { %v7405_v62 = vpop.f32.mrb[72].mxu1  ;;  %7722 = vmatpush3.bf16.msra.mxu0 %v7719_v48 }
 0x3e4   : > { %v1900_v35 = vrot.slane %v1899_v56, 1  ;;  %v1905_v53 = vrot.slane %v1904_v52, 4  ;;  %v1912_v25 = vsel %vm986_vm2, %v7405_v62, 0.0  ;;  %v1764_v32 = vpop.f32.mrb[73].mxu1 }
 0x3e5   : > { %v1911_v36 = vsel %vm986_vm2, %v1764_v32, 0.0  ;;  %2043 = vrot.lane.b32.xlu0 %v1764_v32, %s7783_s30  ;;  %2157 = vrot.lane.b32.xlu1 %v1956_v11, %s7781_s18 }
 0x3e6   : > { %v1906_v12 = vadd.f32 %v1905_v53, %v1904_v52  ;;  %v1913_v29 = vadd.f32 %v1912_v25, %v1911_v36  ;;  %v1901_v47 = vadd.f32 %v1900_v35, %v1899_v56 }
 0x3e7   : > { %v7408_v4 = vpop.f32.mrb[74].mxu1 }
 0x3e8   : > { %v1907_v34 = vrot.slane %v1906_v12, 2  ;;  %v1914_v13 = vrot.slane %v1913_v29, 4  ;;  %v1921_v5 = vsel %vm986_vm2, %v7408_v4, 0.0  ;;  %v1774_v45 = vpop.f32.mrb[75].mxu1  ;;  %v1957_v44 = vmul.f32 0.0625, %v1901_v47 }
 0x3e9   : > { %v1920_v1 = vsel %vm986_vm2, %v1774_v45, 0.0  ;;  %2045 = vrot.lane.b32.xlu1 %v7405_v62, %s7783_s30 }
 0x3ea   : > { %v1908_v14 = vadd.f32 %v1907_v34, %v1906_v12  ;;  %v1915_v24 = vadd.f32 %v1914_v13, %v1913_v29  ;;  %v1922_v16 = vadd.f32 %v1921_v5, %v1920_v1  ;;  %2159 = vrot.lane.b32.xlu0 %v1957_v44, %s7781_s18 }
 0x3eb   : > { %v7411_v43 = vpop.f32.mrb[76].mxu1 }
 0x3ec   : > { %v1909_v22 = vrot.slane %v1908_v14, 1  ;;  %v1916_v37 = vrot.slane %v1915_v24, 2  ;;  %v1923_v28 = vrot.slane %v1922_v16, 4  ;;  %v1930_v0 = vsel %vm986_vm2, %v7411_v43, 0.0  ;;  %v1784_v18 = vpop.f32.mrb[77].mxu1 }
 0x3ed   : > { %v1929_v26 = vsel %vm986_vm2, %v1784_v18, 0.0  ;;  %2047 = vrot.lane.b32.xlu1 %v1774_v45, %s7783_s30 }
 0x3ee   : > { %v1917_v30 = vadd.f32 %v1916_v37, %v1915_v24  ;;  %v1924_v56 = vadd.f32 %v1923_v28, %v1922_v16  ;;  %v1931_v52 = vadd.f32 %v1930_v0, %v1929_v26  ;;  %2049 = vrot.lane.b32.xlu0 %v7408_v4, %s7783_s30  ;;  %v1910_v62 = vadd.f32 %v1909_v22, %v1908_v14 }
 0x3ef   : > { %v7414_v11 = vpop.f32.mrb[78].mxu1 }
 0x3f0   : > { %v1918_v35 = vrot.slane %v1917_v30, 1  ;;  %v1925_v53 = vrot.slane %v1924_v56, 2  ;;  %v1932_v25 = vrot.slane %v1931_v52, 4  ;;  %v1939_v32 = vsel %vm986_vm2, %v7414_v11, 0.0  ;;  %v1794_v36 = vpop.f32.mrb[79].mxu1 }
 0x3f1   : > { %v1938_v12 = vsel %vm986_vm2, %v1794_v36, 0.0  ;;  %v1958_v29 = vmul.f32 0.0625, %v1910_v62 }
 0x3f2   : > { %v1926_v47 = vadd.f32 %v1925_v53, %v1924_v56  ;;  %v1933_v34 = vadd.f32 %v1932_v25, %v1931_v52  ;;  %v1940_v13 = vadd.f32 %v1939_v32, %v1938_v12  ;;  %v1919_v5 = vadd.f32 %v1918_v35, %v1917_v30  ;;  %v8542_v30 = vpop.permute.xlu1 %2225  ;;  %v9972_v25 = vld [vmem:[#allocation2_spill] sm:$0xff] }
 0x3f3   : > { %2161 = vrot.lane.b32.xlu1 %v1958_v29, %s7781_s18 }
 0x3f4   : > { %v1927_v45 = vrot.slane %v1926_v47, 1  ;;  %v1934_v4 = vrot.slane %v1933_v34, 2  ;;  %v1941_v44 = vrot.slane %v1940_v13, 4  ;;  %v1959_v1 = vmul.f32 0.0625, %v1919_v5 }
 0x3f6   : > { %v1935_v14 = vadd.f32 %v1934_v4, %v1933_v34  ;;  %v1942_v24 = vadd.f32 %v1941_v44, %v1940_v13  ;;  %2163 = vrot.lane.b32.xlu0 %v1959_v1, %s7781_s18  ;;  %v1928_v16 = vadd.f32 %v1927_v45, %v1926_v47 }
 0x3f7   : > { %2053 = vrot.lane.b32.xlu1 %v7411_v43, %s7783_s30 }
 0x3f8   : > { %v1936_v46 = vrot.slane %v1935_v14, 1  ;;  %v1943_v51 = vrot.slane %v1942_v24, 2  ;;  %v1960_v48 = vmul.f32 0.0625, %v1928_v16 }
 0x3fa   : > { %v1944_v22 = vadd.f32 %v1943_v51, %v1942_v24  ;;  %2051 = vrot.lane.b32.xlu0 %v1784_v18, %s7783_s30  ;;  %v1937_v37 = vadd.f32 %v1936_v46, %v1935_v14 }
 0x3fb   : > { %2165 = vrot.lane.b32.xlu1 %v1960_v48, %s7781_s18 }
 0x3fc   : > { %v1945_v28 = vrot.slane %v1944_v22, 1  ;;  %v1961_v0 = vmul.f32 0.0625, %v1937_v37 }
 0x3fd   : > { %v1998_v43 = vpop.permute.xlu0 %1997 }
 0x3fe   : > { %2167 = vrot.lane.b32.xlu0 %v1961_v0, %s7781_s18  ;;  %v1946_v26 = vadd.f32 %v1945_v28, %v1944_v22  ;;  %v1996_v52 = vpop.permute.xlu1 %1995  ;;  %v2092_v53 = vadd.f32 %v1998_v43, %v7956_v50 }
 0x3ff   : > { %2055 = vrot.lane.b32.xlu1 %v1794_v36, %s7783_s30  ;;  %v2091_v32 = vadd.f32 %v1996_v52, %v9972_v25 }
 0x400   : > { %v1962_v56 = vmul.f32 0.0625, %v1946_v26 }
 0x402   : > { %2057 = vrot.lane.b32.xlu0 %v7414_v11, %s7783_s30  ;;  %v2002_v18 = vpop.permute.xlu0 %2001 }
 0x403   : > { %2169 = vrot.lane.b32.xlu1 %v1962_v56, %s7781_s18  ;;  %v2094_v4 = vadd.f32 %v2002_v18, %v7976_v61 }
 0x406   : > { %v2000_v35 = vpop.permute.xlu0 %1999 }
 0x407   : > { %v2093_v44 = vadd.f32 %v2000_v35, %v7965_v55 }
 0x40a   : > { %v2006_v62 = vpop.permute.xlu1 %2005 }
 0x40b   : > { %v2004_v13 = vpop.permute.xlu0 %2003  ;;  %v2096_v28 = vadd.f32 %v2006_v62, %v7998_v9 }
 0x40c   : > { %v2095_v0 = vadd.f32 %v2004_v13, %v7987_v3 }
 0x40f   : > { %v2140_v12 = vpop.permute.xlu1 %2139 }
 0x410   : > { %v2187_v29 = vadd.f32 %v2140_v12, %v2091_v32  ;;  %v2188_v47 = vadd.f32 %v2140_v12, %v2092_v53 }
 0x412   : > { %v2228_v36 = vadd.f32 %v8542_v30, %v2187_v29  ;;  %v2229_v34 = vadd.f32 %v8542_v30, %v2188_v47  ;;  %v2010_v1 = vpop.permute.xlu0 %2009 }
 0x413   : > { %v2008_v5 = vpop.permute.xlu1 %2007  ;;  %v2098_v29 = vadd.f32 %v2010_v1, %v8020_v21 }
 0x414   : > { %v2260_v11 = vmax.f32 %v2228_v36, 0.0  ;;  %v2261_v45 = vmax.f32 %v2229_v34, 0.0  ;;  %v2097_v62 = vadd.f32 %v2008_v5, %v8009_v15 }
 0x416   : > { %2331 = vrot.lane.b32.xlu1 %v2261_v45, %s7783_s30  ;;  %2329 = vrot.lane.b32.xlu0 %v2260_v11, %s7783_s30 }
 0x417   : > { %v2142_v14 = vpop.permute.xlu1 %2141 }
 0x418   : > { %v2189_v24 = vadd.f32 %v2142_v14, %v2093_v44  ;;  %v2190_v16 = vadd.f32 %v2142_v14, %v2094_v4 }
 0x41a   : > { %v2230_v46 = vadd.f32 %v8542_v30, %v2189_v24  ;;  %v2231_v51 = vadd.f32 %v8542_v30, %v2190_v16 }
 0x41b   : > { %v2012_v48 = vpop.permute.xlu0 %2011  ;;  %v2014_v26 = vpop.permute.xlu1 %2013 }
 0x41c   : > { %v2262_v22 = vmax.f32 %v2230_v46, 0.0  ;;  %v2263_v37 = vmax.f32 %v2231_v51, 0.0  ;;  %v2099_v24 = vadd.f32 %v2012_v48, %v8031_v27  ;;  %v2100_v1 = vadd.f32 %v2014_v26, %v8042_v33 }
 0x41e   : > { %2335 = vrot.lane.b32.xlu1 %v2263_v37, %s7783_s30  ;;  %2333 = vrot.lane.b32.xlu0 %v2262_v22, %s7783_s30 }
 0x41f   : > { %v2144_v56 = vpop.permute.xlu0 %2143 }
 0x420   : > { %v2191_v43 = vadd.f32 %v2144_v56, %v2095_v0  ;;  %v2192_v52 = vadd.f32 %v2144_v56, %v2096_v28 }
 0x422   : > { %v2232_v18 = vadd.f32 %v8542_v30, %v2191_v43  ;;  %v2233_v35 = vadd.f32 %v8542_v30, %v2192_v52 }
 0x423   : > { %v2016_v53 = vpop.permute.xlu1 %2015  ;;  %v2018_v47 = vpop.permute.xlu0 %2017 }
 0x424   : > { %v2264_v32 = vmax.f32 %v2232_v18, 0.0  ;;  %v2265_v12 = vmax.f32 %v2233_v35, 0.0  ;;  %v2102_v43 = vadd.f32 %v2018_v47, %v8058_v42  ;;  %v2101_v48 = vadd.f32 %v2016_v53, %v8051_v38 }
 0x426   : > { %2339 = vrot.lane.b32.xlu1 %v2265_v12, %s7783_s30  ;;  %2337 = vrot.lane.b32.xlu0 %v2264_v32, %s7783_s30 }
 0x427   : > { %v2146_v36 = vpop.permute.xlu1 %2145 }
 0x428   : > { %v2193_v34 = vadd.f32 %v2146_v36, %v2097_v62  ;;  %v2194_v13 = vadd.f32 %v2146_v36, %v2098_v29 }
 0x42a   : > { %v2234_v11 = vadd.f32 %v8542_v30, %v2193_v34  ;;  %v2235_v45 = vadd.f32 %v8542_v30, %v2194_v13 }
 0x42b   : > { %v2020_v4 = vpop.permute.xlu0 %2019  ;;  %v2022_v5 = vpop.permute.xlu1 %2021 }
 0x42c   : > { %v2266_v44 = vmax.f32 %v2234_v11, 0.0  ;;  %v2267_v14 = vmax.f32 %v2235_v45, 0.0  ;;  %v2103_v34 = vadd.f32 %v2020_v4, %v8065_v49  ;;  %v2104_v47 = vadd.f32 %v2022_v5, %v8072_v59 }
 0x42e   : > { %2343 = vrot.lane.b32.xlu1 %v2267_v14, %s7783_s30  ;;  %2341 = vrot.lane.b32.xlu0 %v2266_v44, %s7783_s30 }
 0x42f   : > { %v2148_v16 = vpop.permute.xlu0 %2147 }
 0x430   : > { %v2195_v46 = vadd.f32 %v2148_v16, %v2099_v24  ;;  %v2196_v51 = vadd.f32 %v2148_v16, %v2100_v1 }
 0x432   : > { %v2236_v22 = vadd.f32 %v8542_v30, %v2195_v46  ;;  %v2237_v37 = vadd.f32 %v8542_v30, %v2196_v51 }
 0x433   : > { %v2024_v28 = vpop.permute.xlu1 %2023  ;;  %v2026_v26 = vpop.permute.xlu0 %2025 }
 0x434   : > { %v2268_v0 = vmax.f32 %v2236_v22, 0.0  ;;  %v2269_v56 = vmax.f32 %v2237_v37, 0.0  ;;  %v2106_v46 = vadd.f32 %v2026_v26, %v8086_v19  ;;  %v2105_v4 = vadd.f32 %v2024_v28, %v8079_v7 }
 0x436   : > { %2347 = vrot.lane.b32.xlu1 %v2269_v56, %s7783_s30  ;;  %2345 = vrot.lane.b32.xlu0 %v2268_v0, %s7783_s30 }
 0x437   : > { %v2150_v52 = vpop.permute.xlu1 %2149 }
 0x438   : > { %v2197_v18 = vadd.f32 %v2150_v52, %v2101_v48  ;;  %v2198_v35 = vadd.f32 %v2150_v52, %v2102_v43 }
 0x43a   : > { %v2238_v32 = vadd.f32 %v8542_v30, %v2197_v18  ;;  %v2239_v12 = vadd.f32 %v8542_v30, %v2198_v35 }
 0x43b   : > { %v2028_v29 = vpop.permute.xlu0 %2027  ;;  %v2030_v53 = vpop.permute.xlu1 %2029 }
 0x43c   : > { %v2270_v62 = vmax.f32 %v2238_v32, 0.0  ;;  %v2271_v36 = vmax.f32 %v2239_v12, 0.0  ;;  %v2107_v18 = vadd.f32 %v2028_v29, %v8093_v31  ;;  %v2108_v26 = vadd.f32 %v2030_v53, %v8100_v41 }
 0x43e   : > { %2351 = vrot.lane.b32.xlu1 %v2271_v36, %s7783_s30  ;;  %2349 = vrot.lane.b32.xlu0 %v2270_v62, %s7783_s30 }
 0x43f   : > { %v2152_v13 = vpop.permute.xlu0 %2151 }
 0x440   : > { %v2199_v11 = vadd.f32 %v2152_v13, %v2103_v34  ;;  %v2200_v45 = vadd.f32 %v2152_v13, %v2104_v47 }
 0x442   : > { %v2240_v44 = vadd.f32 %v8542_v30, %v2199_v11  ;;  %v2241_v14 = vadd.f32 %v8542_v30, %v2200_v45 }
 0x443   : > { %v2032_v24 = vpop.permute.xlu1 %2031  ;;  %v2034_v5 = vpop.permute.xlu0 %2033 }
 0x444   : > { %v2272_v1 = vmax.f32 %v2240_v44, 0.0  ;;  %v2273_v16 = vmax.f32 %v2241_v14, 0.0  ;;  %v2110_v29 = vadd.f32 %v2034_v5, %v8114_v17  ;;  %v2109_v53 = vadd.f32 %v2032_v24, %v8107_v57 }
 0x446   : > { %2355 = vrot.lane.b32.xlu1 %v2273_v16, %s7783_s30  ;;  %2353 = vrot.lane.b32.xlu0 %v2272_v1, %s7783_s30 }
 0x447   : > { %v2154_v51 = vpop.permute.xlu1 %2153 }
 0x448   : > { %v2201_v22 = vadd.f32 %v2154_v51, %v2105_v4  ;;  %v2202_v37 = vadd.f32 %v2154_v51, %v2106_v46 }
 0x44a   : > { %v2242_v0 = vadd.f32 %v8542_v30, %v2201_v22  ;;  %v2243_v56 = vadd.f32 %v8542_v30, %v2202_v37 }
 0x44b   : > { %v2036_v43 = vpop.permute.xlu0 %2035  ;;  %v2038_v28 = vpop.permute.xlu1 %2037 }
 0x44c   : > { %v2274_v48 = vmax.f32 %v2242_v0, 0.0  ;;  %v2275_v52 = vmax.f32 %v2243_v56, 0.0  ;;  %v2111_v4 = vadd.f32 %v2036_v43, %v8121_v39  ;;  %v2112_v51 = vadd.f32 %v2038_v28, %v8128_v63 }
 0x44e   : > { %2359 = vrot.lane.b32.xlu1 %v2275_v52, %s7783_s30  ;;  %2357 = vrot.lane.b32.xlu0 %v2274_v48, %s7783_s30 }
 0x44f   : > { %v2156_v35 = vpop.permute.xlu0 %2155 }
 0x450   : > { %v2203_v32 = vadd.f32 %v2156_v35, %v2107_v18  ;;  %v2204_v12 = vadd.f32 %v2156_v35, %v2108_v26 }
 0x452   : > { %v2244_v62 = vadd.f32 %v8542_v30, %v2203_v32  ;;  %v2245_v36 = vadd.f32 %v8542_v30, %v2204_v12 }
 0x453   : > { %v2042_v34 = vpop.permute.xlu0 %2041  ;;  %v2040_v47 = vpop.permute.xlu1 %2039 }
 0x454   : > { %v2276_v13 = vmax.f32 %v2244_v62, 0.0  ;;  %v2277_v11 = vmax.f32 %v2245_v36, 0.0  ;;  %v2114_v43 = vadd.f32 %v2042_v34, %v8144_v10  ;;  %v2113_v28 = vadd.f32 %v2040_v47, %v8135_v23 }
 0x456   : > { %2363 = vrot.lane.b32.xlu1 %v2277_v11, %s7783_s30  ;;  %2361 = vrot.lane.b32.xlu0 %v2276_v13, %s7783_s30 }
 0x457   : > { %v2044_v45 = vpop.permute.xlu0 %2043  ;;  %v2158_v44 = vpop.permute.xlu1 %2157 }
 0x458   : > { %v2205_v14 = vadd.f32 %v2158_v44, %v2109_v53  ;;  %v2206_v1 = vadd.f32 %v2158_v44, %v2110_v29  ;;  %v2115_v13 = vadd.f32 %v2044_v45, %v7963_v54 }
 0x45a   : > { %v2246_v16 = vadd.f32 %v8542_v30, %v2205_v14  ;;  %v2247_v46 = vadd.f32 %v8542_v30, %v2206_v1 }
 0x45b   : > { %v2046_v22 = vpop.permute.xlu1 %2045 }
 0x45c   : > { %v2278_v5 = vmax.f32 %v2246_v16, 0.0  ;;  %v2279_v37 = vmax.f32 %v2247_v46, 0.0  ;;  %v2160_v24 = vpop.permute.xlu0 %2159  ;;  %v2116_v11 = vadd.f32 %v2046_v22, %v7974_v60 }
 0x45d   : > { %v2207_v0 = vadd.f32 %v2160_v24, %v2111_v4  ;;  %v2208_v56 = vadd.f32 %v2160_v24, %v2112_v51 }
 0x45e   : > { %2367 = vrot.lane.b32.xlu1 %v2279_v37, %s7783_s30  ;;  %2365 = vrot.lane.b32.xlu0 %v2278_v5, %s7783_s30 }
 0x45f   : > { %v2248_v48 = vadd.f32 %v8542_v30, %v2207_v0  ;;  %v2249_v52 = vadd.f32 %v8542_v30, %v2208_v56  ;;  %v2048_v18 = vpop.permute.xlu1 %2047 }
 0x460   : > { %v2050_v32 = vpop.permute.xlu0 %2049  ;;  %v2117_v51 = vadd.f32 %v2048_v18, %v7985_v2 }
 0x461   : > { %v2280_v26 = vmax.f32 %v2248_v48, 0.0  ;;  %v2281_v35 = vmax.f32 %v2249_v52, 0.0  ;;  %v2118_v45 = vadd.f32 %v2050_v32, %v7996_v8 }
 0x463   : > { %2371 = vrot.lane.b32.xlu1 %v2281_v35, %s7783_s30  ;;  %2369 = vrot.lane.b32.xlu0 %v2280_v26, %s7783_s30 }
 0x465   : > { %v2162_v12 = vpop.permute.xlu1 %2161 }
 0x466   : > { %v2209_v62 = vadd.f32 %v2162_v12, %v2113_v28  ;;  %v2210_v36 = vadd.f32 %v2162_v12, %v2114_v43 }
 0x468   : > { %v2250_v29 = vadd.f32 %v8542_v30, %v2209_v62  ;;  %v2251_v53 = vadd.f32 %v8542_v30, %v2210_v36  ;;  %v2164_v44 = vpop.permute.xlu0 %2163 }
 0x469   : > { %v2211_v14 = vadd.f32 %v2164_v44, %v2115_v13  ;;  %v2212_v1 = vadd.f32 %v2164_v44, %v2116_v11  ;;  %v2054_v16 = vpop.permute.xlu1 %2053 }
 0x46a   : > { %v2282_v46 = vmax.f32 %v2250_v29, 0.0  ;;  %v2283_v34 = vmax.f32 %v2251_v53, 0.0  ;;  %v2120_v48 = vadd.f32 %v2054_v16, %v8018_v20 }
 0x46b   : > { %v2252_v47 = vadd.f32 %v8542_v30, %v2211_v14  ;;  %v2253_v4 = vadd.f32 %v8542_v30, %v2212_v1 }
 0x46c   : > { %2375 = vrot.lane.b32.xlu1 %v2283_v34, %s7783_s30  ;;  %2373 = vrot.lane.b32.xlu0 %v2282_v46, %s7783_s30  ;;  %v2052_v22 = vpop.permute.xlu0 %2051 }
 0x46d   : > { %v2284_v5 = vmax.f32 %v2252_v47, 0.0  ;;  %v2285_v37 = vmax.f32 %v2253_v4, 0.0  ;;  %v2166_v24 = vpop.permute.xlu1 %2165  ;;  %v2119_v52 = vadd.f32 %v2052_v22, %v9969_v58 }
 0x46e   : > { %v2213_v0 = vadd.f32 %v2166_v24, %v2117_v51  ;;  %v2214_v56 = vadd.f32 %v2166_v24, %v2118_v45  ;;  %v6900_v45 = vld [vmem:[%s9891_s3 + $0x3] ss:$0 sm:$0xff] }
 0x470   : > { %v2254_v26 = vadd.f32 %v8542_v30, %v2213_v0  ;;  %v2255_v18 = vadd.f32 %v8542_v30, %v2214_v56  ;;  %2379 = vrot.lane.b32.xlu1 %v2285_v37, %s7783_s30  ;;  %2377 = vrot.lane.b32.xlu0 %v2284_v5, %s7783_s30  ;;  %v2168_v35 = vpop.permute.xlu0 %2167 }
 0x471   : > { %v2215_v43 = vadd.f32 %v2168_v35, %v2119_v52  ;;  %v2216_v28 = vadd.f32 %v2168_v35, %v2120_v48  ;;  %v2056_v32 = vpop.permute.xlu1 %2055 }
 0x472   : > { %v2286_v12 = vmax.f32 %v2254_v26, 0.0  ;;  %v2287_v62 = vmax.f32 %v2255_v18, 0.0  ;;  %v2121_v11 = vadd.f32 %v2056_v32, %v9971_v6 }
 0x473   : > { %v2256_v36 = vadd.f32 %v8542_v30, %v2215_v43  ;;  %v2257_v13 = vadd.f32 %v8542_v30, %v2216_v28 }
 0x474   : > { %2383 = vrot.lane.b32.xlu1 %v2287_v62, %s7783_s30  ;;  %2381 = vrot.lane.b32.xlu0 %v2286_v12, %s7783_s30  ;;  %v2058_v29 = vpop.permute.xlu0 %2057 }
 0x475   : > { %v2288_v53 = vmax.f32 %v2256_v36, 0.0  ;;  %v2289_v44 = vmax.f32 %v2257_v13, 0.0  ;;  %v2122_v14 = vadd.f32 %v2058_v29, %v9970_v40  ;;  %v2170_v1 = vpop.permute.xlu1 %2169 }
 0x476   : > { %v2217_v16 = vadd.f32 %v2170_v1, %v2121_v11 }
 0x477   : > { %v2218_v46 = vadd.f32 %v2170_v1, %v2122_v14 }
 0x478   : > { %v2258_v34 = vadd.f32 %v8542_v30, %v2217_v16  ;;  %2387 = vrot.lane.b32.xlu1 %v2289_v44, %s7783_s30  ;;  %2385 = vrot.lane.b32.xlu0 %v2288_v53, %s7783_s30 }
 0x479   : > { %v2259_v47 = vadd.f32 %v8542_v30, %v2218_v46 }
 0x47a   : > { %v2290_v4 = vmax.f32 %v2258_v34, 0.0 }
 0x47b   : > { %v2291_v51 = vmax.f32 %v2259_v47, 0.0 }
 0x47c   : > { %2389 = vrot.lane.b32.xlu0 %v2290_v4, %s7783_s30 }
 0x47d   : > { %2391 = vrot.lane.b32.xlu1 %v2291_v51, %s7783_s30 }
 0x480   : > { %3104 = vrot.lane.b32.xlu0 %v6900_v45, %s7782_s27 }
 0x488   : > { %v2330_v22 = vpop.permute.xlu0 %2329  ;;  %v2332_v5 = vpop.permute.xlu1 %2331 }
 0x489   : > { %7423 = vmatprep.mubr.msk.f32.mxu0 %vm664_vm1, %v2330_v22 }
 0x48a   : > { %7424 = vmatmul.mubr.msk.f32.vlgmr.msra.gmra.mrb[48].mxu0 %vm664_vm1, %v2332_v5 }
 0x490   : > { %v2334_v37 = vpop.permute.xlu0 %2333  ;;  %v2336_v30 = vpop.permute.xlu1 %2335 }
 0x491   : > { %7426 = vmatprep.mubr.msk.f32.mxu0 %vm664_vm1, %v2334_v37 }
 0x492   : > { %7427 = vmatmul.mubr.msk.f32.gmra.mrb[50].mxu0 %vm664_vm1, %v2336_v30 }
 0x498   : > { %v2338_v24 = vpop.permute.xlu0 %2337  ;;  %v2340_v0 = vpop.permute.xlu1 %2339 }
 0x499   : > { %7429 = vmatprep.mubr.msk.f32.mxu0 %vm664_vm1, %v2338_v24 }
 0x49a   : > { %7430 = vmatmul.mubr.msk.f32.gmra.mrb[52].mxu0 %vm664_vm1, %v2340_v0 }
 0x4a0   : > { %v2342_v56 = vpop.permute.xlu0 %2341  ;;  %v2344_v48 = vpop.permute.xlu1 %2343 }
 0x4a1   : > { %7432 = vmatprep.mubr.msk.f32.mxu0 %vm664_vm1, %v2342_v56 }
 0x4a2   : > { %7433 = vmatmul.mubr.msk.f32.gmra.mrb[54].mxu0 %vm664_vm1, %v2344_v48 }
 0x4a8   : > { %v2346_v52 = vpop.permute.xlu0 %2345  ;;  %v2348_v26 = vpop.permute.xlu1 %2347 }
 0x4a9   : > { %7435 = vmatprep.mubr.msk.f32.mxu0 %vm664_vm1, %v2346_v52 }
 0x4aa   : > { %7436 = vmatmul.mubr.msk.f32.gmra.mrb[56].mxu0 %vm664_vm1, %v2348_v26 }
 0x4b0   : > { %v2350_v18 = vpop.permute.xlu0 %2349  ;;  %v2352_v35 = vpop.permute.xlu1 %2351 }
 0x4b1   : > { %7438 = vmatprep.mubr.msk.f32.mxu0 %vm664_vm1, %v2350_v18 }
 0x4b2   : > { %7439 = vmatmul.mubr.msk.f32.gmra.mrb[58].mxu0 %vm664_vm1, %v2352_v35 }
 0x4b8   : > { %v2354_v43 = vpop.permute.xlu0 %2353  ;;  %v2356_v28 = vpop.permute.xlu1 %2355 }
 0x4b9   : > { %7441 = vmatprep.mubr.msk.f32.mxu0 %vm664_vm1, %v2354_v43 }
 0x4ba   : > { %7442 = vmatmul.mubr.msk.f32.gmra.mrb[60].mxu0 %vm664_vm1, %v2356_v28 }
 0x4c0   : > { %v2358_v32 = vpop.permute.xlu0 %2357  ;;  %v2360_v12 = vpop.permute.xlu1 %2359 }
 0x4c1   : > { %7444 = vmatprep.mubr.msk.f32.mxu0 %vm664_vm1, %v2358_v32 }
 0x4c2   : > { %7445 = vmatmul.mubr.msk.f32.gmra.mrb[62].mxu0 %vm664_vm1, %v2360_v12 }
 0x4c8   : > { %v2362_v62 = vpop.permute.xlu0 %2361  ;;  %v2364_v36 = vpop.permute.xlu1 %2363 }
 0x4c9   : > { %7447 = vmatprep.mubr.msk.f32.mxu0 %vm664_vm1, %v2362_v62 }
 0x4ca   : > { %7448 = vmatmul.mubr.msk.f32.gmra.mrb[64].mxu0 %vm664_vm1, %v2364_v36 }
 0x4d0   : > { %v2366_v13 = vpop.permute.xlu0 %2365  ;;  %v2368_v11 = vpop.permute.xlu1 %2367 }
 0x4d1   : > { %7450 = vmatprep.mubr.msk.f32.mxu0 %vm664_vm1, %v2366_v13 }
 0x4d2   : > { %7451 = vmatmul.mubr.msk.f32.gmra.mrb[66].mxu0 %vm664_vm1, %v2368_v11 }
 0x4d5   : > { %v2370_v29 = vpop.permute.xlu0 %2369  ;;  %v2372_v53 = vpop.permute.xlu1 %2371 }
 0x4d6   : > { %7453 = vmatprep.mubr.msk.f32.mxu0 %vm664_vm1, %v2370_v29 }
 0x4d7   : > { %7454 = vmatmul.mubr.msk.f32.gmra.mrb[68].mxu0 %vm664_vm1, %v2372_v53 }
 0x4de   : > { %v2374_v44 = vpop.permute.xlu0 %2373  ;;  %v2376_v14 = vpop.permute.xlu1 %2375 }
 0x4df   : > { %7456 = vmatprep.mubr.msk.f32.mxu0 %vm664_vm1, %v2374_v44 }
 0x4e0   : > { %7457 = vmatmul.mubr.msk.f32.gmra.mrb[70].mxu0 %vm664_vm1, %v2376_v14 }
 0x4e2   : > { %v2378_v1 = vpop.permute.xlu0 %2377  ;;  %v2380_v16 = vpop.permute.xlu1 %2379 }
 0x4e3   : > { %7459 = vmatprep.mubr.msk.f32.mxu0 %vm664_vm1, %v2378_v1 }
 0x4e4   : > { %7460 = vmatmul.mubr.msk.f32.gmra.mrb[72].mxu0 %vm664_vm1, %v2380_v16 }
 0x4e6   : > { %v2382_v46 = vpop.permute.xlu0 %2381  ;;  %v2384_v34 = vpop.permute.xlu1 %2383 }
 0x4e7   : > { %7462 = vmatprep.mubr.msk.f32.mxu0 %vm664_vm1, %v2382_v46 }
 0x4e8   : > { %7463 = vmatmul.mubr.msk.f32.gmra.mrb[74].mxu0 %vm664_vm1, %v2384_v34 }
 0x4ea   : > { %v2386_v47 = vpop.permute.xlu0 %2385  ;;  %v2388_v4 = vpop.permute.xlu1 %2387 }
 0x4eb   : > { %7465 = vmatprep.mubr.msk.f32.mxu0 %vm664_vm1, %v2386_v47 }
 0x4ec   : > { %7466 = vmatmul.mubr.msk.f32.gmra.mrb[76].mxu0 %vm664_vm1, %v2388_v4 }
 0x4ee   : > { %v2390_v51 = vpop.permute.xlu0 %2389 }
 0x4ef   : > { %7468 = vmatprep.mubr.msk.f32.mxu0 %vm664_vm1, %v2390_v51  ;;  %v2392_v45 = vpop.permute.xlu1 %2391 }
 0x4f0   : > { %7469 = vmatmul.mubr.msk.f32.gmra.mrb[78].mxu0 %vm664_vm1, %v2392_v45 }
 0x55d   : > { %v7425_v22 = vpop.f32.mrb[48].mxu0 }
 0x55e   : > { %v2683_v5 = vsel %vm986_vm2, %v7425_v22, 0.0  ;;  %2876 = vrot.lane.b32.xlu1 %v7425_v22, %s7782_s27  ;;  %v2523_v37 = vpop.f32.mrb[49].mxu0 }
 0x55f   : > { %v2682_v30 = vsel %vm986_vm2, %v2523_v37, 0.0  ;;  %2874 = vrot.lane.b32.xlu0 %v2523_v37, %s7782_s27 }
 0x560   : > { %v2684_v24 = vadd.f32 %v2683_v5, %v2682_v30 }
 0x562   : > { %v2685_v0 = vrot.slane %v2684_v24, 4 }
 0x564   : > { %v2686_v56 = vadd.f32 %v2685_v0, %v2684_v24 }
 0x565   : > { %v7428_v48 = vpop.f32.mrb[50].mxu0 }
 0x566   : > { %v2687_v52 = vrot.slane %v2686_v56, 2  ;;  %v2692_v26 = vsel %vm986_vm2, %v7428_v48, 0.0  ;;  %2880 = vrot.lane.b32.xlu1 %v7428_v48, %s7782_s27  ;;  %v2533_v18 = vpop.f32.mrb[51].mxu0 }
 0x567   : > { %v2691_v35 = vsel %vm986_vm2, %v2533_v18, 0.0 }
 0x568   : > { %v2688_v43 = vadd.f32 %v2687_v52, %v2686_v56  ;;  %v2693_v28 = vadd.f32 %v2692_v26, %v2691_v35 }
 0x56a   : > { %v2689_v32 = vrot.slane %v2688_v43, 1  ;;  %v2694_v12 = vrot.slane %v2693_v28, 4  ;;  %2878 = vrot.lane.b32.xlu1 %v2533_v18, %s7782_s27 }
 0x56c   : > { %v2695_v62 = vadd.f32 %v2694_v12, %v2693_v28  ;;  %v2690_v36 = vadd.f32 %v2689_v32, %v2688_v43 }
 0x56d   : > { %v7431_v13 = vpop.f32.mrb[52].mxu0 }
 0x56e   : > { %v2696_v11 = vrot.slane %v2695_v62, 2  ;;  %v2701_v29 = vsel %vm986_vm2, %v7431_v13, 0.0  ;;  %2884 = vrot.lane.b32.xlu0 %v7431_v13, %s7782_s27  ;;  %v2543_v53 = vpop.f32.mrb[53].mxu0  ;;  %v2826_v16 = vmul.f32 0.0625, %v2690_v36 }
 0x56f   : > { %v2700_v44 = vsel %vm986_vm2, %v2543_v53, 0.0  ;;  %2882 = vrot.lane.b32.xlu1 %v2543_v53, %s7782_s27 }
 0x570   : > { %v2697_v14 = vadd.f32 %v2696_v11, %v2695_v62  ;;  %v2702_v1 = vadd.f32 %v2701_v29, %v2700_v44 }
 0x572   : > { %v2698_v46 = vrot.slane %v2697_v14, 1  ;;  %v2703_v34 = vrot.slane %v2702_v1, 4  ;;  %3018 = vrot.lane.b32.xlu0 %v2826_v16, %s7783_s30 }
 0x574   : > { %v2704_v47 = vadd.f32 %v2703_v34, %v2702_v1  ;;  %v2699_v51 = vadd.f32 %v2698_v46, %v2697_v14 }
 0x575   : > { %v7434_v4 = vpop.f32.mrb[54].mxu0 }
 0x576   : > { %v2705_v45 = vrot.slane %v2704_v47, 2  ;;  %v2710_v22 = vsel %vm986_vm2, %v7434_v4, 0.0  ;;  %2888 = vrot.lane.b32.xlu1 %v7434_v4, %s7782_s27  ;;  %v2553_v5 = vpop.f32.mrb[55].mxu0  ;;  %v2827_v0 = vmul.f32 0.0625, %v2699_v51 }
 0x577   : > { %v2709_v37 = vsel %vm986_vm2, %v2553_v5, 0.0  ;;  %2886 = vrot.lane.b32.xlu0 %v2553_v5, %s7782_s27 }
 0x578   : > { %v2706_v30 = vadd.f32 %v2705_v45, %v2704_v47  ;;  %v2711_v24 = vadd.f32 %v2710_v22, %v2709_v37 }
 0x57a   : > { %v2707_v56 = vrot.slane %v2706_v30, 1  ;;  %v2712_v48 = vrot.slane %v2711_v24, 4 }
 0x57b   : > { %3020 = vrot.lane.b32.xlu0 %v2827_v0, %s7783_s30 }
 0x57c   : > { %v2713_v52 = vadd.f32 %v2712_v48, %v2711_v24  ;;  %v2708_v18 = vadd.f32 %v2707_v56, %v2706_v30 }
 0x57d   : > { %v7437_v26 = vpop.f32.mrb[56].mxu0 }
 0x57e   : > { %v2714_v35 = vrot.slane %v2713_v52, 2  ;;  %v2719_v43 = vsel %vm986_vm2, %v7437_v26, 0.0  ;;  %v2563_v28 = vpop.f32.mrb[57].mxu0  ;;  %v2828_v36 = vmul.f32 0.0625, %v2708_v18 }
 0x57f   : > { %v2718_v32 = vsel %vm986_vm2, %v2563_v28, 0.0  ;;  %2892 = vrot.lane.b32.xlu0 %v7437_v26, %s7782_s27  ;;  %2890 = vrot.lane.b32.xlu1 %v2563_v28, %s7782_s27 }
 0x580   : > { %v2715_v12 = vadd.f32 %v2714_v35, %v2713_v52  ;;  %v2720_v62 = vadd.f32 %v2719_v43, %v2718_v32 }
 0x582   : > { %v2716_v13 = vrot.slane %v2715_v12, 1  ;;  %v2721_v11 = vrot.slane %v2720_v62, 4 }
 0x583   : > { %3022 = vrot.lane.b32.xlu1 %v2828_v36, %s7783_s30 }
 0x584   : > { %v2722_v29 = vadd.f32 %v2721_v11, %v2720_v62  ;;  %v2717_v44 = vadd.f32 %v2716_v13, %v2715_v12 }
 0x585   : > { %v7440_v53 = vpop.f32.mrb[58].mxu0 }
 0x586   : > { %v2723_v14 = vrot.slane %v2722_v29, 2  ;;  %v2728_v1 = vsel %vm986_vm2, %v7440_v53, 0.0  ;;  %v2573_v16 = vpop.f32.mrb[59].mxu0  ;;  %v2829_v4 = vmul.f32 0.0625, %v2717_v44 }
 0x587   : > { %v2727_v46 = vsel %vm986_vm2, %v2573_v16, 0.0  ;;  %2896 = vrot.lane.b32.xlu1 %v7440_v53, %s7782_s27  ;;  %2894 = vrot.lane.b32.xlu0 %v2573_v16, %s7782_s27 }
 0x588   : > { %v2724_v34 = vadd.f32 %v2723_v14, %v2722_v29  ;;  %v2729_v47 = vadd.f32 %v2728_v1, %v2727_v46 }
 0x58a   : > { %v2725_v51 = vrot.slane %v2724_v34, 1  ;;  %v2730_v45 = vrot.slane %v2729_v47, 4 }
 0x58b   : > { %3024 = vrot.lane.b32.xlu0 %v2829_v4, %s7783_s30 }
 0x58c   : > { %v2731_v22 = vadd.f32 %v2730_v45, %v2729_v47  ;;  %v2726_v37 = vadd.f32 %v2725_v51, %v2724_v34 }
 0x58d   : > { %v7443_v5 = vpop.f32.mrb[60].mxu0 }
 0x58e   : > { %v2732_v30 = vrot.slane %v2731_v22, 2  ;;  %v2737_v24 = vsel %vm986_vm2, %v7443_v5, 0.0  ;;  %v2583_v0 = vpop.f32.mrb[61].mxu0  ;;  %v2830_v26 = vmul.f32 0.0625, %v2726_v37 }
 0x58f   : > { %v2736_v56 = vsel %vm986_vm2, %v2583_v0, 0.0  ;;  %2900 = vrot.lane.b32.xlu0 %v7443_v5, %s7782_s27  ;;  %2898 = vrot.lane.b32.xlu1 %v2583_v0, %s7782_s27 }
 0x590   : > { %v2733_v48 = vadd.f32 %v2732_v30, %v2731_v22  ;;  %v2738_v52 = vadd.f32 %v2737_v24, %v2736_v56 }
 0x592   : > { %v2734_v18 = vrot.slane %v2733_v48, 1  ;;  %v2739_v35 = vrot.slane %v2738_v52, 4 }
 0x593   : > { %3026 = vrot.lane.b32.xlu1 %v2830_v26, %s7783_s30 }
 0x594   : > { %v2740_v43 = vadd.f32 %v2739_v35, %v2738_v52  ;;  %v2735_v32 = vadd.f32 %v2734_v18, %v2733_v48 }
 0x595   : > { %v7446_v28 = vpop.f32.mrb[62].mxu0 }
 0x596   : > { %v2741_v12 = vrot.slane %v2740_v43, 2  ;;  %v2746_v62 = vsel %vm986_vm2, %v7446_v28, 0.0  ;;  %v2593_v36 = vpop.f32.mrb[63].mxu0  ;;  %v2831_v53 = vmul.f32 0.0625, %v2735_v32 }
 0x597   : > { %v2745_v13 = vsel %vm986_vm2, %v2593_v36, 0.0  ;;  %2904 = vrot.lane.b32.xlu1 %v7446_v28, %s7782_s27  ;;  %2902 = vrot.lane.b32.xlu0 %v2593_v36, %s7782_s27 }
 0x598   : > { %v2742_v11 = vadd.f32 %v2741_v12, %v2740_v43  ;;  %v2747_v29 = vadd.f32 %v2746_v62, %v2745_v13 }
 0x59a   : > { %v2743_v44 = vrot.slane %v2742_v11, 1  ;;  %v2748_v14 = vrot.slane %v2747_v29, 4 }
 0x59b   : > { %3028 = vrot.lane.b32.xlu0 %v2831_v53, %s7783_s30 }
 0x59c   : > { %v2749_v1 = vadd.f32 %v2748_v14, %v2747_v29  ;;  %v2744_v46 = vadd.f32 %v2743_v44, %v2742_v11 }
 0x59d   : > { %v7449_v16 = vpop.f32.mrb[64].mxu0 }
 0x59e   : > { %v2750_v34 = vrot.slane %v2749_v1, 2  ;;  %v2755_v47 = vsel %vm986_vm2, %v7449_v16, 0.0  ;;  %v2603_v4 = vpop.f32.mrb[65].mxu0  ;;  %v2832_v5 = vmul.f32 0.0625, %v2744_v46 }
 0x59f   : > { %v2754_v51 = vsel %vm986_vm2, %v2603_v4, 0.0  ;;  %2908 = vrot.lane.b32.xlu0 %v7449_v16, %s7782_s27  ;;  %2906 = vrot.lane.b32.xlu1 %v2603_v4, %s7782_s27 }
 0x5a0   : > { %v2751_v45 = vadd.f32 %v2750_v34, %v2749_v1  ;;  %v2756_v22 = vadd.f32 %v2755_v47, %v2754_v51  ;;  %v6901_v34 = vld [vmem:[%s9890_s2 + $0x60] sm:$0xff]  ;;  %v6902_v47 = vld [vmem:[%s9890_s2 + $0x68] sm:$0xff] }
 0x5a1   : > { %v7723_v51 = vpack.c.bf16 %v6902_v47, %v6901_v34 }
 0x5a2   : > { %v2752_v37 = vrot.slane %v2751_v45, 1  ;;  %v2757_v30 = vrot.slane %v2756_v22, 4 }
 0x5a3   : > { %3030 = vrot.lane.b32.xlu1 %v2832_v5, %s7783_s30  ;;  %7724 = vmatprep.subr.bf16.mxu1 %v7723_v51 }
 0x5a4   : > { %v2758_v24 = vadd.f32 %v2757_v30, %v2756_v22  ;;  %v2753_v56 = vadd.f32 %v2752_v37, %v2751_v45  ;;  %7726 = vmatpush3.bf16.msra.mxu1 %v7723_v51 }
 0x5a5   : > { %v7452_v0 = vpop.f32.mrb[66].mxu0 }
 0x5a6   : > { %v2759_v48 = vrot.slane %v2758_v24, 2  ;;  %v2764_v52 = vsel %vm986_vm2, %v7452_v0, 0.0  ;;  %v2613_v26 = vpop.f32.mrb[67].mxu0  ;;  %v2833_v28 = vmul.f32 0.0625, %v2753_v56 }
 0x5a7   : > { %v2763_v18 = vsel %vm986_vm2, %v2613_v26, 0.0  ;;  %2912 = vrot.lane.b32.xlu1 %v7452_v0, %s7782_s27  ;;  %2910 = vrot.lane.b32.xlu0 %v2613_v26, %s7782_s27 }
 0x5a8   : > { %v2760_v35 = vadd.f32 %v2759_v48, %v2758_v24  ;;  %v2765_v43 = vadd.f32 %v2764_v52, %v2763_v18 }
 0x5aa   : > { %v2761_v32 = vrot.slane %v2760_v35, 1  ;;  %v2766_v12 = vrot.slane %v2765_v43, 4  ;;  %v7455_v62 = vpop.f32.mrb[68].mxu0 }
 0x5ab   : > { %v2773_v36 = vsel %vm986_vm2, %v7455_v62, 0.0  ;;  %3032 = vrot.lane.b32.xlu0 %v2833_v28, %s7783_s30  ;;  %v2623_v13 = vpop.f32.mrb[69].mxu0 }
 0x5ac   : > { %v2767_v11 = vadd.f32 %v2766_v12, %v2765_v43  ;;  %v2772_v29 = vsel %vm986_vm2, %v2623_v13, 0.0  ;;  %2914 = vrot.lane.b32.xlu1 %v2623_v13, %s7782_s27  ;;  %v2762_v53 = vadd.f32 %v2761_v32, %v2760_v35 }
 0x5ad   : > { %v2774_v44 = vadd.f32 %v2773_v36, %v2772_v29 }
 0x5ae   : > { %v2768_v14 = vrot.slane %v2767_v11, 2  ;;  %v2834_v1 = vmul.f32 0.0625, %v2762_v53 }
 0x5af   : > { %v2775_v16 = vrot.slane %v2774_v44, 4  ;;  %2916 = vrot.lane.b32.xlu0 %v7455_v62, %s7782_s27 }
 0x5b0   : > { %v2769_v46 = vadd.f32 %v2768_v14, %v2767_v11  ;;  %3034 = vrot.lane.b32.xlu1 %v2834_v1, %s7783_s30 }
 0x5b1   : > { %v2776_v4 = vadd.f32 %v2775_v16, %v2774_v44 }
 0x5b2   : > { %v2770_v45 = vrot.slane %v2769_v46, 1 }
 0x5b3   : > { %v2777_v22 = vrot.slane %v2776_v4, 2  ;;  %v7458_v5 = vpop.f32.mrb[70].mxu0 }
 0x5b4   : > { %v2782_v37 = vsel %vm986_vm2, %v7458_v5, 0.0  ;;  %v2633_v30 = vpop.f32.mrb[71].mxu0  ;;  %2920 = vrot.lane.b32.xlu1 %v7458_v5, %s7782_s27  ;;  %v2771_v24 = vadd.f32 %v2770_v45, %v2769_v46 }
 0x5b5   : > { %v2778_v0 = vadd.f32 %v2777_v22, %v2776_v4  ;;  %v2781_v56 = vsel %vm986_vm2, %v2633_v30, 0.0  ;;  %2918 = vrot.lane.b32.xlu0 %v2633_v30, %s7782_s27 }
 0x5b6   : > { %v2783_v48 = vadd.f32 %v2782_v37, %v2781_v56  ;;  %v2835_v52 = vmul.f32 0.0625, %v2771_v24 }
 0x5b7   : > { %v2779_v26 = vrot.slane %v2778_v0, 1  ;;  %v7461_v18 = vpop.f32.mrb[72].mxu0 }
 0x5b8   : > { %v2784_v35 = vrot.slane %v2783_v48, 4  ;;  %v2791_v43 = vsel %vm986_vm2, %v7461_v18, 0.0  ;;  %v2643_v28 = vpop.f32.mrb[73].mxu0 }
 0x5b9   : > { %v2790_v32 = vsel %vm986_vm2, %v2643_v28, 0.0  ;;  %3036 = vrot.lane.b32.xlu0 %v2835_v52, %s7783_s30  ;;  %2922 = vrot.lane.b32.xlu1 %v2643_v28, %s7782_s27  ;;  %v2780_v12 = vadd.f32 %v2779_v26, %v2778_v0 }
 0x5ba   : > { %v2785_v62 = vadd.f32 %v2784_v35, %v2783_v48  ;;  %v2792_v36 = vadd.f32 %v2791_v43, %v2790_v32 }
 0x5bb   : > { %v7464_v13 = vpop.f32.mrb[74].mxu0  ;;  %v2836_v11 = vmul.f32 0.0625, %v2780_v12 }
 0x5bc   : > { %v2786_v29 = vrot.slane %v2785_v62, 2  ;;  %v2793_v53 = vrot.slane %v2792_v36, 4  ;;  %v2800_v44 = vsel %vm986_vm2, %v7464_v13, 0.0  ;;  %v2653_v14 = vpop.f32.mrb[75].mxu0 }
 0x5bd   : > { %v2799_v1 = vsel %vm986_vm2, %v2653_v14, 0.0  ;;  %2924 = vrot.lane.b32.xlu0 %v7461_v18, %s7782_s27  ;;  %3038 = vrot.lane.b32.xlu1 %v2836_v11, %s7783_s30 }
 0x5be   : > { %v2787_v16 = vadd.f32 %v2786_v29, %v2785_v62  ;;  %v2794_v46 = vadd.f32 %v2793_v53, %v2792_v36  ;;  %v2801_v34 = vadd.f32 %v2800_v44, %v2799_v1 }
 0x5bf   : > { %v7467_v47 = vpop.f32.mrb[76].mxu0 }
 0x5c0   : > { %v2788_v4 = vrot.slane %v2787_v16, 1  ;;  %v2795_v51 = vrot.slane %v2794_v46, 2  ;;  %v2802_v45 = vrot.slane %v2801_v34, 4  ;;  %v2809_v22 = vsel %vm986_vm2, %v7467_v47, 0.0  ;;  %v2663_v5 = vpop.f32.mrb[77].mxu0 }
 0x5c1   : > { %v2808_v37 = vsel %vm986_vm2, %v2663_v5, 0.0  ;;  %2926 = vrot.lane.b32.xlu0 %v2653_v14, %s7782_s27  ;;  %2928 = vrot.lane.b32.xlu1 %v7464_v13, %s7782_s27 }
 0x5c2   : > { %v2796_v30 = vadd.f32 %v2795_v51, %v2794_v46  ;;  %v2803_v24 = vadd.f32 %v2802_v45, %v2801_v34  ;;  %v2810_v0 = vadd.f32 %v2809_v22, %v2808_v37  ;;  %v2789_v56 = vadd.f32 %v2788_v4, %v2787_v16  ;;  %v6903_v22 = vld [vmem:[%s9890_s2 + $0x70] sm:$0xff]  ;;  %v6904_v37 = vld [vmem:[%s9890_s2 + $0x78] sm:$0xff] }
 0x5c3   : > { %v7470_v48 = vpop.f32.mrb[78].mxu0 }
 0x5c4   : > { %v2797_v52 = vrot.slane %v2796_v30, 1  ;;  %v2804_v26 = vrot.slane %v2803_v24, 2  ;;  %v2811_v18 = vrot.slane %v2810_v0, 4  ;;  %v2818_v35 = vsel %vm986_vm2, %v7470_v48, 0.0  ;;  %v2673_v43 = vpop.f32.mrb[79].mxu0 }
 0x5c5   : > { %v2817_v28 = vsel %vm986_vm2, %v2673_v43, 0.0  ;;  %v2837_v32 = vmul.f32 0.0625, %v2789_v56  ;;  %v8768_v56 = vpop.permute.xlu0 %3104 }
 0x5c6   : > { %v2805_v12 = vadd.f32 %v2804_v26, %v2803_v24  ;;  %v2812_v62 = vadd.f32 %v2811_v18, %v2810_v0  ;;  %v2819_v36 = vadd.f32 %v2818_v35, %v2817_v28  ;;  %v2798_v11 = vadd.f32 %v2797_v52, %v2796_v30 }
 0x5c7   : > { %3040 = vrot.lane.b32.xlu0 %v2837_v32, %s7783_s30 }
 0x5c8   : > { %v2806_v13 = vrot.slane %v2805_v12, 1  ;;  %v2813_v29 = vrot.slane %v2812_v62, 2  ;;  %v2820_v53 = vrot.slane %v2819_v36, 4  ;;  %v2838_v44 = vmul.f32 0.0625, %v2798_v11 }
 0x5ca   : > { %v2814_v14 = vadd.f32 %v2813_v29, %v2812_v62  ;;  %v2821_v1 = vadd.f32 %v2820_v53, %v2819_v36  ;;  %3042 = vrot.lane.b32.xlu1 %v2838_v44, %s7783_s30  ;;  %v2807_v16 = vadd.f32 %v2806_v13, %v2805_v12 }
 0x5cb   : > { %2932 = vrot.lane.b32.xlu0 %v7467_v47, %s7782_s27  ;;  %v7727_v47 = vpack.c.bf16 %v6904_v37, %v6903_v22 }
 0x5cc   : > { %v2815_v46 = vrot.slane %v2814_v14, 1  ;;  %v2822_v34 = vrot.slane %v2821_v1, 2  ;;  %v2839_v4 = vmul.f32 0.0625, %v2807_v16 }
 0x5cd   : > { %7728 = vmatprep.subr.bf16.mxu1 %v7727_v47 }
 0x5ce   : > { %v2823_v51 = vadd.f32 %v2822_v34, %v2821_v1  ;;  %2930 = vrot.lane.b32.xlu1 %v2663_v5, %s7782_s27  ;;  %v2816_v45 = vadd.f32 %v2815_v46, %v2814_v14  ;;  %7730 = vmatpush3.bf16.msra.mxu1 %v7727_v47 }
 0x5cf   : > { %3044 = vrot.lane.b32.xlu0 %v2839_v4, %s7783_s30 }
 0x5d0   : > { %v2824_v30 = vrot.slane %v2823_v51, 1  ;;  %v2840_v24 = vmul.f32 0.0625, %v2816_v45  ;;  %v2877_v52 = vpop.permute.xlu1 %2876 }
 0x5d1   : > { %v2875_v26 = vpop.permute.xlu0 %2874  ;;  %v2971_v28 = vadd.f32 %v2877_v52, %v7956_v50 }
 0x5d2   : > { %3046 = vrot.lane.b32.xlu1 %v2840_v24, %s7783_s30  ;;  %v2825_v0 = vadd.f32 %v2824_v30, %v2823_v51  ;;  %v2970_v32 = vadd.f32 %v2875_v26, %v9972_v25 }
 0x5d3   : > { %2934 = vrot.lane.b32.xlu0 %v2673_v43, %s7782_s27 }
 0x5d4   : > { %v2841_v5 = vmul.f32 0.0625, %v2825_v0 }
 0x5d6   : > { %2936 = vrot.lane.b32.xlu1 %v7470_v48, %s7782_s27 }
 0x5d7   : > { %3048 = vrot.lane.b32.xlu0 %v2841_v5, %s7783_s30 }
 0x5d8   : > { %v2881_v18 = vpop.permute.xlu1 %2880 }
 0x5d9   : > { %v2973_v50 = vadd.f32 %v2881_v18, %v7976_v61 }
 0x5dc   : > { %v2879_v12 = vpop.permute.xlu1 %2878 }
 0x5dd   : > { %v2972_v25 = vadd.f32 %v2879_v12, %v7965_v55 }
 0x5e0   : > { %v2885_v35 = vpop.permute.xlu0 %2884 }
 0x5e1   : > { %v2883_v29 = vpop.permute.xlu1 %2882  ;;  %v2975_v37 = vadd.f32 %v2885_v35, %v7998_v9 }
 0x5e2   : > { %v2974_v30 = vadd.f32 %v2883_v29, %v7987_v3 }
 0x5e4   : > { %v3019_v62 = vpop.permute.xlu0 %3018 }
 0x5e5   : > { %v3066_v36 = vadd.f32 %v3019_v62, %v2970_v32  ;;  %v3067_v43 = vadd.f32 %v3019_v62, %v2971_v28 }
 0x5e7   : > { %v3107_v11 = vadd.f32 %v8768_v56, %v3066_v36  ;;  %v3108_v13 = vadd.f32 %v8768_v56, %v3067_v43 }
 0x5e8   : > { %v2889_v14 = vpop.permute.xlu1 %2888 }
 0x5e9   : > { %v3139_v48 = vmax.f32 %v3107_v11, 0.0  ;;  %v3140_v53 = vmax.f32 %v3108_v13, 0.0  ;;  %v2887_v44 = vpop.permute.xlu0 %2886  ;;  %v2977_v28 = vadd.f32 %v2889_v14, %v8020_v21 }
 0x5ea   : > { %v2976_v9 = vadd.f32 %v2887_v44, %v8009_v15 }
 0x5eb   : > { %3208 = vrot.lane.b32.xlu1 %v3139_v48, %s7781_s18  ;;  %3210 = vrot.lane.b32.xlu0 %v3140_v53, %s7781_s18 }
 0x5ed   : > { %v3021_v1 = vpop.permute.xlu0 %3020 }
 0x5ee   : > { %v3068_v16 = vadd.f32 %v3021_v1, %v2972_v25  ;;  %v3069_v46 = vadd.f32 %v3021_v1, %v2973_v50 }
 0x5f0   : > { %v3109_v34 = vadd.f32 %v8768_v56, %v3068_v16  ;;  %v3110_v4 = vadd.f32 %v8768_v56, %v3069_v46 }
 0x5f1   : > { %v2891_v51 = vpop.permute.xlu1 %2890  ;;  %v2893_v55 = vpop.permute.xlu0 %2892 }
 0x5f2   : > { %v3141_v45 = vmax.f32 %v3109_v34, 0.0  ;;  %v3142_v22 = vmax.f32 %v3110_v4, 0.0  ;;  %v2979_v29 = vadd.f32 %v2893_v55, %v8042_v33  ;;  %v2978_v21 = vadd.f32 %v2891_v51, %v8031_v27 }
 0x5f4   : > { %3212 = vrot.lane.b32.xlu1 %v3141_v45, %s7781_s18  ;;  %3214 = vrot.lane.b32.xlu0 %v3142_v22, %s7781_s18 }
 0x5f5   : > { %v3023_v61 = vpop.permute.xlu1 %3022 }
 0x5f6   : > { %v3070_v24 = vadd.f32 %v3023_v61, %v2974_v30  ;;  %v3071_v47 = vadd.f32 %v3023_v61, %v2975_v37 }
 0x5f8   : > { %v3111_v0 = vadd.f32 %v8768_v56, %v3070_v24  ;;  %v3112_v5 = vadd.f32 %v8768_v56, %v3071_v47 }
 0x5f9   : > { %v2895_v52 = vpop.permute.xlu0 %2894  ;;  %v2897_v3 = vpop.permute.xlu1 %2896 }
 0x5fa   : > { %v3143_v26 = vmax.f32 %v3111_v0, 0.0  ;;  %v3144_v18 = vmax.f32 %v3112_v5, 0.0  ;;  %v2981_v46 = vadd.f32 %v2897_v3, %v8058_v42  ;;  %v2980_v33 = vadd.f32 %v2895_v52, %v8051_v38 }
 0x5fc   : > { %3216 = vrot.lane.b32.xlu1 %v3143_v26, %s7781_s18  ;;  %3218 = vrot.lane.b32.xlu0 %v3144_v18, %s7781_s18 }
 0x5fd   : > { %v3025_v35 = vpop.permute.xlu0 %3024 }
 0x5fe   : > { %v3072_v32 = vadd.f32 %v3025_v35, %v2976_v9  ;;  %v3073_v12 = vadd.f32 %v3025_v35, %v2977_v28 }
 0x600   : > { %v3113_v62 = vadd.f32 %v8768_v56, %v3072_v32  ;;  %v3114_v36 = vadd.f32 %v8768_v56, %v3073_v12 }
 0x601   : > { %v2899_v43 = vpop.permute.xlu1 %2898  ;;  %v2901_v15 = vpop.permute.xlu0 %2900 }
 0x602   : > { %v3145_v11 = vmax.f32 %v3113_v62, 0.0  ;;  %v3146_v13 = vmax.f32 %v3114_v36, 0.0  ;;  %v2983_v61 = vadd.f32 %v2901_v15, %v8072_v59  ;;  %v2982_v42 = vadd.f32 %v2899_v43, %v8065_v49 }
 0x604   : > { %3220 = vrot.lane.b32.xlu1 %v3145_v11, %s7781_s18  ;;  %3222 = vrot.lane.b32.xlu0 %v3146_v13, %s7781_s18 }
 0x605   : > { %v3027_v48 = vpop.permute.xlu1 %3026 }
 0x606   : > { %v3074_v53 = vadd.f32 %v3027_v48, %v2978_v21  ;;  %v3075_v44 = vadd.f32 %v3027_v48, %v2979_v29 }
 0x608   : > { %v3115_v50 = vadd.f32 %v8768_v56, %v3074_v53  ;;  %v3116_v25 = vadd.f32 %v8768_v56, %v3075_v44 }
 0x609   : > { %v2903_v14 = vpop.permute.xlu0 %2902  ;;  %v2905_v27 = vpop.permute.xlu1 %2904 }
 0x60a   : > { %v3147_v1 = vmax.f32 %v3115_v50, 0.0  ;;  %v3148_v16 = vmax.f32 %v3116_v25, 0.0  ;;  %v2985_v59 = vadd.f32 %v2905_v27, %v8086_v19  ;;  %v2984_v49 = vadd.f32 %v2903_v14, %v8079_v7 }
 0x60c   : > { %3224 = vrot.lane.b32.xlu1 %v3147_v1, %s7781_s18  ;;  %3226 = vrot.lane.b32.xlu0 %v3148_v16, %s7781_s18 }
 0x60d   : > { %v3029_v34 = vpop.permute.xlu0 %3028 }
 0x60e   : > { %v3076_v4 = vadd.f32 %v3029_v34, %v2980_v33  ;;  %v3077_v51 = vadd.f32 %v3029_v34, %v2981_v46 }
 0x610   : > { %v3117_v45 = vadd.f32 %v8768_v56, %v3076_v4  ;;  %v3118_v22 = vadd.f32 %v8768_v56, %v3077_v51 }
 0x611   : > { %v2907_v37 = vpop.permute.xlu1 %2906  ;;  %v2909_v38 = vpop.permute.xlu0 %2908 }
 0x612   : > { %v3149_v30 = vmax.f32 %v3117_v45, 0.0  ;;  %v3150_v55 = vmax.f32 %v3118_v22, 0.0  ;;  %v2987_v43 = vadd.f32 %v2909_v38, %v8100_v41  ;;  %v2986_v11 = vadd.f32 %v2907_v37, %v8093_v31 }
 0x614   : > { %3228 = vrot.lane.b32.xlu1 %v3149_v30, %s7781_s18  ;;  %3230 = vrot.lane.b32.xlu0 %v3150_v55, %s7781_s18 }
 0x615   : > { %v3031_v24 = vpop.permute.xlu1 %3030 }
 0x616   : > { %v3078_v47 = vadd.f32 %v3031_v24, %v2982_v42  ;;  %v3079_v0 = vadd.f32 %v3031_v24, %v2983_v61 }
 0x618   : > { %v3119_v5 = vadd.f32 %v8768_v56, %v3078_v47  ;;  %v3120_v52 = vadd.f32 %v8768_v56, %v3079_v0 }
 0x619   : > { %v2913_v26 = vpop.permute.xlu1 %2912  ;;  %v2911_v18 = vpop.permute.xlu0 %2910 }
 0x61a   : > { %v3151_v28 = vmax.f32 %v3119_v5, 0.0  ;;  %v3152_v9 = vmax.f32 %v3120_v52, 0.0  ;;  %v2989_v31 = vadd.f32 %v2913_v26, %v8114_v17  ;;  %v2988_v14 = vadd.f32 %v2911_v18, %v8107_v57 }
 0x61c   : > { %3232 = vrot.lane.b32.xlu1 %v3151_v28, %s7781_s18  ;;  %3234 = vrot.lane.b32.xlu0 %v3152_v9, %s7781_s18 }
 0x61d   : > { %v3033_v3 = vpop.permute.xlu0 %3032 }
 0x61e   : > { %v3080_v35 = vadd.f32 %v3033_v3, %v2984_v49  ;;  %v3081_v32 = vadd.f32 %v3033_v3, %v2985_v59  ;;  %v2915_v12 = vpop.permute.xlu1 %2914 }
 0x61f   : > { %v2990_v27 = vadd.f32 %v2915_v12, %v8121_v39 }
 0x620   : > { %v3121_v62 = vadd.f32 %v8768_v56, %v3080_v35  ;;  %v3122_v36 = vadd.f32 %v8768_v56, %v3081_v32 }
 0x621   : > { %v2917_v13 = vpop.permute.xlu0 %2916 }
 0x622   : > { %v3153_v19 = vmax.f32 %v3121_v62, 0.0  ;;  %v3154_v29 = vmax.f32 %v3122_v36, 0.0  ;;  %v3035_v7 = vpop.permute.xlu1 %3034  ;;  %v2991_v51 = vadd.f32 %v2917_v13, %v8128_v63 }
 0x623   : > { %v3082_v21 = vadd.f32 %v3035_v7, %v2986_v11  ;;  %v3083_v15 = vadd.f32 %v3035_v7, %v2987_v43 }
 0x624   : > { %3236 = vrot.lane.b32.xlu1 %v3153_v19, %s7781_s18  ;;  %3238 = vrot.lane.b32.xlu0 %v3154_v29, %s7781_s18 }
 0x625   : > { %v3123_v48 = vadd.f32 %v8768_v56, %v3082_v21  ;;  %v3124_v53 = vadd.f32 %v8768_v56, %v3083_v15 }
 0x626   : > { %v2921_v44 = vpop.permute.xlu1 %2920 }
 0x627   : > { %v3155_v50 = vmax.f32 %v3123_v48, 0.0  ;;  %v3156_v25 = vmax.f32 %v3124_v53, 0.0  ;;  %v2919_v41 = vpop.permute.xlu0 %2918  ;;  %v2993_v63 = vadd.f32 %v2921_v44, %v8144_v10 }
 0x628   : > { %v2992_v24 = vadd.f32 %v2919_v41, %v8135_v23 }
 0x629   : > { %3240 = vrot.lane.b32.xlu1 %v3155_v50, %s7781_s18  ;;  %3242 = vrot.lane.b32.xlu0 %v3156_v25, %s7781_s18 }
 0x62b   : > { %v3037_v1 = vpop.permute.xlu0 %3036  ;;  %v2923_v16 = vpop.permute.xlu1 %2922 }
 0x62c   : > { %v3084_v46 = vadd.f32 %v3037_v1, %v2988_v14  ;;  %v3085_v33 = vadd.f32 %v3037_v1, %v2989_v31  ;;  %v2994_v26 = vadd.f32 %v2923_v16, %v7963_v54 }
 0x62e   : > { %v3125_v34 = vadd.f32 %v8768_v56, %v3084_v46  ;;  %v3126_v4 = vadd.f32 %v8768_v56, %v3085_v33 }
 0x62f   : > { %v2925_v45 = vpop.permute.xlu0 %2924  ;;  %v3039_v22 = vpop.permute.xlu1 %3038 }
 0x630   : > { %v3157_v37 = vmax.f32 %v3125_v34, 0.0  ;;  %v3158_v30 = vmax.f32 %v3126_v4, 0.0  ;;  %v3086_v55 = vadd.f32 %v3039_v22, %v2990_v27  ;;  %v3087_v17 = vadd.f32 %v3039_v22, %v2991_v51 }
 0x631   : > { %v2995_v18 = vadd.f32 %v2925_v45, %v7974_v60 }
 0x632   : > { %v3127_v57 = vadd.f32 %v8768_v56, %v3086_v55  ;;  %3244 = vrot.lane.b32.xlu1 %v3157_v37, %s7781_s18  ;;  %3246 = vrot.lane.b32.xlu0 %v3158_v30, %s7781_s18  ;;  %v3128_v39 = vadd.f32 %v8768_v56, %v3087_v17 }
 0x633   : > { %v2927_v61 = vpop.permute.xlu0 %2926  ;;  %v2929_v47 = vpop.permute.xlu1 %2928 }
 0x634   : > { %v3159_v42 = vmax.f32 %v3127_v57, 0.0  ;;  %v3160_v38 = vmax.f32 %v3128_v39, 0.0  ;;  %v2996_v62 = vadd.f32 %v2927_v61, %v7985_v2  ;;  %v2997_v54 = vadd.f32 %v2929_v47, %v7996_v8 }
 0x636   : > { %3248 = vrot.lane.b32.xlu1 %v3159_v42, %s7781_s18  ;;  %3250 = vrot.lane.b32.xlu0 %v3160_v38, %s7781_s18 }
 0x639   : > { %v3041_v0 = vpop.permute.xlu0 %3040 }
 0x63a   : > { %v3088_v5 = vadd.f32 %v3041_v0, %v2992_v24  ;;  %v3089_v52 = vadd.f32 %v3041_v0, %v2993_v63 }
 0x63c   : > { %v3129_v28 = vadd.f32 %v8768_v56, %v3088_v5  ;;  %v3130_v9 = vadd.f32 %v8768_v56, %v3089_v52  ;;  %v3043_v59 = vpop.permute.xlu1 %3042 }
 0x63d   : > { %v3090_v49 = vadd.f32 %v3043_v59, %v2994_v26  ;;  %v3091_v3 = vadd.f32 %v3043_v59, %v2995_v18  ;;  %v2933_v35 = vpop.permute.xlu0 %2932 }
 0x63e   : > { %v3161_v32 = vmax.f32 %v3129_v28, 0.0  ;;  %v3162_v10 = vmax.f32 %v3130_v9, 0.0  ;;  %v2999_v29 = vadd.f32 %v2933_v35, %v8018_v20 }
 0x63f   : > { %v3131_v23 = vadd.f32 %v8768_v56, %v3090_v49  ;;  %v3132_v12 = vadd.f32 %v8768_v56, %v3091_v3 }
 0x640   : > { %3252 = vrot.lane.b32.xlu1 %v3161_v32, %s7781_s18  ;;  %3254 = vrot.lane.b32.xlu0 %v3162_v10, %s7781_s18  ;;  %v2931_v60 = vpop.permute.xlu1 %2930 }
 0x641   : > { %v3163_v36 = vmax.f32 %v3131_v23, 0.0  ;;  %v3164_v43 = vmax.f32 %v3132_v12, 0.0  ;;  %v3045_v11 = vpop.permute.xlu0 %3044  ;;  %v2998_v7 = vadd.f32 %v2931_v60, %v9969_v58 }
 0x642   : > { %v3092_v13 = vadd.f32 %v3045_v11, %v2996_v62  ;;  %v3093_v19 = vadd.f32 %v3045_v11, %v2997_v54  ;;  %v6938_v62 = vld [vmem:[%s9890_s2 + $0x80] sm:$0xff]  ;;  %v6939_v54 = vld [vmem:[%s9890_s2 + $0x88] sm:$0xff] }
 0x643   : > { %v7731_v60 = vpack.c.bf16 %v6939_v54, %v6938_v62 }
 0x644   : > { %v3133_v21 = vadd.f32 %v8768_v56, %v3092_v13  ;;  %v3134_v2 = vadd.f32 %v8768_v56, %v3093_v19  ;;  %3256 = vrot.lane.b32.xlu1 %v3163_v36, %s7781_s18  ;;  %3258 = vrot.lane.b32.xlu0 %v3164_v43, %s7781_s18  ;;  %v3047_v8 = vpop.permute.xlu1 %3046  ;;  %v6940_v36 = vld [vmem:[%s9890_s2 + $0x90] sm:$0xff]  ;;  %v6941_v43 = vld [vmem:[%s9890_s2 + $0x98] sm:$0xff] }
 0x645   : > { %v3094_v15 = vadd.f32 %v3047_v8, %v2998_v7  ;;  %v3095_v48 = vadd.f32 %v3047_v8, %v2999_v29  ;;  %v2935_v53 = vpop.permute.xlu0 %2934  ;;  %7732 = vmatprep.subr.bf16.mxu0 %v7731_v60  ;;  %v7735_v11 = vpack.c.bf16 %v6941_v43, %v6940_v36  ;;  %v9973_v29 = vld [vmem:[#allocation4_spill] sm:$0xff]  ;;  %v9974_v8 = vld [vmem:[#allocation3_spill] sm:$0xff] }
 0x646   : > { %v3165_v44 = vmax.f32 %v3133_v21, 0.0  ;;  %v3166_v50 = vmax.f32 %v3134_v2, 0.0  ;;  %v3000_v58 = vadd.f32 %v2935_v53, %v9971_v6  ;;  %7734 = vmatpush3.bf16.msra.mxu0 %v7731_v60  ;;  %v9981_v36 = vld [vmem:[#allocation23_spill] sm:$0xff] }
 0x647   : > { %v3135_v25 = vadd.f32 %v8768_v56, %v3094_v15  ;;  %v3136_v20 = vadd.f32 %v8768_v56, %v3095_v48  ;;  %7736 = vmatprep.subr.bf16.mxu0 %v7735_v11 }
 0x648   : > { %3260 = vrot.lane.b32.xlu1 %v3165_v44, %s7781_s18  ;;  %3262 = vrot.lane.b32.xlu0 %v3166_v50, %s7781_s18  ;;  %v2937_v41 = vpop.permute.xlu1 %2936 }
 0x649   : > { %v3167_v31 = vmax.f32 %v3135_v25, 0.0  ;;  %v3168_v14 = vmax.f32 %v3136_v20, 0.0  ;;  %v3001_v1 = vadd.f32 %v2937_v41, %v9970_v40  ;;  %v3049_v16 = vpop.permute.xlu0 %3048 }
 0x64a   : > { %v3096_v46 = vadd.f32 %v3049_v16, %v3000_v58  ;;  %7738 = vmatpush3.bf16.msra.mxu0 %v7735_v11  ;;  %v9975_v58 = vld [vmem:[#allocation8_spill] sm:$0xff] }
 0x64b   : > { %v3097_v33 = vadd.f32 %v3049_v16, %v3001_v1  ;;  %v9976_v16 = vld [vmem:[#allocation6_spill] sm:$0xff] }
 0x64c   : > { %v3137_v27 = vadd.f32 %v8768_v56, %v3096_v46  ;;  %3264 = vrot.lane.b32.xlu1 %v3167_v31, %s7781_s18  ;;  %3266 = vrot.lane.b32.xlu0 %v3168_v14, %s7781_s18 }
 0x64d   : > { %v3138_v6 = vadd.f32 %v8768_v56, %v3097_v33 }
 0x64e   : > { %v3169_v34 = vmax.f32 %v3137_v27, 0.0 }
 0x64f   : > { %v3170_v4 = vmax.f32 %v3138_v6, 0.0 }
 0x650   : > { %3268 = vrot.lane.b32.xlu1 %v3169_v34, %s7781_s18 }
 0x651   : > { %3270 = vrot.lane.b32.xlu0 %v3170_v4, %s7781_s18 }
 0x65d   : > { %v3209_v51 = vpop.permute.xlu1 %3208  ;;  %v3211_v45 = vpop.permute.xlu0 %3210 }
 0x65e   : > { %7479 = vmatprep.mubr.msk.f32.mxu1 %vm664_vm1, %v3209_v51 }
 0x65f   : > { %7480 = vmatmul.mubr.msk.f32.vlgmr.msra.gmra.mrb[80].mxu1 %vm664_vm1, %v3211_v45 }
 0x666   : > { %v3213_v40 = vpop.permute.xlu1 %3212  ;;  %v3215_v22 = vpop.permute.xlu0 %3214 }
 0x667   : > { %7482 = vmatprep.mubr.msk.f32.mxu1 %vm664_vm1, %v3213_v40 }
 0x668   : > { %7483 = vmatmul.mubr.msk.f32.gmra.mrb[82].mxu1 %vm664_vm1, %v3215_v22 }
 0x66e   : > { %v3217_v37 = vpop.permute.xlu1 %3216  ;;  %v3219_v56 = vpop.permute.xlu0 %3218 }
 0x66f   : > { %7485 = vmatprep.mubr.msk.f32.mxu1 %vm664_vm1, %v3217_v37  ;;  %v9977_v37 = vld [vmem:[#allocation12_spill] sm:$0xff] }
 0x670   : > { %7486 = vmatmul.mubr.msk.f32.gmra.mrb[84].mxu1 %vm664_vm1, %v3219_v56 }
 0x676   : > { %v3221_v30 = vpop.permute.xlu1 %3220  ;;  %v3223_v55 = vpop.permute.xlu0 %3222 }
 0x677   : > { %7488 = vmatprep.mubr.msk.f32.mxu1 %vm664_vm1, %v3221_v30 }
 0x678   : > { %7489 = vmatmul.mubr.msk.f32.gmra.mrb[86].mxu1 %vm664_vm1, %v3223_v55 }
 0x67e   : > { %v3225_v17 = vpop.permute.xlu1 %3224  ;;  %v3227_v57 = vpop.permute.xlu0 %3226 }
 0x67f   : > { %7491 = vmatprep.mubr.msk.f32.mxu1 %vm664_vm1, %v3225_v17  ;;  %v9978_v17 = vld [vmem:[#allocation10_spill] sm:$0xff] }
 0x680   : > { %7492 = vmatmul.mubr.msk.f32.gmra.mrb[88].mxu1 %vm664_vm1, %v3227_v57 }
 0x686   : > { %v3229_v39 = vpop.permute.xlu1 %3228  ;;  %v3231_v61 = vpop.permute.xlu0 %3230 }
 0x687   : > { %7494 = vmatprep.mubr.msk.f32.mxu1 %vm664_vm1, %v3229_v39 }
 0x688   : > { %7495 = vmatmul.mubr.msk.f32.gmra.mrb[90].mxu1 %vm664_vm1, %v3231_v61 }
 0x68e   : > { %v3233_v42 = vpop.permute.xlu1 %3232  ;;  %v3235_v38 = vpop.permute.xlu0 %3234 }
 0x68f   : > { %7497 = vmatprep.mubr.msk.f32.mxu1 %vm664_vm1, %v3233_v42 }
 0x690   : > { %7498 = vmatmul.mubr.msk.f32.gmra.mrb[92].mxu1 %vm664_vm1, %v3235_v38 }
 0x696   : > { %v3237_v63 = vpop.permute.xlu1 %3236  ;;  %v3239_v24 = vpop.permute.xlu0 %3238 }
 0x697   : > { %7500 = vmatprep.mubr.msk.f32.mxu1 %vm664_vm1, %v3237_v63 }
 0x698   : > { %7501 = vmatmul.mubr.msk.f32.gmra.mrb[94].mxu1 %vm664_vm1, %v3239_v24 }
 0x69b   : > { %v3241_v47 = vpop.permute.xlu1 %3240  ;;  %v3243_v0 = vpop.permute.xlu0 %3242 }
 0x69c   : > { %7503 = vmatprep.mubr.msk.f32.mxu1 %vm664_vm1, %v3241_v47 }
 0x69d   : > { %7504 = vmatmul.mubr.msk.f32.gmra.mrb[96].mxu1 %vm664_vm1, %v3243_v0 }
 0x6a4   : > { %v3245_v5 = vpop.permute.xlu1 %3244  ;;  %v3247_v52 = vpop.permute.xlu0 %3246 }
 0x6a5   : > { %7506 = vmatprep.mubr.msk.f32.mxu1 %vm664_vm1, %v3245_v5 }
 0x6a6   : > { %7507 = vmatmul.mubr.msk.f32.gmra.mrb[98].mxu1 %vm664_vm1, %v3247_v52  ;;  %v9979_v52 = vld [vmem:[#allocation17_spill] sm:$0xff] }
 0x6a8   : > { %v3249_v26 = vpop.permute.xlu1 %3248  ;;  %v3251_v18 = vpop.permute.xlu0 %3250 }
 0x6a9   : > { %7509 = vmatprep.mubr.msk.f32.mxu1 %vm664_vm1, %v3249_v26 }
 0x6aa   : > { %7510 = vmatmul.mubr.msk.f32.gmra.mrb[100].mxu1 %vm664_vm1, %v3251_v18 }
 0x6b2   : > { %v3253_v28 = vpop.permute.xlu1 %3252  ;;  %v3255_v9 = vpop.permute.xlu0 %3254 }
 0x6b3   : > { %7512 = vmatprep.mubr.msk.f32.mxu1 %vm664_vm1, %v3253_v28 }
 0x6b4   : > { %7513 = vmatmul.mubr.msk.f32.gmra.mrb[102].mxu1 %vm664_vm1, %v3255_v9 }
 0x6b6   : > { %v3257_v59 = vpop.permute.xlu1 %3256  ;;  %v3259_v49 = vpop.permute.xlu0 %3258 }
 0x6b7   : > { %7515 = vmatprep.mubr.msk.f32.mxu1 %vm664_vm1, %v3257_v59  ;;  %v9980_v59 = vld [vmem:[#allocation15_spill] sm:$0xff] }
 0x6b8   : > { %7516 = vmatmul.mubr.msk.f32.gmra.mrb[104].mxu1 %vm664_vm1, %v3259_v49 }
 0x6ba   : > { %v3261_v3 = vpop.permute.xlu1 %3260  ;;  %v3263_v35 = vpop.permute.xlu0 %3262 }
 0x6bb   : > { %7518 = vmatprep.mubr.msk.f32.mxu1 %vm664_vm1, %v3261_v3 }
 0x6bc   : > { %7519 = vmatmul.mubr.msk.f32.gmra.mrb[106].mxu1 %vm664_vm1, %v3263_v35 }
 0x6be   : > { %v3265_v32 = vpop.permute.xlu1 %3264  ;;  %v3267_v10 = vpop.permute.xlu0 %3266 }
 0x6bf   : > { %7521 = vmatprep.mubr.msk.f32.mxu1 %vm664_vm1, %v3265_v32 }
 0x6c0   : > { %7522 = vmatmul.mubr.msk.f32.gmra.mrb[108].mxu1 %vm664_vm1, %v3267_v10 }
 0x6c2   : > { %v3269_v23 = vpop.permute.xlu1 %3268 }
 0x6c3   : > { %7524 = vmatprep.mubr.msk.f32.mxu1 %vm664_vm1, %v3269_v23  ;;  %v3271_v12 = vpop.permute.xlu0 %3270 }
 0x6c4   : > { %7525 = vmatmul.mubr.msk.f32.gmra.mrb[110].mxu1 %vm664_vm1, %v3271_v12 }
 0x732   : > { %v7481_v13 = vpop.f32.mrb[80].mxu1 }
 0x733   : > { %v3562_v19 = vsel %vm986_vm2, %v7481_v13, 0.0  ;;  %v8914_v7 = vadd.f32 %v7481_v13, %v9973_v29  ;;  %v3402_v21 = vpop.f32.mrb[81].mxu1 }
 0x734   : > { %v3561_v2 = vsel %vm986_vm2, %v3402_v21, 0.0  ;;  %v8918_v15 = vadd.f32 %v3402_v21, %v9974_v8  ;;  %v9982_v21 = vld [vmem:[#allocation20_spill] sm:$0xff] }
 0x735   : > { %v3563_v48 = vadd.f32 %v3562_v19, %v3561_v2 }
 0x737   : > { %v3564_v53 = vrot.slane %v3563_v48, 4 }
 0x739   : > { %v3565_v44 = vadd.f32 %v3564_v53, %v3563_v48 }
 0x73b   : > { %v3566_v50 = vrot.slane %v3565_v44, 2  ;;  %v7484_v25 = vpop.f32.mrb[82].mxu1 }
 0x73c   : > { %v3571_v20 = vsel %vm986_vm2, %v7484_v25, 0.0  ;;  %v8922_v41 = vadd.f32 %v7484_v25, %v9975_v58  ;;  %v3412_v31 = vpop.f32.mrb[83].mxu1 }
 0x73d   : > { %v3567_v14 = vadd.f32 %v3566_v50, %v3565_v44  ;;  %v3570_v1 = vsel %vm986_vm2, %v3412_v31, 0.0  ;;  %v8926_v46 = vadd.f32 %v3412_v31, %v9976_v16 }
 0x73e   : > { %v3572_v33 = vadd.f32 %v3571_v20, %v3570_v1 }
 0x73f   : > { %v3568_v27 = vrot.slane %v3567_v14, 1 }
 0x740   : > { %v3573_v6 = vrot.slane %v3572_v33, 4 }
 0x741   : > { %v3569_v34 = vadd.f32 %v3568_v27, %v3567_v14 }
 0x742   : > { %v3574_v4 = vadd.f32 %v3573_v6, %v3572_v33  ;;  %v9983_v33 = vld [vmem:[#allocation25_spill] sm:$0xff] }
 0x743   : > { %v7487_v51 = vpop.f32.mrb[84].mxu1  ;;  %v3705_v45 = vmul.f32 0.0625, %v3569_v34 }
 0x744   : > { %v3575_v40 = vrot.slane %v3574_v4, 2  ;;  %v3580_v22 = vsel %vm986_vm2, %v7487_v51, 0.0  ;;  %v8930_v56 = vadd.f32 %v7487_v51, %v9977_v37  ;;  %v3422_v30 = vpop.f32.mrb[85].mxu1  ;;  %v9984_v51 = vld [vmem:[#allocation24_spill] sm:$0xff] }
 0x745   : > { %v3579_v55 = vsel %vm986_vm2, %v3422_v30, 0.0  ;;  %v8934_v57 = vadd.f32 %v3422_v30, %v9978_v17  ;;  %3769 = vrot.lane.b32.xlu1 %v3705_v45, %s7782_s27 }
 0x746   : > { %v3576_v39 = vadd.f32 %v3575_v40, %v3574_v4  ;;  %v3581_v61 = vadd.f32 %v3580_v22, %v3579_v55 }
 0x748   : > { %v3577_v42 = vrot.slane %v3576_v39, 1  ;;  %v3582_v38 = vrot.slane %v3581_v61, 4 }
 0x74a   : > { %v3583_v63 = vadd.f32 %v3582_v38, %v3581_v61  ;;  %v3578_v24 = vadd.f32 %v3577_v42, %v3576_v39 }
 0x74b   : > { %v7490_v47 = vpop.f32.mrb[86].mxu1 }
 0x74c   : > { %v3584_v0 = vrot.slane %v3583_v63, 2  ;;  %v3589_v5 = vsel %vm986_vm2, %v7490_v47, 0.0  ;;  %v8939_v26 = vadd.f32 %v7490_v47, %v9979_v52  ;;  %v3432_v18 = vpop.f32.mrb[87].mxu1  ;;  %v3706_v28 = vmul.f32 0.0625, %v3578_v24  ;;  %v9985_v24 = vld [vmem:[#allocation27_spill] sm:$0xff] }
 0x74d   : > { %v3588_v9 = vsel %vm986_vm2, %v3432_v18, 0.0  ;;  %v8943_v49 = vadd.f32 %v3432_v18, %v9980_v59 }
 0x74e   : > { %v3585_v3 = vadd.f32 %v3584_v0, %v3583_v63  ;;  %v3590_v35 = vadd.f32 %v3589_v5, %v3588_v9  ;;  %3771 = vrot.lane.b32.xlu0 %v3706_v28, %s7782_s27  ;;  %v9986_v28 = vld [vmem:[#allocation26_spill] sm:$0xff] }
 0x750   : > { %v3586_v32 = vrot.slane %v3585_v3, 1  ;;  %v3591_v10 = vrot.slane %v3590_v35, 4 }
 0x752   : > { %v3592_v23 = vadd.f32 %v3591_v10, %v3590_v35  ;;  %v3587_v12 = vadd.f32 %v3586_v32, %v3585_v3 }
 0x753   : > { %v7493_v62 = vpop.f32.mrb[88].mxu1 }
 0x754   : > { %v3593_v54 = vrot.slane %v3592_v23, 2  ;;  %v3598_v60 = vsel %vm986_vm2, %v7493_v62, 0.0  ;;  %v8948_v43 = vadd.f32 %v7493_v62, %v9981_v36  ;;  %v3442_v11 = vpop.f32.mrb[89].mxu1  ;;  %v3707_v13 = vmul.f32 0.0625, %v3587_v12 }
 0x755   : > { %v3597_v19 = vsel %vm986_vm2, %v3442_v11, 0.0  ;;  %v8952_v2 = vadd.f32 %v3442_v11, %v9982_v21  ;;  %v9987_v11 = vld [vmem:[#allocation29_spill] sm:$0xff] }
 0x756   : > { %v3594_v48 = vadd.f32 %v3593_v54, %v3592_v23  ;;  %v3599_v53 = vadd.f32 %v3598_v60, %v3597_v19  ;;  %3773 = vrot.lane.b32.xlu1 %v3707_v13, %s7782_s27 }
 0x758   : > { %v3595_v44 = vrot.slane %v3594_v48, 1  ;;  %v3600_v50 = vrot.slane %v3599_v53, 4 }
 0x75a   : > { %v3601_v25 = vadd.f32 %v3600_v50, %v3599_v53  ;;  %v3596_v20 = vadd.f32 %v3595_v44, %v3594_v48  ;;  %v9988_v44 = vld [vmem:[#allocation28_spill] sm:$0xff] }
 0x75b   : > { %v7496_v31 = vpop.f32.mrb[90].mxu1 }
 0x75c   : > { %v3602_v14 = vrot.slane %v3601_v25, 2  ;;  %v3607_v1 = vsel %vm986_vm2, %v7496_v31, 0.0  ;;  %v8957_v27 = vadd.f32 %v7496_v31, %v9983_v33  ;;  %v3452_v6 = vpop.f32.mrb[91].mxu1  ;;  %v3708_v34 = vmul.f32 0.0625, %v3596_v20 }
 0x75d   : > { %v3606_v4 = vsel %vm986_vm2, %v3452_v6, 0.0  ;;  %v8961_v45 = vadd.f32 %v3452_v6, %v9984_v51  ;;  %v10003_v51 = vld [vmem:[#allocation22_spill] sm:$0xff] }
 0x75e   : > { %v3603_v40 = vadd.f32 %v3602_v14, %v3601_v25  ;;  %v3608_v22 = vadd.f32 %v3607_v1, %v3606_v4  ;;  %3775 = vrot.lane.b32.xlu0 %v3708_v34, %s7782_s27  ;;  %v9989_v34 = vld [vmem:[#allocation31_spill] sm:$0xff] }
 0x760   : > { %v3604_v30 = vrot.slane %v3603_v40, 1  ;;  %v3609_v55 = vrot.slane %v3608_v22, 4 }
 0x762   : > { %v3610_v39 = vadd.f32 %v3609_v55, %v3608_v22  ;;  %v3605_v61 = vadd.f32 %v3604_v30, %v3603_v40  ;;  %v9990_v55 = vld [vmem:[#allocation30_spill] sm:$0xff] }
 0x763   : > { %v7499_v42 = vpop.f32.mrb[92].mxu1 }
 0x764   : > { %v3611_v38 = vrot.slane %v3610_v39, 2  ;;  %v3616_v63 = vsel %vm986_vm2, %v7499_v42, 0.0  ;;  %v8966_v47 = vadd.f32 %v7499_v42, %v9985_v24  ;;  %v3462_v0 = vpop.f32.mrb[93].mxu1  ;;  %v3709_v5 = vmul.f32 0.0625, %v3605_v61 }
 0x765   : > { %v3615_v18 = vsel %vm986_vm2, %v3462_v0, 0.0  ;;  %v8970_v9 = vadd.f32 %v3462_v0, %v9986_v28 }
 0x766   : > { %v3612_v3 = vadd.f32 %v3611_v38, %v3610_v39  ;;  %v3617_v35 = vadd.f32 %v3616_v63, %v3615_v18  ;;  %3777 = vrot.lane.b32.xlu1 %v3709_v5, %s7782_s27 }
 0x768   : > { %v3613_v32 = vrot.slane %v3612_v3, 1  ;;  %v3618_v10 = vrot.slane %v3617_v35, 4 }
 0x76a   : > { %v3619_v23 = vadd.f32 %v3618_v10, %v3617_v35  ;;  %v3614_v12 = vadd.f32 %v3613_v32, %v3612_v3 }
 0x76b   : > { %v7502_v62 = vpop.f32.mrb[94].mxu1 }
 0x76c   : > { %v3620_v54 = vrot.slane %v3619_v23, 2  ;;  %v3625_v60 = vsel %vm986_vm2, %v7502_v62, 0.0  ;;  %v8975_v13 = vadd.f32 %v7502_v62, %v9987_v11  ;;  %v3472_v19 = vpop.f32.mrb[95].mxu1  ;;  %v3710_v48 = vmul.f32 0.0625, %v3614_v12 }
 0x76d   : > { %v3624_v53 = vsel %vm986_vm2, %v3472_v19, 0.0  ;;  %v8979_v50 = vadd.f32 %v3472_v19, %v9988_v44  ;;  %v10002_v44 = vld [vmem:[#allocation14_spill] sm:$0xff] }
 0x76e   : > { %v3621_v25 = vadd.f32 %v3620_v54, %v3619_v23  ;;  %v3626_v20 = vadd.f32 %v3625_v60, %v3624_v53  ;;  %3779 = vrot.lane.b32.xlu0 %v3710_v48, %s7782_s27  ;;  %v9991_v23 = vld [vmem:[#allocation33_spill] sm:$0xff]  ;;  %v9992_v48 = vld [vmem:[#allocation32_spill] sm:$0xff] }
 0x770   : > { %v3622_v31 = vrot.slane %v3621_v25, 1  ;;  %v3627_v14 = vrot.slane %v3626_v20, 4  ;;  %v7505_v1 = vpop.f32.mrb[96].mxu1 }
 0x771   : > { %v3634_v6 = vsel %vm986_vm2, %v7505_v1, 0.0  ;;  %v8984_v4 = vadd.f32 %v7505_v1, %v9989_v34  ;;  %v3482_v40 = vpop.f32.mrb[97].mxu1 }
 0x772   : > { %v3628_v22 = vadd.f32 %v3627_v14, %v3626_v20  ;;  %v3633_v30 = vsel %vm986_vm2, %v3482_v40, 0.0  ;;  %v8988_v39 = vadd.f32 %v3482_v40, %v9990_v55  ;;  %v3623_v61 = vadd.f32 %v3622_v31, %v3621_v25  ;;  %v9993_v40 = vld [vmem:[#allocation35_spill] sm:$0xff] }
 0x773   : > { %v3635_v42 = vadd.f32 %v3634_v6, %v3633_v30 }
 0x774   : > { %v3629_v38 = vrot.slane %v3628_v22, 2  ;;  %v3711_v63 = vmul.f32 0.0625, %v3623_v61 }
 0x775   : > { %v3636_v0 = vrot.slane %v3635_v42, 4 }
 0x776   : > { %v3630_v5 = vadd.f32 %v3629_v38, %v3628_v22  ;;  %3781 = vrot.lane.b32.xlu1 %v3711_v63, %s7782_s27 }
 0x777   : > { %v3637_v18 = vadd.f32 %v3636_v0, %v3635_v42  ;;  %v9994_v42 = vld [vmem:[#allocation34_spill] sm:$0xff] }
 0x778   : > { %v3631_v3 = vrot.slane %v3630_v5, 1 }
 0x779   : > { %v3638_v35 = vrot.slane %v3637_v18, 2  ;;  %v7508_v32 = vpop.f32.mrb[98].mxu1 }
 0x77a   : > { %v3643_v10 = vsel %vm986_vm2, %v7508_v32, 0.0  ;;  %v8993_v12 = vadd.f32 %v7508_v32, %v9991_v23  ;;  %v3492_v62 = vpop.f32.mrb[99].mxu1  ;;  %v3632_v54 = vadd.f32 %v3631_v3, %v3630_v5  ;;  %v9999_v23 = vld [vmem:[#allocation11_spill] sm:$0xff] }
 0x77b   : > { %v3639_v60 = vadd.f32 %v3638_v35, %v3637_v18  ;;  %v3642_v19 = vsel %vm986_vm2, %v3492_v62, 0.0  ;;  %v8997_v53 = vadd.f32 %v3492_v62, %v9992_v48 }
 0x77c   : > { %v3644_v25 = vadd.f32 %v3643_v10, %v3642_v19  ;;  %v3712_v20 = vmul.f32 0.0625, %v3632_v54 }
 0x77d   : > { %v3640_v31 = vrot.slane %v3639_v60, 1  ;;  %v7511_v14 = vpop.f32.mrb[100].mxu1 }
 0x77e   : > { %v3645_v1 = vrot.slane %v3644_v25, 4  ;;  %v3652_v6 = vsel %vm986_vm2, %v7511_v14, 0.0  ;;  %v9001_v22 = vadd.f32 %v7511_v14, %v9993_v40  ;;  %3783 = vrot.lane.b32.xlu0 %v3712_v20, %s7782_s27  ;;  %v3502_v30 = vpop.f32.mrb[101].mxu1  ;;  %v9995_v40 = vld [vmem:[#allocation37_spill] sm:$0xff] }
 0x77f   : > { %v3651_v61 = vsel %vm986_vm2, %v3502_v30, 0.0  ;;  %v9006_v38 = vadd.f32 %v3502_v30, %v9994_v42  ;;  %v3641_v63 = vadd.f32 %v3640_v31, %v3639_v60  ;;  %v9996_v31 = vld [vmem:[#allocation36_spill] sm:$0xff] }
 0x780   : > { %v3646_v0 = vadd.f32 %v3645_v1, %v3644_v25  ;;  %v3653_v5 = vadd.f32 %v3652_v6, %v3651_v61 }
 0x781   : > { %v3713_v18 = vmul.f32 0.0625, %v3641_v63 }
 0x782   : > { %v3647_v3 = vrot.slane %v3646_v0, 2  ;;  %v3654_v35 = vrot.slane %v3653_v5, 4 }
 0x783   : > { %3785 = vrot.lane.b32.xlu1 %v3713_v18, %s7782_s27 }
 0x784   : > { %v3648_v32 = vadd.f32 %v3647_v3, %v3646_v0  ;;  %v3655_v10 = vadd.f32 %v3654_v35, %v3653_v5  ;;  %v9997_v3 = vld [vmem:[#allocation7_spill] sm:$0xff] }
 0x786   : > { %v3649_v62 = vrot.slane %v3648_v32, 1  ;;  %v3656_v54 = vrot.slane %v3655_v10, 2 }
 0x787   : > { %v7514_v19 = vpop.f32.mrb[102].mxu1 }
 0x788   : > { %v3657_v20 = vadd.f32 %v3656_v54, %v3655_v10  ;;  %v3661_v14 = vsel %vm986_vm2, %v7514_v19, 0.0  ;;  %v9011_v48 = vadd.f32 %v7514_v19, %v9995_v40  ;;  %v3512_v30 = vpop.f32.mrb[103].mxu1  ;;  %v3650_v60 = vadd.f32 %v3649_v62, %v3648_v32  ;;  %v9998_v62 = vld [vmem:[#allocation5_spill] sm:$0xff] }
 0x789   : > { %v3660_v25 = vsel %vm986_vm2, %v3512_v30, 0.0  ;;  %v9015_v1 = vadd.f32 %v3512_v30, %v9996_v31 }
 0x78a   : > { %v3658_v6 = vrot.slane %v3657_v20, 1  ;;  %v3662_v61 = vadd.f32 %v3661_v14, %v3660_v25  ;;  %v3714_v63 = vmul.f32 0.0625, %v3650_v60 }
 0x78b   : > { %v7517_v0 = vpop.f32.mrb[104].mxu1 }
 0x78c   : > { %v3663_v5 = vrot.slane %v3662_v61, 4  ;;  %v3670_v18 = vsel %vm986_vm2, %v7517_v0, 0.0  ;;  %v9019_v35 = vadd.f32 %v7517_v0, %v9997_v3  ;;  %v3522_v10 = vpop.f32.mrb[105].mxu1  ;;  %3787 = vrot.lane.b32.xlu0 %v3714_v63, %s7782_s27  ;;  %v3659_v54 = vadd.f32 %v3658_v6, %v3657_v20  ;;  %v10000_v6 = vld [vmem:[#allocation9_spill] sm:$0xff] }
 0x78d   : > { %v3669_v32 = vsel %vm986_vm2, %v3522_v10, 0.0  ;;  %v9024_v19 = vadd.f32 %v3522_v10, %v9998_v62 }
 0x78e   : > { %v3664_v30 = vadd.f32 %v3663_v5, %v3662_v61  ;;  %v3671_v31 = vadd.f32 %v3670_v18, %v3669_v32  ;;  %v3715_v14 = vmul.f32 0.0625, %v3659_v54 }
 0x78f   : > { %v7520_v60 = vpop.f32.mrb[106].mxu1 }
 0x790   : > { %v3665_v25 = vrot.slane %v3664_v30, 2  ;;  %v3672_v40 = vrot.slane %v3671_v31, 4  ;;  %v3679_v42 = vsel %vm986_vm2, %v7520_v60, 0.0  ;;  %v9028_v0 = vadd.f32 %v7520_v60, %v9999_v23  ;;  %v3532_v3 = vpop.f32.mrb[107].mxu1  ;;  %3789 = vrot.lane.b32.xlu1 %v3715_v14, %s7782_s27  ;;  %v10001_v60 = vld [vmem:[#allocation16_spill] sm:$0xff] }
 0x791   : > { %v3678_v20 = vsel %vm986_vm2, %v3532_v3, 0.0  ;;  %v9033_v63 = vadd.f32 %v3532_v3, %v10000_v6 }
 0x792   : > { %v3666_v10 = vadd.f32 %v3665_v25, %v3664_v30  ;;  %v3673_v61 = vadd.f32 %v3672_v40, %v3671_v31  ;;  %v3680_v5 = vadd.f32 %v3679_v42, %v3678_v20 }
 0x793   : > { %v7523_v18 = vpop.f32.mrb[108].mxu1 }
 0x794   : > { %v3667_v54 = vrot.slane %v3666_v10, 1  ;;  %v3674_v32 = vrot.slane %v3673_v61, 2  ;;  %v3681_v62 = vrot.slane %v3680_v5, 4  ;;  %v3688_v55 = vsel %vm986_vm2, %v7523_v18, 0.0  ;;  %v3542_v34 = vpop.f32.mrb[109].mxu1 }
 0x795   : > { %v9037_v23 = vadd.f32 %v7523_v18, %v10001_v60  ;;  %v3687_v14 = vsel %vm986_vm2, %v3542_v34, 0.0  ;;  %v9041_v11 = vadd.f32 %v3542_v34, %v10002_v44  ;;  %v10004_v60 = vld [vmem:[#allocation19_spill] sm:$0xff] }
 0x796   : > { %v3675_v3 = vadd.f32 %v3674_v32, %v3673_v61  ;;  %v3682_v6 = vadd.f32 %v3681_v62, %v3680_v5  ;;  %v3689_v30 = vadd.f32 %v3688_v55, %v3687_v14  ;;  %v3668_v40 = vadd.f32 %v3667_v54, %v3666_v10 }
 0x797   : > { %v7526_v42 = vpop.f32.mrb[110].mxu1 }
 0x798   : > { %v3676_v31 = vrot.slane %v3675_v3, 1  ;;  %v3683_v25 = vrot.slane %v3682_v6, 2  ;;  %v3690_v20 = vrot.slane %v3689_v30, 4  ;;  %v3697_v28 = vsel %vm986_vm2, %v7526_v42, 0.0  ;;  %v3552_v24 = vpop.f32.mrb[111].mxu1 }
 0x799   : > { %v9045_v33 = vadd.f32 %v7526_v42, %v10003_v51  ;;  %v3696_v18 = vsel %vm986_vm2, %v3552_v24, 0.0  ;;  %v9049_v21 = vadd.f32 %v3552_v24, %v10004_v60  ;;  %v3716_v34 = vmul.f32 0.0625, %v3668_v40 }
 0x79a   : > { %v3684_v61 = vadd.f32 %v3683_v25, %v3682_v6  ;;  %v3691_v62 = vadd.f32 %v3690_v20, %v3689_v30  ;;  %v3698_v55 = vadd.f32 %v3697_v28, %v3696_v18  ;;  %v3677_v10 = vadd.f32 %v3676_v31, %v3675_v3  ;;  %v9059_v31 = vld [vmem:[%s9891_s3 + $0x4] ss:$0 sm:$0xff] }
 0x79b   : > { %3791 = vrot.lane.b32.xlu0 %v3716_v34, %s7782_s27 }
 0x79c   : > { %v3685_v5 = vrot.slane %v3684_v61, 1  ;;  %v3692_v54 = vrot.slane %v3691_v62, 2  ;;  %v3699_v32 = vrot.slane %v3698_v55, 4  ;;  %v3717_v14 = vmul.f32 0.0625, %v3677_v10 }
 0x79e   : > { %v3693_v44 = vadd.f32 %v3692_v54, %v3691_v62  ;;  %v3700_v36 = vadd.f32 %v3699_v32, %v3698_v55  ;;  %3793 = vrot.lane.b32.xlu1 %v3717_v14, %s7782_s27  ;;  %v3686_v42 = vadd.f32 %v3685_v5, %v3684_v61 }
 0x7a0   : > { %v3694_v51 = vrot.slane %v3693_v44, 1  ;;  %v3701_v59 = vrot.slane %v3700_v36, 2  ;;  %v3718_v24 = vmul.f32 0.0625, %v3686_v42 }
 0x7a2   : > { %v3702_v60 = vadd.f32 %v3701_v59, %v3700_v36  ;;  %3795 = vrot.lane.b32.xlu0 %v3718_v24, %s7782_s27  ;;  %v3695_v6 = vadd.f32 %v3694_v51, %v3693_v44 }
 0x7a4   : > { %v3703_v28 = vrot.slane %v3702_v60, 1  ;;  %v3719_v3 = vmul.f32 0.0625, %v3695_v6 }
 0x7a6   : > { %3797 = vrot.lane.b32.xlu1 %v3719_v3, %s7782_s27  ;;  %v3704_v30 = vadd.f32 %v3703_v28, %v3702_v60 }
 0x7a8   : > { %v3720_v40 = vmul.f32 0.0625, %v3704_v30 }
 0x7aa   : > { %3799 = vrot.lane.b32.xlu0 %v3720_v40, %s7782_s27 }
 0x7b7   : > { %v3770_v25 = vpop.permute.xlu1 %3769 }
 0x7b8   : > { %v3817_v20 = vadd.f32 %v3770_v25, %v8918_v15  ;;  %v3818_v59 = vadd.f32 %v3770_v25, %v8914_v7 }
 0x7ba   : > { %v3854_v36 = vadd.f32 %v9059_v31, %v3817_v20  ;;  %v3855_v51 = vadd.f32 %v9059_v31, %v3818_v59 }
 0x7bc   : > { %v3886_v44 = vmax.f32 %v3854_v36, 0.0  ;;  %v3887_v18 = vmax.f32 %v3855_v51, 0.0 }
 0x7be   : > { %7535 = vmatprep.mubr.msk.f32.mxu0 %vm664_vm1, %v3886_v44 }
 0x7bf   : > { %7536 = vmatmul.mubr.msk.f32.vlgmr.msra.gmra.mrb[80].mxu0 %vm664_vm1, %v3887_v18 }
 0x7c0   : > { %v3772_v60 = vpop.permute.xlu0 %3771 }
 0x7c1   : > { %v3819_v34 = vadd.f32 %v3772_v60, %v8926_v46  ;;  %v3820_v61 = vadd.f32 %v3772_v60, %v8922_v41 }
 0x7c3   : > { %v3856_v62 = vadd.f32 %v9059_v31, %v3819_v34  ;;  %v3857_v15 = vadd.f32 %v9059_v31, %v3820_v61 }
 0x7c5   : > { %v3888_v7 = vmax.f32 %v3856_v62, 0.0  ;;  %v3889_v55 = vmax.f32 %v3857_v15, 0.0 }
 0x7c7   : > { %7538 = vmatprep.mubr.msk.f32.mxu0 %vm664_vm1, %v3888_v7 }
 0x7c8   : > { %v3774_v10 = vpop.permute.xlu1 %3773  ;;  %7539 = vmatmul.mubr.msk.f32.gmra.mrb[82].mxu0 %vm664_vm1, %v3889_v55 }
 0x7c9   : > { %v3821_v5 = vadd.f32 %v3774_v10, %v8934_v57  ;;  %v3822_v54 = vadd.f32 %v3774_v10, %v8930_v56 }
 0x7cb   : > { %v3858_v32 = vadd.f32 %v9059_v31, %v3821_v5  ;;  %v3859_v46 = vadd.f32 %v9059_v31, %v3822_v54 }
 0x7cd   : > { %v3890_v41 = vmax.f32 %v3858_v32, 0.0  ;;  %v3891_v14 = vmax.f32 %v3859_v46, 0.0 }
 0x7cf   : > { %7541 = vmatprep.mubr.msk.f32.mxu0 %vm664_vm1, %v3890_v41 }
 0x7d0   : > { %7542 = vmatmul.mubr.msk.f32.gmra.mrb[84].mxu0 %vm664_vm1, %v3891_v14  ;;  %v3776_v42 = vpop.permute.xlu0 %3775 }
 0x7d1   : > { %v3823_v24 = vadd.f32 %v3776_v42, %v8943_v49  ;;  %v3824_v6 = vadd.f32 %v3776_v42, %v8939_v26 }
 0x7d3   : > { %v3860_v28 = vadd.f32 %v9059_v31, %v3823_v24  ;;  %v3861_v57 = vadd.f32 %v9059_v31, %v3824_v6 }
 0x7d5   : > { %v3892_v56 = vmax.f32 %v3860_v28, 0.0  ;;  %v3893_v3 = vmax.f32 %v3861_v57, 0.0 }
 0x7d7   : > { %7544 = vmatprep.mubr.msk.f32.mxu0 %vm664_vm1, %v3892_v56 }
 0x7d8   : > { %v3778_v30 = vpop.permute.xlu1 %3777  ;;  %7545 = vmatmul.mubr.msk.f32.gmra.mrb[86].mxu0 %vm664_vm1, %v3893_v3 }
 0x7d9   : > { %v3825_v40 = vadd.f32 %v3778_v30, %v8952_v2  ;;  %v3826_v25 = vadd.f32 %v3778_v30, %v8948_v43 }
 0x7db   : > { %v3862_v20 = vadd.f32 %v9059_v31, %v3825_v40  ;;  %v3863_v49 = vadd.f32 %v9059_v31, %v3826_v25 }
 0x7dd   : > { %v3894_v26 = vmax.f32 %v3862_v20, 0.0  ;;  %v3895_v59 = vmax.f32 %v3863_v49, 0.0 }
 0x7df   : > { %7547 = vmatprep.mubr.msk.f32.mxu0 %vm664_vm1, %v3894_v26 }
 0x7e0   : > { %7548 = vmatmul.mubr.msk.f32.gmra.mrb[88].mxu0 %vm664_vm1, %v3895_v59  ;;  %v3780_v36 = vpop.permute.xlu0 %3779 }
 0x7e1   : > { %v3827_v51 = vadd.f32 %v3780_v36, %v8961_v45  ;;  %v3828_v44 = vadd.f32 %v3780_v36, %v8957_v27 }
 0x7e3   : > { %v3864_v18 = vadd.f32 %v9059_v31, %v3827_v51  ;;  %v3865_v2 = vadd.f32 %v9059_v31, %v3828_v44 }
 0x7e5   : > { %v3896_v43 = vmax.f32 %v3864_v18, 0.0  ;;  %v3897_v60 = vmax.f32 %v3865_v2, 0.0 }
 0x7e7   : > { %7550 = vmatprep.mubr.msk.f32.mxu0 %vm664_vm1, %v3896_v43 }
 0x7e8   : > { %v3782_v34 = vpop.permute.xlu1 %3781  ;;  %7551 = vmatmul.mubr.msk.f32.gmra.mrb[90].mxu0 %vm664_vm1, %v3897_v60 }
 0x7e9   : > { %v3829_v61 = vadd.f32 %v3782_v34, %v8970_v9  ;;  %v3830_v62 = vadd.f32 %v3782_v34, %v8966_v47 }
 0x7eb   : > { %v3866_v15 = vadd.f32 %v9059_v31, %v3829_v61  ;;  %v3867_v45 = vadd.f32 %v9059_v31, %v3830_v62 }
 0x7ed   : > { %v3898_v27 = vmax.f32 %v3866_v15, 0.0  ;;  %v3899_v7 = vmax.f32 %v3867_v45, 0.0 }
 0x7ef   : > { %7553 = vmatprep.mubr.msk.f32.mxu0 %vm664_vm1, %v3898_v27 }
 0x7f0   : > { %7554 = vmatmul.mubr.msk.f32.gmra.mrb[92].mxu0 %vm664_vm1, %v3899_v7  ;;  %v3784_v55 = vpop.permute.xlu0 %3783 }
 0x7f1   : > { %v3831_v10 = vadd.f32 %v3784_v55, %v8979_v50  ;;  %v3832_v5 = vadd.f32 %v3784_v55, %v8975_v13 }
 0x7f3   : > { %v3868_v54 = vadd.f32 %v9059_v31, %v3831_v10  ;;  %v3869_v9 = vadd.f32 %v9059_v31, %v3832_v5 }
 0x7f5   : > { %v3900_v47 = vmax.f32 %v3868_v54, 0.0  ;;  %v3901_v32 = vmax.f32 %v3869_v9, 0.0  ;;  %v3786_v46 = vpop.permute.xlu1 %3785 }
 0x7f6   : > { %v3833_v41 = vadd.f32 %v3786_v46, %v8988_v39  ;;  %v3834_v14 = vadd.f32 %v3786_v46, %v8984_v4 }
 0x7f7   : > { %7556 = vmatprep.mubr.msk.f32.mxu0 %vm664_vm1, %v3900_v47 }
 0x7f8   : > { %v3870_v42 = vadd.f32 %v9059_v31, %v3833_v41  ;;  %v3871_v24 = vadd.f32 %v9059_v31, %v3834_v14  ;;  %7557 = vmatmul.mubr.msk.f32.gmra.mrb[94].mxu0 %vm664_vm1, %v3901_v32 }
 0x7fa   : > { %v3902_v13 = vmax.f32 %v3870_v42, 0.0  ;;  %v3903_v50 = vmax.f32 %v3871_v24, 0.0 }
 0x7fc   : > { %7559 = vmatprep.mubr.msk.f32.mxu0 %vm664_vm1, %v3902_v13 }
 0x7fd   : > { %7560 = vmatmul.mubr.msk.f32.gmra.mrb[96].mxu0 %vm664_vm1, %v3903_v50 }
 0x7fe   : > { %v3788_v6 = vpop.permute.xlu0 %3787 }
 0x7ff   : > { %v3835_v28 = vadd.f32 %v3788_v6, %v8997_v53  ;;  %v3836_v39 = vadd.f32 %v3788_v6, %v8993_v12 }
 0x801   : > { %v3872_v4 = vadd.f32 %v9059_v31, %v3835_v28  ;;  %v3873_v57 = vadd.f32 %v9059_v31, %v3836_v39 }
 0x802   : > { %v3790_v56 = vpop.permute.xlu1 %3789 }
 0x803   : > { %v3904_v3 = vmax.f32 %v3872_v4, 0.0  ;;  %v3905_v30 = vmax.f32 %v3873_v57, 0.0  ;;  %v3837_v40 = vadd.f32 %v3790_v56, %v9006_v38  ;;  %v3838_v25 = vadd.f32 %v3790_v56, %v9001_v22 }
 0x805   : > { %v3874_v20 = vadd.f32 %v9059_v31, %v3837_v40  ;;  %v3875_v49 = vadd.f32 %v9059_v31, %v3838_v25  ;;  %7562 = vmatprep.mubr.msk.f32.mxu0 %vm664_vm1, %v3904_v3 }
 0x806   : > { %7563 = vmatmul.mubr.msk.f32.gmra.mrb[98].mxu0 %vm664_vm1, %v3905_v30 }
 0x807   : > { %v3906_v12 = vmax.f32 %v3874_v20, 0.0  ;;  %v3907_v53 = vmax.f32 %v3875_v49, 0.0 }
 0x809   : > { %7565 = vmatprep.mubr.msk.f32.mxu0 %vm664_vm1, %v3906_v12 }
 0x80a   : > { %7566 = vmatmul.mubr.msk.f32.gmra.mrb[100].mxu0 %vm664_vm1, %v3907_v53 }
 0x80d   : > { %v3792_v26 = vpop.permute.xlu0 %3791 }
 0x80e   : > { %v3839_v59 = vadd.f32 %v3792_v26, %v9015_v1  ;;  %v3840_v38 = vadd.f32 %v3792_v26, %v9011_v48 }
 0x810   : > { %v3876_v22 = vadd.f32 %v9059_v31, %v3839_v59  ;;  %v3877_v36 = vadd.f32 %v9059_v31, %v3840_v38  ;;  %v3794_v51 = vpop.permute.xlu1 %3793 }
 0x811   : > { %v3841_v44 = vadd.f32 %v3794_v51, %v9024_v19  ;;  %v3842_v18 = vadd.f32 %v3794_v51, %v9019_v35 }
 0x812   : > { %v3908_v2 = vmax.f32 %v3876_v22, 0.0  ;;  %v3909_v43 = vmax.f32 %v3877_v36, 0.0 }
 0x813   : > { %v3878_v60 = vadd.f32 %v9059_v31, %v3841_v44  ;;  %v3879_v34 = vadd.f32 %v9059_v31, %v3842_v18 }
 0x814   : > { %7568 = vmatprep.mubr.msk.f32.mxu0 %vm664_vm1, %v3908_v2  ;;  %v3796_v1 = vpop.permute.xlu0 %3795 }
 0x815   : > { %v3910_v61 = vmax.f32 %v3878_v60, 0.0  ;;  %v3911_v48 = vmax.f32 %v3879_v34, 0.0  ;;  %7569 = vmatmul.mubr.msk.f32.gmra.mrb[102].mxu0 %vm664_vm1, %v3909_v43  ;;  %v3843_v62 = vadd.f32 %v3796_v1, %v9033_v63  ;;  %v3844_v15 = vadd.f32 %v3796_v1, %v9028_v0 }
 0x817   : > { %v3880_v19 = vadd.f32 %v9059_v31, %v3843_v62  ;;  %v3881_v35 = vadd.f32 %v9059_v31, %v3844_v15  ;;  %7571 = vmatprep.mubr.msk.f32.mxu0 %vm664_vm1, %v3910_v61 }
 0x818   : > { %v3798_v45 = vpop.permute.xlu1 %3797 }
 0x819   : > { %v3912_v27 = vmax.f32 %v3880_v19, 0.0  ;;  %v3913_v7 = vmax.f32 %v3881_v35, 0.0  ;;  %v3845_v55 = vadd.f32 %v3798_v45, %v9041_v11  ;;  %v3846_v10 = vadd.f32 %v3798_v45, %v9037_v23  ;;  %7572 = vmatmul.mubr.msk.f32.gmra.mrb[104].mxu0 %vm664_vm1, %v3911_v48 }
 0x81b   : > { %v3882_v5 = vadd.f32 %v9059_v31, %v3845_v55  ;;  %v3883_v63 = vadd.f32 %v9059_v31, %v3846_v10  ;;  %7574 = vmatprep.mubr.msk.f32.mxu0 %vm664_vm1, %v3912_v27 }
 0x81c   : > { %v3800_v0 = vpop.permute.xlu0 %3799 }
 0x81d   : > { %v3914_v54 = vmax.f32 %v3882_v5, 0.0  ;;  %v3915_v9 = vmax.f32 %v3883_v63, 0.0  ;;  %7575 = vmatmul.mubr.msk.f32.gmra.mrb[106].mxu0 %vm664_vm1, %v3913_v7  ;;  %v3847_v47 = vadd.f32 %v3800_v0, %v9049_v21  ;;  %v3848_v32 = vadd.f32 %v3800_v0, %v9045_v33  ;;  %v6975_v5 = vld [vmem:[%s9890_s2 + $0xa0] sm:$0xff]  ;;  %v6976_v63 = vld [vmem:[%s9890_s2 + $0xa8] sm:$0xff] }
 0x81e   : > { %v7739_v0 = vpack.c.bf16 %v6976_v63, %v6975_v5 }
 0x81f   : > { %v3884_v11 = vadd.f32 %v9059_v31, %v3847_v47  ;;  %v3885_v23 = vadd.f32 %v9059_v31, %v3848_v32  ;;  %7577 = vmatprep.mubr.msk.f32.mxu0 %vm664_vm1, %v3914_v54  ;;  %v6974_v31 = vld [vmem:[%s9891_s3 + $0x5] ss:$0 sm:$0xff] }
 0x820   : > { %7740 = vmatprep.subr.bf16.mxu1 %v7739_v0 }
 0x821   : > { %v3916_v46 = vmax.f32 %v3884_v11, 0.0  ;;  %v3917_v41 = vmax.f32 %v3885_v23, 0.0  ;;  %7578 = vmatmul.mubr.msk.f32.gmra.mrb[108].mxu0 %vm664_vm1, %v3915_v9  ;;  %7742 = vmatpush3.bf16.msra.mxu1 %v7739_v0 }
 0x823   : > { %7580 = vmatprep.mubr.msk.f32.mxu0 %vm664_vm1, %v3916_v46 }
 0x825   : > { %7581 = vmatmul.mubr.msk.f32.gmra.mrb[110].mxu0 %vm664_vm1, %v3917_v41 }
 0x892   : > { %v7537_v14 = vpop.f32.mrb[80].mxu0 }
 0x893   : > { %v4245_v42 = vsel %vm986_vm2, %v7537_v14, 0.0  ;;  %v4085_v21 = vpop.f32.mrb[81].mxu0  ;;  %4438 = vrot.lane.b32.xlu0 %v7537_v14, %s7781_s18 }
 0x894   : > { %v4244_v33 = vsel %vm986_vm2, %v4085_v21, 0.0  ;;  %4436 = vrot.lane.b32.xlu1 %v4085_v21, %s7781_s18 }
 0x895   : > { %v9164_v24 = vadd.f32 %v4245_v42, %v4244_v33 }
 0x897   : > { %4602 = vrot.lane.b32.xlu0 %v6974_v31, %s7781_s18 }
 0x89b   : > { %v7540_v13 = vpop.f32.mrb[82].mxu0 }
 0x89c   : > { %v4254_v50 = vsel %vm986_vm2, %v7540_v13, 0.0  ;;  %v4095_v6 = vpop.f32.mrb[83].mxu0 }
 0x89d   : > { %v4253_v28 = vsel %vm986_vm2, %v4095_v6, 0.0  ;;  %4440 = vrot.lane.b32.xlu1 %v4095_v6, %s7781_s18 }
 0x89e   : > { %v9170_v39 = vadd.f32 %v4254_v50, %v4253_v28 }
 0x8a1   : > { %4442 = vrot.lane.b32.xlu1 %v7540_v13, %s7781_s18 }
 0x8a3   : > { %v7543_v4 = vpop.f32.mrb[84].mxu0 }
 0x8a4   : > { %v4263_v57 = vsel %vm986_vm2, %v7543_v4, 0.0  ;;  %v4105_v56 = vpop.f32.mrb[85].mxu0 }
 0x8a5   : > { %v4262_v3 = vsel %vm986_vm2, %v4105_v56, 0.0  ;;  %4446 = vrot.lane.b32.xlu1 %v7543_v4, %s7781_s18  ;;  %4444 = vrot.lane.b32.xlu0 %v4105_v56, %s7781_s18 }
 0x8a6   : > { %v9177_v30 = vadd.f32 %v4263_v57, %v4262_v3  ;;  %v4247_v57 = vrot.slane %v9164_v24, 4 }
 0x8a8   : > { %v4265_v5 = vrot.slane %v9177_v30, 4 }
 0x8ab   : > { %v7546_v40 = vpop.f32.mrb[86].mxu0 }
 0x8ac   : > { %v4272_v25 = vsel %vm986_vm2, %v7546_v40, 0.0  ;;  %4450 = vrot.lane.b32.xlu1 %v7546_v40, %s7781_s18  ;;  %v4115_v20 = vpop.f32.mrb[87].mxu0 }
 0x8ad   : > { %v4271_v49 = vsel %vm986_vm2, %v4115_v20, 0.0  ;;  %4448 = vrot.lane.b32.xlu0 %v4115_v20, %s7781_s18 }
 0x8ae   : > { %v9183_v12 = vadd.f32 %v4272_v25, %v4271_v49  ;;  %v4248_v49 = vadd.f32 %v4247_v57, %v9164_v24 }
 0x8b3   : > { %v7549_v53 = vpop.f32.mrb[88].mxu0 }
 0x8b4   : > { %v4281_v26 = vsel %vm986_vm2, %v7549_v53, 0.0  ;;  %4454 = vrot.lane.b32.xlu1 %v7549_v53, %s7781_s18  ;;  %v4125_v59 = vpop.f32.mrb[89].mxu0 }
 0x8b5   : > { %v4280_v38 = vsel %vm986_vm2, %v4125_v59, 0.0  ;;  %4452 = vrot.lane.b32.xlu0 %v4125_v59, %s7781_s18  ;;  %v6977_v59 = vld [vmem:[%s9890_s2 + $0xb0] sm:$0xff] }
 0x8b6   : > { %v9189_v22 = vadd.f32 %v4281_v26, %v4280_v38  ;;  %v6978_v38 = vld [vmem:[%s9890_s2 + $0xb8] sm:$0xff] }
 0x8bb   : > { %v7552_v36 = vpop.f32.mrb[90].mxu0 }
 0x8bc   : > { %v4290_v51 = vsel %vm986_vm2, %v7552_v36, 0.0  ;;  %4458 = vrot.lane.b32.xlu1 %v7552_v36, %s7781_s18  ;;  %v4135_v44 = vpop.f32.mrb[91].mxu0 }
 0x8bd   : > { %v4289_v18 = vsel %vm986_vm2, %v4135_v44, 0.0  ;;  %4456 = vrot.lane.b32.xlu0 %v4135_v44, %s7781_s18 }
 0x8be   : > { %v9195_v2 = vadd.f32 %v4290_v51, %v4289_v18  ;;  %v7743_v51 = vpack.c.bf16 %v6978_v38, %v6977_v59  ;;  %v4249_v18 = vrot.slane %v4248_v49, 2 }
 0x8c0   : > { %7744 = vmatprep.subr.bf16.mxu1 %v7743_v51 }
 0x8c1   : > { %7746 = vmatpush3.bf16.msra.mxu1 %v7743_v51 }
 0x8c3   : > { %v7555_v43 = vpop.f32.mrb[92].mxu0 }
 0x8c4   : > { %v4299_v60 = vsel %vm986_vm2, %v7555_v43, 0.0  ;;  %4462 = vrot.lane.b32.xlu1 %v7555_v43, %s7781_s18  ;;  %v4145_v34 = vpop.f32.mrb[93].mxu0 }
 0x8c5   : > { %v4298_v1 = vsel %vm986_vm2, %v4145_v34, 0.0  ;;  %4460 = vrot.lane.b32.xlu0 %v4145_v34, %s7781_s18  ;;  %v4256_v34 = vrot.slane %v9170_v39, 4 }
 0x8c6   : > { %v9201_v61 = vadd.f32 %v4299_v60, %v4298_v1 }
 0x8cb   : > { %v7558_v48 = vpop.f32.mrb[94].mxu0 }
 0x8cc   : > { %v4308_v62 = vsel %vm986_vm2, %v7558_v48, 0.0  ;;  %4466 = vrot.lane.b32.xlu1 %v7558_v48, %s7781_s18  ;;  %v4155_v15 = vpop.f32.mrb[95].mxu0 }
 0x8cd   : > { %v4307_v19 = vsel %vm986_vm2, %v4155_v15, 0.0  ;;  %4464 = vrot.lane.b32.xlu0 %v4155_v15, %s7781_s18  ;;  %v4250_v15 = vadd.f32 %v4249_v18, %v4248_v49 }
 0x8ce   : > { %v9207_v35 = vadd.f32 %v4308_v62, %v4307_v19 }
 0x8d0   : > { %v7561_v45 = vpop.f32.mrb[96].mxu0 }
 0x8d1   : > { %v4317_v27 = vsel %vm986_vm2, %v7561_v45, 0.0  ;;  %4470 = vrot.lane.b32.xlu1 %v7561_v45, %s7781_s18  ;;  %v4165_v7 = vpop.f32.mrb[97].mxu0 }
 0x8d2   : > { %v4316_v55 = vsel %vm986_vm2, %v4165_v7, 0.0  ;;  %4468 = vrot.lane.b32.xlu0 %v4165_v7, %s7781_s18  ;;  %v4251_v7 = vrot.slane %v4250_v15, 1 }
 0x8d3   : > { %v9213_v10 = vadd.f32 %v4317_v27, %v4316_v55  ;;  %v4257_v27 = vadd.f32 %v4256_v34, %v9170_v39 }
 0x8d4   : > { %v4252_v63 = vadd.f32 %v4251_v7, %v4250_v15 }
 0x8d5   : > { %v4258_v55 = vrot.slane %v4257_v27, 2 }
 0x8d7   : > { %v4259_v0 = vadd.f32 %v4258_v55, %v4257_v27 }
 0x8d9   : > { %v7564_v54 = vpop.f32.mrb[98].mxu0  ;;  %v4260_v39 = vrot.slane %v4259_v0, 1 }
 0x8da   : > { %v4326_v9 = vsel %vm986_vm2, %v7564_v54, 0.0  ;;  %4474 = vrot.lane.b32.xlu1 %v7564_v54, %s7781_s18  ;;  %v4175_v47 = vpop.f32.mrb[99].mxu0  ;;  %v4266_v54 = vadd.f32 %v4265_v5, %v9177_v30 }
 0x8db   : > { %v4325_v32 = vsel %vm986_vm2, %v4175_v47, 0.0  ;;  %4472 = vrot.lane.b32.xlu0 %v4175_v47, %s7781_s18  ;;  %v4388_v47 = vmul.f32 0.0625, %v4252_v63  ;;  %v4261_v57 = vadd.f32 %v4260_v39, %v4259_v0 }
 0x8dc   : > { %v9225_v11 = vadd.f32 %v4326_v9, %v4325_v32 }
 0x8dd   : > { %v7567_v23 = vpop.f32.mrb[100].mxu0  ;;  %v4389_v49 = vmul.f32 0.0625, %v4261_v57 }
 0x8de   : > { %v4335_v46 = vsel %vm986_vm2, %v7567_v23, 0.0  ;;  %4478 = vrot.lane.b32.xlu1 %v7567_v23, %s7781_s18  ;;  %v4185_v41 = vpop.f32.mrb[101].mxu0 }
 0x8df   : > { %v4334_v14 = vsel %vm986_vm2, %v4185_v41, 0.0  ;;  %4476 = vrot.lane.b32.xlu0 %v4185_v41, %s7781_s18 }
 0x8e0   : > { %v9231_v42 = vadd.f32 %v4335_v46, %v4334_v14  ;;  %v4274_v46 = vrot.slane %v9183_v12, 4  ;;  %v4267_v14 = vrot.slane %v4266_v54, 2 }
 0x8e8   : > { %v7570_v21 = vpop.f32.mrb[102].mxu0 }
 0x8e9   : > { %v4344_v33 = vsel %vm986_vm2, %v7570_v21, 0.0  ;;  %4482 = vrot.lane.b32.xlu1 %v7570_v21, %s7781_s18  ;;  %v4195_v31 = vpop.f32.mrb[103].mxu0 }
 0x8ea   : > { %v4343_v13 = vsel %vm986_vm2, %v4195_v31, 0.0  ;;  %4480 = vrot.lane.b32.xlu0 %v4195_v31, %s7781_s18 }
 0x8eb   : > { %v9237_v50 = vadd.f32 %v4344_v33, %v4343_v13 }
 0x8ec   : > { %v7573_v6 = vpop.f32.mrb[104].mxu0 }
 0x8ed   : > { %v4353_v28 = vsel %vm986_vm2, %v7573_v6, 0.0  ;;  %4486 = vrot.lane.b32.xlu1 %v7573_v6, %s7781_s18  ;;  %v4205_v4 = vpop.f32.mrb[105].mxu0  ;;  %v4275_v6 = vadd.f32 %v4274_v46, %v9183_v12 }
 0x8ee   : > { %v4352_v56 = vsel %vm986_vm2, %v4205_v4, 0.0  ;;  %4484 = vrot.lane.b32.xlu0 %v4205_v4, %s7781_s18 }
 0x8ef   : > { %v9244_v3 = vadd.f32 %v4353_v28, %v4352_v56  ;;  %v4268_v28 = vadd.f32 %v4267_v14, %v4266_v54 }
 0x8f0   : > { %v7576_v40 = vpop.f32.mrb[106].mxu0 }
 0x8f1   : > { %v4362_v25 = vsel %vm986_vm2, %v7576_v40, 0.0  ;;  %4490 = vrot.lane.b32.xlu1 %v7576_v40, %s7781_s18  ;;  %v4215_v20 = vpop.f32.mrb[107].mxu0  ;;  %v4283_v40 = vrot.slane %v9189_v22, 4  ;;  %v4269_v59 = vrot.slane %v4268_v28, 1 }
 0x8f2   : > { %v4361_v53 = vsel %vm986_vm2, %v4215_v20, 0.0  ;;  %4488 = vrot.lane.b32.xlu0 %v4215_v20, %s7781_s18 }
 0x8f3   : > { %v9251_v26 = vadd.f32 %v4362_v25, %v4361_v53  ;;  %v4276_v25 = vrot.slane %v4275_v6, 2  ;;  %v4284_v12 = vadd.f32 %v4283_v40, %v9189_v22  ;;  %v4270_v18 = vadd.f32 %v4269_v59, %v4268_v28  ;;  %v10005_v28 = vld [vmem:[#allocation15_spill] sm:$0xff] }
 0x8f4   : > { %v7579_v36 = vpop.f32.mrb[108].mxu0 }
 0x8f5   : > { %v4371_v44 = vsel %vm986_vm2, %v7579_v36, 0.0  ;;  %4494 = vrot.lane.b32.xlu1 %v7579_v36, %s7781_s18  ;;  %v4225_v24 = vpop.f32.mrb[109].mxu0  ;;  %v4277_v36 = vadd.f32 %v4276_v25, %v4275_v6  ;;  %v4390_v7 = vmul.f32 0.0625, %v4270_v18 }
 0x8f6   : > { %v4370_v43 = vsel %vm986_vm2, %v4225_v24, 0.0  ;;  %4492 = vrot.lane.b32.xlu0 %v4225_v24, %s7781_s18 }
 0x8f7   : > { %v9263_v60 = vadd.f32 %v4371_v44, %v4370_v43  ;;  %v4285_v43 = vrot.slane %v4284_v12, 2 }
 0x8f8   : > { %v7582_v1 = vpop.f32.mrb[110].mxu0 }
 0x8f9   : > { %v4380_v48 = vsel %vm986_vm2, %v7582_v1, 0.0  ;;  %4498 = vrot.lane.b32.xlu1 %v7582_v1, %s7781_s18  ;;  %v4235_v62 = vpop.f32.mrb[111].mxu0  ;;  %v4286_v5 = vadd.f32 %v4285_v43, %v4284_v12 }
 0x8fa   : > { %v4379_v19 = vsel %vm986_vm2, %v4235_v62, 0.0  ;;  %4496 = vrot.lane.b32.xlu0 %v4235_v62, %s7781_s18 }
 0x8fb   : > { %v9270_v45 = vadd.f32 %v4380_v48, %v4379_v19  ;;  %v4292_v48 = vrot.slane %v9195_v2, 4  ;;  %v4278_v19 = vrot.slane %v4277_v36, 1 }
 0x905   : > { %v4439_v9 = vpop.permute.xlu0 %4438 }
 0x906   : > { %v4533_v32 = vadd.f32 %v4439_v9, %v9973_v29  ;;  %v4437_v23 = vpop.permute.xlu1 %4436  ;;  %v4293_v9 = vadd.f32 %v4292_v48, %v9195_v2 }
 0x907   : > { %v4532_v41 = vadd.f32 %v4437_v23, %v9974_v8 }
 0x908   : > { %v4565_v21 = vadd.f32 %v4533_v32, %v4388_v47  ;;  %v4294_v39 = vrot.slane %v4293_v9, 2 }
 0x909   : > { %v4564_v33 = vadd.f32 %v4532_v41, %v4388_v47  ;;  %v9278_v31 = vpop.permute.xlu0 %4602  ;;  %v4279_v47 = vadd.f32 %v4278_v19, %v4277_v36 }
 0x90a   : > { %v4606_v13 = vadd.f32 %v9278_v31, %v4565_v21  ;;  %v4287_v21 = vrot.slane %v4286_v5, 1  ;;  %v4295_v40 = vadd.f32 %v4294_v39, %v4293_v9  ;;  %v10008_v9 = vld [vmem:[#allocation25_spill] sm:$0xff] }
 0x90b   : > { %v4605_v30 = vadd.f32 %v9278_v31, %v4564_v33  ;;  %v4301_v33 = vrot.slane %v9201_v61, 4 }
 0x90c   : > { %v4638_v4 = vmax.f32 %v4606_v13, 0.0  ;;  %v4391_v13 = vmul.f32 0.0625, %v4279_v47  ;;  %v4296_v43 = vrot.slane %v4295_v40, 1 }
 0x90d   : > { %v4637_v56 = vmax.f32 %v4605_v30, 0.0  ;;  %v4302_v25 = vadd.f32 %v4301_v33, %v9201_v61 }
 0x90e   : > { %4708 = vrot.lane.b32.xlu1 %v4638_v4, %s7782_s27 }
 0x90f   : > { %v4441_v20 = vpop.permute.xlu1 %4440  ;;  %4706 = vrot.lane.b32.xlu0 %v4637_v56, %s7782_s27  ;;  %v4288_v56 = vadd.f32 %v4287_v21, %v4286_v5  ;;  %v4303_v36 = vrot.slane %v4302_v25, 2 }
 0x910   : > { %v4534_v53 = vadd.f32 %v4441_v20, %v9976_v16 }
 0x912   : > { %v4566_v38 = vadd.f32 %v4534_v53, %v4389_v49 }
 0x913   : > { %v4443_v51 = vpop.permute.xlu1 %4442 }
 0x914   : > { %v4607_v44 = vadd.f32 %v9278_v31, %v4566_v38  ;;  %v4535_v24 = vadd.f32 %v4443_v51, %v9975_v58  ;;  %v4392_v38 = vmul.f32 0.0625, %v4288_v56  ;;  %v4310_v51 = vrot.slane %v9207_v35, 4 }
 0x916   : > { %v4639_v34 = vmax.f32 %v4607_v44, 0.0  ;;  %v4567_v1 = vadd.f32 %v4535_v24, %v4389_v49  ;;  %v10006_v44 = vld [vmem:[#allocation23_spill] sm:$0xff] }
 0x917   : > { %v4447_v62 = vpop.permute.xlu1 %4446  ;;  %v4445_v15 = vpop.permute.xlu0 %4444 }
 0x918   : > { %v4608_v27 = vadd.f32 %v9278_v31, %v4567_v1  ;;  %v4537_v22 = vadd.f32 %v4447_v62, %v9977_v37  ;;  %v4536_v55 = vadd.f32 %v4445_v15, %v9978_v17  ;;  %4710 = vrot.lane.b32.xlu0 %v4639_v34, %s7782_s27  ;;  %v10007_v34 = vld [vmem:[#allocation20_spill] sm:$0xff]  ;;  %v4304_v62 = vadd.f32 %v4303_v36, %v4302_v25 }
 0x919   : > { %v4311_v15 = vadd.f32 %v4310_v51, %v9207_v35  ;;  %v4337_v36 = vrot.slane %v9231_v42, 4 }
 0x91a   : > { %v4640_v63 = vmax.f32 %v4608_v27, 0.0  ;;  %v4569_v0 = vadd.f32 %v4537_v22, %v4390_v7  ;;  %v4568_v54 = vadd.f32 %v4536_v55, %v4390_v7  ;;  %v4297_v27 = vadd.f32 %v4296_v43, %v4295_v40 }
 0x91b   : > { %v4319_v7 = vrot.slane %v9213_v10, 4 }
 0x91c   : > { %v4610_v32 = vadd.f32 %v9278_v31, %v4569_v0  ;;  %v4609_v23 = vadd.f32 %v9278_v31, %v4568_v54  ;;  %4712 = vrot.lane.b32.xlu1 %v4640_v63, %s7782_s27  ;;  %v4312_v0 = vrot.slane %v4311_v15, 2  ;;  %v4393_v54 = vmul.f32 0.0625, %v4297_v27 }
 0x91d   : > { %v4320_v35 = vadd.f32 %v4319_v7, %v9213_v10  ;;  %v10010_v10 = vld [vmem:[#allocation27_spill] sm:$0xff] }
 0x91e   : > { %v4642_v46 = vmax.f32 %v4610_v32, 0.0  ;;  %v4641_v41 = vmax.f32 %v4609_v23, 0.0  ;;  %v4451_v14 = vpop.permute.xlu1 %4450  ;;  %v4305_v23 = vrot.slane %v4304_v62, 1  ;;  %v4313_v39 = vadd.f32 %v4312_v0, %v4311_v15 }
 0x91f   : > { %v4539_v6 = vadd.f32 %v4451_v14, %v9979_v52  ;;  %v4449_v30 = vpop.permute.xlu0 %4448 }
 0x920   : > { %v4538_v2 = vadd.f32 %v4449_v30, %v10005_v28  ;;  %4716 = vrot.lane.b32.xlu1 %v4642_v46, %s7782_s27  ;;  %4714 = vrot.lane.b32.xlu0 %v4641_v41, %s7782_s27  ;;  %v10009_v46 = vld [vmem:[#allocation24_spill] sm:$0xff] }
 0x921   : > { %v4571_v4 = vadd.f32 %v4539_v6, %v4391_v13  ;;  %v4321_v6 = vrot.slane %v4320_v35, 2 }
 0x922   : > { %v4570_v57 = vadd.f32 %v4538_v2, %v4391_v13  ;;  %v4306_v13 = vadd.f32 %v4305_v23, %v4304_v62  ;;  %v4328_v2 = vrot.slane %v9225_v11, 4  ;;  %v4338_v62 = vadd.f32 %v4337_v36, %v9231_v42 }
 0x923   : > { %v4612_v20 = vadd.f32 %v9278_v31, %v4571_v4  ;;  %v4346_v23 = vrot.slane %v9237_v50, 4 }
 0x924   : > { %v4611_v49 = vadd.f32 %v9278_v31, %v4570_v57  ;;  %v4394_v40 = vmul.f32 0.0625, %v4306_v13 }
 0x925   : > { %v4644_v53 = vmax.f32 %v4612_v20, 0.0 }
 0x926   : > { %v4643_v59 = vmax.f32 %v4611_v49, 0.0  ;;  %v4455_v12 = vpop.permute.xlu1 %4454  ;;  %v4314_v49 = vrot.slane %v4313_v39, 1 }
 0x927   : > { %v4541_v24 = vadd.f32 %v4455_v12, %v10006_v44  ;;  %4720 = vrot.lane.b32.xlu1 %v4644_v53, %s7782_s27  ;;  %v4453_v18 = vpop.permute.xlu0 %4452  ;;  %v4322_v53 = vadd.f32 %v4321_v6, %v4320_v35 }
 0x928   : > { %v4540_v1 = vadd.f32 %v4453_v18, %v10007_v34  ;;  %4718 = vrot.lane.b32.xlu0 %v4643_v59, %s7782_s27  ;;  %v10011_v59 = vld [vmem:[#allocation26_spill] sm:$0xff]  ;;  %v4315_v43 = vadd.f32 %v4314_v49, %v4313_v39  ;;  %v10014_v39 = vld [vmem:[#allocation31_spill] sm:$0xff] }
 0x929   : > { %v4573_v61 = vadd.f32 %v4541_v24, %v4392_v38 }
 0x92a   : > { %v4572_v48 = vadd.f32 %v4540_v1, %v4392_v38  ;;  %v4329_v38 = vadd.f32 %v4328_v2, %v9225_v11  ;;  %v4395_v7 = vmul.f32 0.0625, %v4315_v43  ;;  %v10015_v2 = vld [vmem:[#allocation30_spill] sm:$0xff] }
 0x92b   : > { %v4614_v19 = vadd.f32 %v9278_v31, %v4573_v61  ;;  %v4323_v61 = vrot.slane %v4322_v53, 1 }
 0x92c   : > { %v4613_v22 = vadd.f32 %v9278_v31, %v4572_v48  ;;  %v4330_v48 = vrot.slane %v4329_v38, 2 }
 0x92d   : > { %v4646_v55 = vmax.f32 %v4614_v19, 0.0  ;;  %v4324_v0 = vadd.f32 %v4323_v61, %v4322_v53 }
 0x92e   : > { %v4645_v5 = vmax.f32 %v4613_v22, 0.0  ;;  %v4459_v63 = vpop.permute.xlu1 %4458  ;;  %v10012_v22 = vld [vmem:[#allocation29_spill] sm:$0xff] }
 0x92f   : > { %v4543_v47 = vadd.f32 %v4459_v63, %v10008_v9  ;;  %4724 = vrot.lane.b32.xlu1 %v4646_v55, %s7782_s27  ;;  %v4457_v32 = vpop.permute.xlu0 %4456 }
 0x930   : > { %v4542_v41 = vadd.f32 %v4457_v32, %v10009_v46  ;;  %4722 = vrot.lane.b32.xlu0 %v4645_v5, %s7782_s27  ;;  %v10013_v5 = vld [vmem:[#allocation28_spill] sm:$0xff] }
 0x931   : > { %v4575_v14 = vadd.f32 %v4543_v47, %v4393_v54  ;;  %v4339_v47 = vrot.slane %v4338_v62, 2 }
 0x932   : > { %v4574_v21 = vadd.f32 %v4542_v41, %v4393_v54  ;;  %v4331_v54 = vadd.f32 %v4330_v48, %v4329_v38  ;;  %v10016_v48 = vld [vmem:[#allocation33_spill] sm:$0xff] }
 0x933   : > { %v4616_v33 = vadd.f32 %v9278_v31, %v4575_v14  ;;  %v4340_v6 = vadd.f32 %v4339_v47, %v4338_v62 }
 0x934   : > { %v4615_v30 = vadd.f32 %v9278_v31, %v4574_v21  ;;  %v4396_v21 = vmul.f32 0.0625, %v4324_v0  ;;  %v4373_v0 = vrot.slane %v9263_v60, 4 }
 0x935   : > { %v4648_v4 = vmax.f32 %v4616_v33, 0.0  ;;  %v4341_v36 = vrot.slane %v4340_v6, 1 }
 0x936   : > { %v4647_v57 = vmax.f32 %v4615_v30, 0.0  ;;  %v4463_v56 = vpop.permute.xlu1 %4462 }
 0x937   : > { %v4545_v25 = vadd.f32 %v4463_v56, %v10010_v10  ;;  %4728 = vrot.lane.b32.xlu1 %v4648_v4, %s7782_s27  ;;  %v4461_v20 = vpop.permute.xlu0 %4460  ;;  %v4347_v56 = vadd.f32 %v4346_v23, %v9237_v50  ;;  %v4364_v50 = vrot.slane %v9251_v26, 4 }
 0x938   : > { %v4544_v12 = vadd.f32 %v4461_v20, %v10011_v59  ;;  %4726 = vrot.lane.b32.xlu0 %v4647_v57, %s7782_s27  ;;  %v4332_v57 = vrot.slane %v4331_v54, 1  ;;  %v4355_v20 = vrot.slane %v9244_v3, 4 }
 0x939   : > { %v4577_v51 = vadd.f32 %v4545_v25, %v4394_v40 }
 0x93a   : > { %v4576_v24 = vadd.f32 %v4544_v12, %v4394_v40  ;;  %v4333_v38 = vadd.f32 %v4332_v57, %v4331_v54  ;;  %v4374_v57 = vadd.f32 %v4373_v0, %v9263_v60 }
 0x93b   : > { %v4618_v18 = vadd.f32 %v9278_v31, %v4577_v51  ;;  %v4348_v51 = vrot.slane %v4347_v56, 2 }
 0x93c   : > { %v4617_v1 = vadd.f32 %v9278_v31, %v4576_v24  ;;  %v4397_v61 = vmul.f32 0.0625, %v4333_v38 }
 0x93d   : > { %v4650_v15 = vmax.f32 %v4618_v18, 0.0  ;;  %v4356_v18 = vadd.f32 %v4355_v20, %v9244_v3 }
 0x93e   : > { %v4649_v19 = vmax.f32 %v4617_v1, 0.0  ;;  %v4467_v27 = vpop.permute.xlu1 %4466 }
 0x93f   : > { %v4547_v55 = vadd.f32 %v4467_v27, %v10012_v22  ;;  %4732 = vrot.lane.b32.xlu1 %v4650_v15, %s7782_s27  ;;  %v4465_v11 = vpop.permute.xlu0 %4464  ;;  %v4349_v27 = vadd.f32 %v4348_v51, %v4347_v56  ;;  %v4382_v56 = vrot.slane %v9270_v45, 4 }
 0x940   : > { %v4546_v63 = vadd.f32 %v4465_v11, %v10013_v5  ;;  %4730 = vrot.lane.b32.xlu0 %v4649_v19, %s7782_s27  ;;  %v4342_v19 = vadd.f32 %v4341_v36, %v4340_v6  ;;  %v4357_v11 = vrot.slane %v4356_v18, 2  ;;  %v4375_v36 = vrot.slane %v4374_v57, 2 }
 0x941   : > { %v4579_v32 = vadd.f32 %v4547_v55, %v4395_v7  ;;  %v4383_v51 = vadd.f32 %v4382_v56, %v9270_v45 }
 0x942   : > { %v4578_v42 = vadd.f32 %v4546_v63, %v4395_v7  ;;  %v10017_v7 = vld [vmem:[#allocation32_spill] sm:$0xff]  ;;  %v4365_v63 = vadd.f32 %v4364_v50, %v9251_v26  ;;  %v4398_v23 = vmul.f32 0.0625, %v4342_v19  ;;  %v4358_v6 = vadd.f32 %v4357_v11, %v4356_v18 }
 0x943   : > { %v4620_v35 = vadd.f32 %v9278_v31, %v4579_v32  ;;  %v4471_v41 = vpop.permute.xlu1 %4470  ;;  %v10021_v11 = vld [vmem:[#allocation36_spill] sm:$0xff] }
 0x944   : > { %v4619_v14 = vadd.f32 %v9278_v31, %v4578_v42  ;;  %v4549_v33 = vadd.f32 %v4471_v41, %v10014_v39  ;;  %v4469_v13 = vpop.permute.xlu0 %4468  ;;  %v10018_v42 = vld [vmem:[#allocation35_spill] sm:$0xff]  ;;  %v4359_v38 = vrot.slane %v4358_v6, 1 }
 0x945   : > { %v4652_v30 = vmax.f32 %v4620_v35, 0.0  ;;  %v4548_v4 = vadd.f32 %v4469_v13, %v10015_v2  ;;  %v4350_v13 = vrot.slane %v4349_v27, 1 }
 0x946   : > { %v4651_v40 = vmax.f32 %v4619_v14, 0.0  ;;  %v4581_v25 = vadd.f32 %v4549_v33, %v4396_v21  ;;  %v4360_v50 = vadd.f32 %v4359_v38, %v4358_v6 }
 0x947   : > { %v4580_v49 = vadd.f32 %v4548_v4, %v4396_v21  ;;  %4736 = vrot.lane.b32.xlu1 %v4652_v30, %s7782_s27  ;;  %v10019_v21 = vld [vmem:[#allocation34_spill] sm:$0xff]  ;;  %v4366_v30 = vrot.slane %v4365_v63, 2  ;;  %v4351_v60 = vadd.f32 %v4350_v13, %v4349_v27  ;;  %v10023_v13 = vld [vmem:[#allocation5_spill] sm:$0xff] }
 0x948   : > { %v4622_v53 = vadd.f32 %v9278_v31, %v4581_v25  ;;  %4734 = vrot.lane.b32.xlu0 %v4651_v40, %s7782_s27 }
 0x949   : > { %v4621_v12 = vadd.f32 %v9278_v31, %v4580_v49 }
 0x94a   : > { %v4654_v24 = vmax.f32 %v4622_v53, 0.0  ;;  %v4367_v53 = vadd.f32 %v4366_v30, %v4365_v63 }
 0x94b   : > { %v4653_v43 = vmax.f32 %v4621_v12, 0.0 }
 0x94c   : > { %v4475_v1 = vpop.permute.xlu1 %4474  ;;  %4740 = vrot.lane.b32.xlu1 %v4654_v24, %s7782_s27 }
 0x94d   : > { %v4551_v62 = vadd.f32 %v4475_v1, %v10016_v48  ;;  %v4473_v15 = vpop.permute.xlu0 %4472  ;;  %4738 = vrot.lane.b32.xlu0 %v4653_v43, %s7782_s27  ;;  %v4368_v43 = vrot.slane %v4367_v53, 1  ;;  %v4376_v1 = vadd.f32 %v4375_v36, %v4374_v57 }
 0x94e   : > { %v4550_v55 = vadd.f32 %v4473_v15, %v10017_v7  ;;  %v10020_v15 = vld [vmem:[#allocation37_spill] sm:$0xff] }
 0x94f   : > { %v4583_v3 = vadd.f32 %v4551_v62, %v4397_v61  ;;  %v4399_v62 = vmul.f32 0.0625, %v4351_v60  ;;  %v4369_v27 = vadd.f32 %v4368_v43, %v4367_v53 }
 0x950   : > { %v4582_v54 = vadd.f32 %v4550_v55, %v4397_v61  ;;  %v4479_v47 = vpop.permute.xlu1 %4478  ;;  %v4384_v61 = vrot.slane %v4383_v51, 2 }
 0x951   : > { %v4624_v32 = vadd.f32 %v9278_v31, %v4583_v3  ;;  %v4553_v35 = vadd.f32 %v4479_v47, %v10018_v42  ;;  %v4477_v41 = vpop.permute.xlu0 %4476 }
 0x952   : > { %v4623_v14 = vadd.f32 %v9278_v31, %v4582_v54  ;;  %v4552_v33 = vadd.f32 %v4477_v41, %v10019_v21  ;;  %v4400_v54 = vmul.f32 0.0625, %v4360_v50  ;;  %v4385_v47 = vadd.f32 %v4384_v61, %v4383_v51  ;;  %v10025_v51 = vld [vmem:[#allocation9_spill] sm:$0xff] }
 0x953   : > { %v4656_v4 = vmax.f32 %v4624_v32, 0.0  ;;  %v4585_v26 = vadd.f32 %v4553_v35, %v4398_v23 }
 0x954   : > { %v4655_v40 = vmax.f32 %v4623_v14, 0.0  ;;  %v4584_v25 = vadd.f32 %v4552_v33, %v4398_v23  ;;  %v10022_v23 = vld [vmem:[#allocation7_spill] sm:$0xff]  ;;  %v4377_v14 = vrot.slane %v4376_v1, 1  ;;  %v4386_v38 = vrot.slane %v4385_v47, 1 }
 0x955   : > { %v4626_v20 = vadd.f32 %v9278_v31, %v4585_v26  ;;  %4744 = vrot.lane.b32.xlu1 %v4656_v4, %s7782_s27 }
 0x956   : > { %v4625_v49 = vadd.f32 %v9278_v31, %v4584_v25  ;;  %4742 = vrot.lane.b32.xlu0 %v4655_v40, %s7782_s27  ;;  %v4401_v40 = vmul.f32 0.0625, %v4369_v27 }
 0x957   : > { %v4658_v12 = vmax.f32 %v4626_v20, 0.0  ;;  %v10024_v20 = vld [vmem:[#allocation11_spill] sm:$0xff] }
 0x958   : > { %v4657_v24 = vmax.f32 %v4625_v49, 0.0 }
 0x959   : > { %4748 = vrot.lane.b32.xlu1 %v4658_v12, %s7782_s27  ;;  %v4378_v12 = vadd.f32 %v4377_v14, %v4376_v1 }
 0x95a   : > { %4746 = vrot.lane.b32.xlu0 %v4657_v24, %s7782_s27 }
 0x95b   : > { %v4483_v18 = vpop.permute.xlu1 %4482 }
 0x95c   : > { %v4555_v19 = vadd.f32 %v4483_v18, %v10020_v15  ;;  %v4481_v55 = vpop.permute.xlu0 %4480 }
 0x95d   : > { %v4554_v63 = vadd.f32 %v4481_v55, %v10021_v11  ;;  %v10026_v55 = vld [vmem:[#allocation16_spill] sm:$0xff] }
 0x95e   : > { %v4587_v3 = vadd.f32 %v4555_v19, %v4399_v62  ;;  %v4402_v19 = vmul.f32 0.0625, %v4378_v12 }
 0x95f   : > { %v4586_v0 = vadd.f32 %v4554_v63, %v4399_v62  ;;  %v4487_v45 = vpop.permute.xlu1 %4486 }
 0x960   : > { %v4628_v32 = vadd.f32 %v9278_v31, %v4587_v3  ;;  %v4557_v35 = vadd.f32 %v4487_v45, %v10022_v23  ;;  %v4485_v41 = vpop.permute.xlu0 %4484  ;;  %v4387_v3 = vadd.f32 %v4386_v38, %v4385_v47  ;;  %v10027_v45 = vld [vmem:[#allocation14_spill] sm:$0xff] }
 0x961   : > { %v4627_v33 = vadd.f32 %v9278_v31, %v4586_v0  ;;  %v4556_v6 = vadd.f32 %v4485_v41, %v10023_v13 }
 0x962   : > { %v4660_v30 = vmax.f32 %v4628_v32, 0.0  ;;  %v4589_v4 = vadd.f32 %v4557_v35, %v4400_v54 }
 0x963   : > { %v4659_v26 = vmax.f32 %v4627_v33, 0.0  ;;  %v4588_v57 = vadd.f32 %v4556_v6, %v4400_v54  ;;  %v4491_v56 = vpop.permute.xlu1 %4490  ;;  %v4403_v6 = vmul.f32 0.0625, %v4387_v3 }
 0x964   : > { %v4630_v25 = vadd.f32 %v9278_v31, %v4589_v4  ;;  %v4559_v49 = vadd.f32 %v4491_v56, %v10024_v20  ;;  %4752 = vrot.lane.b32.xlu1 %v4660_v30, %s7782_s27  ;;  %v4489_v53 = vpop.permute.xlu0 %4488  ;;  %v10028_v30 = vld [vmem:[#allocation22_spill] sm:$0xff] }
 0x965   : > { %v4629_v36 = vadd.f32 %v9278_v31, %v4588_v57  ;;  %v4558_v24 = vadd.f32 %v4489_v53, %v10025_v51  ;;  %4750 = vrot.lane.b32.xlu0 %v4659_v26, %s7782_s27  ;;  %v10029_v57 = vld [vmem:[#allocation19_spill] sm:$0xff] }
 0x966   : > { %v4662_v60 = vmax.f32 %v4630_v25, 0.0  ;;  %v4591_v18 = vadd.f32 %v4559_v49, %v4401_v40 }
 0x967   : > { %v4661_v50 = vmax.f32 %v4629_v36, 0.0  ;;  %v4590_v43 = vadd.f32 %v4558_v24, %v4401_v40  ;;  %v4495_v61 = vpop.permute.xlu1 %4494 }
 0x968   : > { %v4632_v62 = vadd.f32 %v9278_v31, %v4591_v18  ;;  %v4561_v63 = vadd.f32 %v4495_v61, %v10026_v55  ;;  %4756 = vrot.lane.b32.xlu1 %v4662_v60, %s7782_s27  ;;  %v4493_v1 = vpop.permute.xlu0 %4492  ;;  %v7011_v60 = vld [vmem:[%s9891_s3 + $0x6] ss:$0 sm:$0xff] }
 0x969   : > { %v4631_v0 = vadd.f32 %v9278_v31, %v4590_v43  ;;  %v4560_v54 = vadd.f32 %v4493_v1, %v10027_v45  ;;  %4754 = vrot.lane.b32.xlu0 %v4661_v50, %s7782_s27 }
 0x96a   : > { %v4664_v27 = vmax.f32 %v4632_v62, 0.0  ;;  %v4593_v32 = vadd.f32 %v4561_v63, %v4402_v19 }
 0x96b   : > { %v4663_v35 = vmax.f32 %v4631_v0, 0.0  ;;  %v4592_v41 = vadd.f32 %v4560_v54, %v4402_v19  ;;  %v4499_v14 = vpop.permute.xlu1 %4498 }
 0x96c   : > { %v4634_v33 = vadd.f32 %v9278_v31, %v4593_v32  ;;  %v4563_v4 = vadd.f32 %v4499_v14, %v10028_v30  ;;  %4760 = vrot.lane.b32.xlu1 %v4664_v27, %s7782_s27  ;;  %v4497_v26 = vpop.permute.xlu0 %4496 }
 0x96d   : > { %v4633_v47 = vadd.f32 %v9278_v31, %v4592_v41  ;;  %4758 = vrot.lane.b32.xlu0 %v4663_v35, %s7782_s27  ;;  %v4562_v56 = vadd.f32 %v4497_v26, %v10029_v57 }
 0x96e   : > { %v4666_v40 = vmax.f32 %v4634_v33, 0.0  ;;  %v4595_v25 = vadd.f32 %v4563_v4, %v4403_v6 }
 0x96f   : > { %v4665_v49 = vmax.f32 %v4633_v47, 0.0  ;;  %v4594_v53 = vadd.f32 %v4562_v56, %v4403_v6 }
 0x970   : > { %v4636_v12 = vadd.f32 %v9278_v31, %v4595_v25  ;;  %4764 = vrot.lane.b32.xlu1 %v4666_v40, %s7782_s27 }
 0x971   : > { %v4635_v38 = vadd.f32 %v9278_v31, %v4594_v53  ;;  %4762 = vrot.lane.b32.xlu0 %v4665_v49, %s7782_s27 }
 0x972   : > { %v4668_v36 = vmax.f32 %v4636_v12, 0.0 }
 0x973   : > { %v4667_v24 = vmax.f32 %v4635_v38, 0.0 }
 0x974   : > { %4768 = vrot.lane.b32.xlu1 %v4668_v36, %s7782_s27 }
 0x975   : > { %4766 = vrot.lane.b32.xlu0 %v4667_v24, %s7782_s27 }
 0x979   : > { %5481 = vrot.lane.b32.xlu0 %v7011_v60, %s7783_s30 }
 0x980   : > { %v4709_v50 = vpop.permute.xlu1 %4708 }
 0x981   : > { %v4707_v18 = vpop.permute.xlu0 %4706 }
 0x982   : > { %7591 = vmatprep.mubr.msk.f32.mxu1 %vm664_vm1, %v4707_v18 }
 0x983   : > { %7592 = vmatmul.mubr.msk.f32.vlgmr.msra.gmra.mrb[112].mxu1 %vm664_vm1, %v4709_v50 }
 0x98a   : > { %v4711_v31 = vpop.permute.xlu0 %4710 }
 0x98b   : > { %7594 = vmatprep.mubr.msk.f32.mxu1 %vm664_vm1, %v4711_v31 }
 0x98e   : > { %v4713_v43 = vpop.permute.xlu1 %4712 }
 0x98f   : > { %7595 = vmatmul.mubr.msk.f32.gmra.mrb[114].mxu1 %vm664_vm1, %v4713_v43 }
 0x992   : > { %v4717_v61 = vpop.permute.xlu1 %4716  ;;  %v4715_v62 = vpop.permute.xlu0 %4714 }
 0x993   : > { %7597 = vmatprep.mubr.msk.f32.mxu1 %vm664_vm1, %v4715_v62 }
 0x994   : > { %7598 = vmatmul.mubr.msk.f32.gmra.mrb[116].mxu1 %vm664_vm1, %v4717_v61 }
 0x999   : > { %v4721_v63 = vpop.permute.xlu1 %4720 }
 0x99a   : > { %v4719_v19 = vpop.permute.xlu0 %4718 }
 0x99b   : > { %7600 = vmatprep.mubr.msk.f32.mxu1 %vm664_vm1, %v4719_v19 }
 0x99c   : > { %7601 = vmatmul.mubr.msk.f32.gmra.mrb[118].mxu1 %vm664_vm1, %v4721_v63 }
 0x9a1   : > { %v4725_v3 = vpop.permute.xlu1 %4724 }
 0x9a2   : > { %v4723_v1 = vpop.permute.xlu0 %4722 }
 0x9a3   : > { %7603 = vmatprep.mubr.msk.f32.mxu1 %vm664_vm1, %v4723_v1 }
 0x9a4   : > { %7604 = vmatmul.mubr.msk.f32.gmra.mrb[120].mxu1 %vm664_vm1, %v4725_v3 }
 0x9a9   : > { %v4729_v54 = vpop.permute.xlu1 %4728 }
 0x9aa   : > { %v4727_v0 = vpop.permute.xlu0 %4726 }
 0x9ab   : > { %7606 = vmatprep.mubr.msk.f32.mxu1 %vm664_vm1, %v4727_v0 }
 0x9ac   : > { %7607 = vmatmul.mubr.msk.f32.gmra.mrb[122].mxu1 %vm664_vm1, %v4729_v54 }
 0x9b1   : > { %v4733_v32 = vpop.permute.xlu1 %4732 }
 0x9b2   : > { %v4731_v27 = vpop.permute.xlu0 %4730 }
 0x9b3   : > { %7609 = vmatprep.mubr.msk.f32.mxu1 %vm664_vm1, %v4731_v27 }
 0x9b4   : > { %7610 = vmatmul.mubr.msk.f32.gmra.mrb[124].mxu1 %vm664_vm1, %v4733_v32 }
 0x9b9   : > { %v4737_v35 = vpop.permute.xlu1 %4736 }
 0x9ba   : > { %v4735_v41 = vpop.permute.xlu0 %4734 }
 0x9bb   : > { %7612 = vmatprep.mubr.msk.f32.mxu1 %vm664_vm1, %v4735_v41 }
 0x9bc   : > { %7613 = vmatmul.mubr.msk.f32.gmra.mrb[126].mxu1 %vm664_vm1, %v4737_v35 }
 0x9be   : > { %v4741_v33 = vpop.permute.xlu1 %4740 }
 0x9bf   : > { %v4739_v14 = vpop.permute.xlu0 %4738 }
 0x9c0   : > { %7615 = vmatprep.mubr.msk.f32.mxu1 %vm664_vm1, %v4739_v14 }
 0x9c1   : > { %7616 = vmatmul.mubr.msk.f32.gmra.mrb[128].mxu1 %vm664_vm1, %v4741_v33 }
 0x9c7   : > { %v4745_v6 = vpop.permute.xlu1 %4744 }
 0x9c8   : > { %v4743_v4 = vpop.permute.xlu0 %4742 }
 0x9c9   : > { %7618 = vmatprep.mubr.msk.f32.mxu1 %vm664_vm1, %v4743_v4 }
 0x9ca   : > { %7619 = vmatmul.mubr.msk.f32.gmra.mrb[130].mxu1 %vm664_vm1, %v4745_v6 }
 0x9cb   : > { %v4749_v47 = vpop.permute.xlu1 %4748 }
 0x9cc   : > { %v4747_v26 = vpop.permute.xlu0 %4746 }
 0x9cd   : > { %7621 = vmatprep.mubr.msk.f32.mxu1 %vm664_vm1, %v4747_v26 }
 0x9ce   : > { %7622 = vmatmul.mubr.msk.f32.gmra.mrb[132].mxu1 %vm664_vm1, %v4749_v47 }
 0x9d6   : > { %v4753_v56 = vpop.permute.xlu1 %4752 }
 0x9d7   : > { %v4751_v40 = vpop.permute.xlu0 %4750 }
 0x9d8   : > { %7624 = vmatprep.mubr.msk.f32.mxu1 %vm664_vm1, %v4751_v40 }
 0x9d9   : > { %7625 = vmatmul.mubr.msk.f32.gmra.mrb[134].mxu1 %vm664_vm1, %v4753_v56 }
 0x9da   : > { %v4757_v25 = vpop.permute.xlu1 %4756 }
 0x9db   : > { %v4755_v49 = vpop.permute.xlu0 %4754 }
 0x9dc   : > { %7627 = vmatprep.mubr.msk.f32.mxu1 %vm664_vm1, %v4755_v49 }
 0x9dd   : > { %7628 = vmatmul.mubr.msk.f32.gmra.mrb[136].mxu1 %vm664_vm1, %v4757_v25 }
 0x9de   : > { %v4761_v53 = vpop.permute.xlu1 %4760 }
 0x9df   : > { %v4759_v12 = vpop.permute.xlu0 %4758 }
 0x9e0   : > { %7630 = vmatprep.mubr.msk.f32.mxu1 %vm664_vm1, %v4759_v12 }
 0x9e1   : > { %7631 = vmatmul.mubr.msk.f32.gmra.mrb[138].mxu1 %vm664_vm1, %v4761_v53 }
 0x9e2   : > { %v4765_v38 = vpop.permute.xlu1 %4764 }
 0x9e3   : > { %v4763_v36 = vpop.permute.xlu0 %4762 }
 0x9e4   : > { %7633 = vmatprep.mubr.msk.f32.mxu1 %vm664_vm1, %v4763_v36 }
 0x9e5   : > { %7634 = vmatmul.mubr.msk.f32.gmra.mrb[140].mxu1 %vm664_vm1, %v4765_v38 }
 0x9e6   : > { %v4769_v60 = vpop.permute.xlu1 %4768 }
 0x9e7   : > { %v4767_v24 = vpop.permute.xlu0 %4766 }
 0x9e8   : > { %7636 = vmatprep.mubr.msk.f32.mxu1 %vm664_vm1, %v4767_v24 }
 0x9e9   : > { %7637 = vmatmul.mubr.msk.f32.gmra.mrb[142].mxu1 %vm664_vm1, %v4769_v60 }
 0xa56   : > { %v7593_v18 = vpop.f32.mrb[112].mxu1 }
 0xa57   : > { %v5060_v50 = vsel %vm986_vm2, %v7593_v18, 0.0  ;;  %5253 = vrot.lane.b32.xlu1 %v7593_v18, %s7783_s30  ;;  %v4900_v31 = vpop.f32.mrb[113].mxu1 }
 0xa58   : > { %v5059_v43 = vsel %vm986_vm2, %v4900_v31, 0.0  ;;  %5251 = vrot.lane.b32.xlu0 %v4900_v31, %s7783_s30 }
 0xa59   : > { %v5061_v61 = vadd.f32 %v5060_v50, %v5059_v43 }
 0xa5b   : > { %v5062_v62 = vrot.slane %v5061_v61, 4 }
 0xa5d   : > { %v5063_v19 = vadd.f32 %v5062_v62, %v5061_v61 }
 0xa5f   : > { %v5064_v63 = vrot.slane %v5063_v19, 2 }
 0xa61   : > { %v5065_v1 = vadd.f32 %v5064_v63, %v5063_v19 }
 0xa62   : > { %v7596_v3 = vpop.f32.mrb[114].mxu1 }
 0xa63   : > { %v5066_v0 = vrot.slane %v5065_v1, 1  ;;  %v5069_v54 = vsel %vm986_vm2, %v7596_v3, 0.0  ;;  %5257 = vrot.lane.b32.xlu1 %v7596_v3, %s7783_s30  ;;  %v4910_v27 = vpop.f32.mrb[115].mxu1 }
 0xa64   : > { %v5068_v32 = vsel %vm986_vm2, %v4910_v27, 0.0 }
 0xa65   : > { %v5070_v35 = vadd.f32 %v5069_v54, %v5068_v32  ;;  %v5067_v41 = vadd.f32 %v5066_v0, %v5065_v1 }
 0xa67   : > { %v5071_v14 = vrot.slane %v5070_v35, 4  ;;  %5255 = vrot.lane.b32.xlu1 %v4910_v27, %s7783_s30  ;;  %v7599_v33 = vpop.f32.mrb[116].mxu1  ;;  %v5203_v40 = vmul.f32 0.0625, %v5067_v41 }
 0xa68   : > { %v5078_v6 = vsel %vm986_vm2, %v7599_v33, 0.0  ;;  %5261 = vrot.lane.b32.xlu0 %v7599_v33, %s7783_s30  ;;  %v4920_v4 = vpop.f32.mrb[117].mxu1 }
 0xa69   : > { %v5072_v26 = vadd.f32 %v5071_v14, %v5070_v35  ;;  %v5077_v47 = vsel %vm986_vm2, %v4920_v4, 0.0 }
 0xa6a   : > { %v5079_v56 = vadd.f32 %v5078_v6, %v5077_v47 }
 0xa6b   : > { %v5073_v25 = vrot.slane %v5072_v26, 2  ;;  %5259 = vrot.lane.b32.xlu1 %v4920_v4, %s7783_s30 }
 0xa6c   : > { %v5080_v49 = vrot.slane %v5079_v56, 4  ;;  %5395 = vrot.lane.b32.xlu0 %v5203_v40, %s7781_s18 }
 0xa6d   : > { %v5074_v53 = vadd.f32 %v5073_v25, %v5072_v26 }
 0xa6e   : > { %v5081_v12 = vadd.f32 %v5080_v49, %v5079_v56 }
 0xa6f   : > { %v5075_v38 = vrot.slane %v5074_v53, 1  ;;  %v7602_v36 = vpop.f32.mrb[118].mxu1 }
 0xa70   : > { %v5082_v24 = vrot.slane %v5081_v12, 2  ;;  %v5087_v60 = vsel %vm986_vm2, %v7602_v36, 0.0  ;;  %5265 = vrot.lane.b32.xlu1 %v7602_v36, %s7783_s30  ;;  %v4930_v18 = vpop.f32.mrb[119].mxu1 }
 0xa71   : > { %v5086_v50 = vsel %vm986_vm2, %v4930_v18, 0.0  ;;  %5263 = vrot.lane.b32.xlu0 %v4930_v18, %s7783_s30  ;;  %v5076_v31 = vadd.f32 %v5075_v38, %v5074_v53 }
 0xa72   : > { %v5083_v43 = vadd.f32 %v5082_v24, %v5081_v12  ;;  %v5088_v61 = vadd.f32 %v5087_v60, %v5086_v50 }
 0xa73   : > { %v5204_v62 = vmul.f32 0.0625, %v5076_v31 }
 0xa74   : > { %v5084_v19 = vrot.slane %v5083_v43, 1  ;;  %v5089_v63 = vrot.slane %v5088_v61, 4 }
 0xa75   : > { %5397 = vrot.lane.b32.xlu0 %v5204_v62, %s7781_s18 }
 0xa76   : > { %v5090_v1 = vadd.f32 %v5089_v63, %v5088_v61  ;;  %v5085_v0 = vadd.f32 %v5084_v19, %v5083_v43 }
 0xa77   : > { %v7605_v3 = vpop.f32.mrb[120].mxu1 }
 0xa78   : > { %v5091_v54 = vrot.slane %v5090_v1, 2  ;;  %v5096_v27 = vsel %vm986_vm2, %v7605_v3, 0.0  ;;  %v4940_v32 = vpop.f32.mrb[121].mxu1  ;;  %v5205_v33 = vmul.f32 0.0625, %v5085_v0 }
 0xa79   : > { %v5095_v35 = vsel %vm986_vm2, %v4940_v32, 0.0  ;;  %5269 = vrot.lane.b32.xlu0 %v7605_v3, %s7783_s30  ;;  %5267 = vrot.lane.b32.xlu1 %v4940_v32, %s7783_s30 }
 0xa7a   : > { %v5092_v41 = vadd.f32 %v5091_v54, %v5090_v1  ;;  %v5097_v14 = vadd.f32 %v5096_v27, %v5095_v35 }
 0xa7c   : > { %v5093_v6 = vrot.slane %v5092_v41, 1  ;;  %v5098_v4 = vrot.slane %v5097_v14, 4 }
 0xa7d   : > { %5399 = vrot.lane.b32.xlu1 %v5205_v33, %s7781_s18 }
 0xa7e   : > { %v5099_v26 = vadd.f32 %v5098_v4, %v5097_v14  ;;  %v5094_v56 = vadd.f32 %v5093_v6, %v5092_v41 }
 0xa7f   : > { %v7608_v47 = vpop.f32.mrb[122].mxu1 }
 0xa80   : > { %v5100_v40 = vrot.slane %v5099_v26, 2  ;;  %v5105_v25 = vsel %vm986_vm2, %v7608_v47, 0.0  ;;  %v4950_v49 = vpop.f32.mrb[123].mxu1  ;;  %v5206_v36 = vmul.f32 0.0625, %v5094_v56 }
 0xa81   : > { %v5104_v53 = vsel %vm986_vm2, %v4950_v49, 0.0  ;;  %5273 = vrot.lane.b32.xlu1 %v7608_v47, %s7783_s30  ;;  %5271 = vrot.lane.b32.xlu0 %v4950_v49, %s7783_s30 }
 0xa82   : > { %v5101_v12 = vadd.f32 %v5100_v40, %v5099_v26  ;;  %v5106_v38 = vadd.f32 %v5105_v25, %v5104_v53 }
 0xa84   : > { %v5102_v24 = vrot.slane %v5101_v12, 1  ;;  %v5107_v60 = vrot.slane %v5106_v38, 4 }
 0xa85   : > { %5401 = vrot.lane.b32.xlu0 %v5206_v36, %s7781_s18 }
 0xa86   : > { %v5108_v18 = vadd.f32 %v5107_v60, %v5106_v38  ;;  %v5103_v31 = vadd.f32 %v5102_v24, %v5101_v12 }
 0xa87   : > { %v7611_v50 = vpop.f32.mrb[124].mxu1 }
 0xa88   : > { %v5109_v43 = vrot.slane %v5108_v18, 2  ;;  %v5114_v61 = vsel %vm986_vm2, %v7611_v50, 0.0  ;;  %v4960_v62 = vpop.f32.mrb[125].mxu1  ;;  %v5207_v3 = vmul.f32 0.0625, %v5103_v31 }
 0xa89   : > { %v5113_v19 = vsel %vm986_vm2, %v4960_v62, 0.0  ;;  %5277 = vrot.lane.b32.xlu0 %v7611_v50, %s7783_s30  ;;  %5275 = vrot.lane.b32.xlu1 %v4960_v62, %s7783_s30 }
 0xa8a   : > { %v5110_v63 = vadd.f32 %v5109_v43, %v5108_v18  ;;  %v5115_v1 = vadd.f32 %v5114_v61, %v5113_v19 }
 0xa8c   : > { %v5111_v0 = vrot.slane %v5110_v63, 1  ;;  %v5116_v54 = vrot.slane %v5115_v1, 4 }
 0xa8d   : > { %5403 = vrot.lane.b32.xlu1 %v5207_v3, %s7781_s18 }
 0xa8e   : > { %v5117_v27 = vadd.f32 %v5116_v54, %v5115_v1  ;;  %v5112_v35 = vadd.f32 %v5111_v0, %v5110_v63 }
 0xa8f   : > { %v7614_v32 = vpop.f32.mrb[126].mxu1 }
 0xa90   : > { %v5118_v41 = vrot.slane %v5117_v27, 2  ;;  %v5123_v14 = vsel %vm986_vm2, %v7614_v32, 0.0  ;;  %v4970_v33 = vpop.f32.mrb[127].mxu1  ;;  %v5208_v47 = vmul.f32 0.0625, %v5112_v35 }
 0xa91   : > { %v5122_v6 = vsel %vm986_vm2, %v4970_v33, 0.0  ;;  %5281 = vrot.lane.b32.xlu1 %v7614_v32, %s7783_s30  ;;  %5279 = vrot.lane.b32.xlu0 %v4970_v33, %s7783_s30 }
 0xa92   : > { %v5119_v4 = vadd.f32 %v5118_v41, %v5117_v27  ;;  %v5124_v26 = vadd.f32 %v5123_v14, %v5122_v6 }
 0xa94   : > { %v5120_v56 = vrot.slane %v5119_v4, 1  ;;  %v5125_v40 = vrot.slane %v5124_v26, 4  ;;  %v7617_v25 = vpop.f32.mrb[128].mxu1 }
 0xa95   : > { %v5132_v49 = vsel %vm986_vm2, %v7617_v25, 0.0  ;;  %5405 = vrot.lane.b32.xlu0 %v5208_v47, %s7781_s18  ;;  %v4980_v53 = vpop.f32.mrb[129].mxu1 }
 0xa96   : > { %v5126_v12 = vadd.f32 %v5125_v40, %v5124_v26  ;;  %v5131_v38 = vsel %vm986_vm2, %v4980_v53, 0.0  ;;  %5283 = vrot.lane.b32.xlu1 %v4980_v53, %s7783_s30  ;;  %v5121_v36 = vadd.f32 %v5120_v56, %v5119_v4 }
 0xa97   : > { %v5133_v24 = vadd.f32 %v5132_v49, %v5131_v38 }
 0xa98   : > { %v5127_v60 = vrot.slane %v5126_v12, 2  ;;  %v5209_v18 = vmul.f32 0.0625, %v5121_v36 }
 0xa99   : > { %v5134_v50 = vrot.slane %v5133_v24, 4  ;;  %5285 = vrot.lane.b32.xlu0 %v7617_v25, %s7783_s30 }
 0xa9a   : > { %v5128_v31 = vadd.f32 %v5127_v60, %v5126_v12  ;;  %5407 = vrot.lane.b32.xlu1 %v5209_v18, %s7781_s18 }
 0xa9b   : > { %v5135_v43 = vadd.f32 %v5134_v50, %v5133_v24 }
 0xa9c   : > { %v5129_v61 = vrot.slane %v5128_v31, 1 }
 0xa9d   : > { %v5136_v62 = vrot.slane %v5135_v43, 2  ;;  %v7620_v19 = vpop.f32.mrb[130].mxu1 }
 0xa9e   : > { %v5141_v63 = vsel %vm986_vm2, %v7620_v19, 0.0  ;;  %v4990_v1 = vpop.f32.mrb[131].mxu1  ;;  %5289 = vrot.lane.b32.xlu1 %v7620_v19, %s7783_s30  ;;  %v5130_v3 = vadd.f32 %v5129_v61, %v5128_v31  ;;  %v7012_v19 = vld [vmem:[%s9890_s2 + $0xc0] sm:$0xff] }
 0xa9f   : > { %v5137_v0 = vadd.f32 %v5136_v62, %v5135_v43  ;;  %v5140_v54 = vsel %vm986_vm2, %v4990_v1, 0.0  ;;  %5287 = vrot.lane.b32.xlu0 %v4990_v1, %s7783_s30 }
 0xaa0   : > { %v5142_v27 = vadd.f32 %v5141_v63, %v5140_v54  ;;  %v5210_v32 = vmul.f32 0.0625, %v5130_v3  ;;  %v7013_v63 = vld [vmem:[%s9890_s2 + $0xc8] sm:$0xff] }
 0xaa1   : > { %v5138_v35 = vrot.slane %v5137_v0, 1  ;;  %v7623_v41 = vpop.f32.mrb[132].mxu1  ;;  %v7747_v3 = vpack.c.bf16 %v7013_v63, %v7012_v19 }
 0xaa2   : > { %v5143_v14 = vrot.slane %v5142_v27, 4  ;;  %v5150_v33 = vsel %vm986_vm2, %v7623_v41, 0.0  ;;  %v5000_v6 = vpop.f32.mrb[133].mxu1 }
 0xaa3   : > { %5409 = vrot.lane.b32.xlu0 %v5210_v32, %s7781_s18  ;;  %v5149_v4 = vsel %vm986_vm2, %v5000_v6, 0.0  ;;  %5291 = vrot.lane.b32.xlu1 %v5000_v6, %s7783_s30  ;;  %v5139_v26 = vadd.f32 %v5138_v35, %v5137_v0 }
 0xaa4   : > { %v5144_v47 = vadd.f32 %v5143_v14, %v5142_v27  ;;  %v5151_v56 = vadd.f32 %v5150_v33, %v5149_v4  ;;  %7748 = vmatprep.subr.bf16.mxu0 %v7747_v3 }
 0xaa5   : > { %v5211_v40 = vmul.f32 0.0625, %v5139_v26  ;;  %7750 = vmatpush3.bf16.msra.mxu0 %v7747_v3 }
 0xaa6   : > { %v5145_v25 = vrot.slane %v5144_v47, 2  ;;  %v5152_v49 = vrot.slane %v5151_v56, 4 }
 0xaa7   : > { %5293 = vrot.lane.b32.xlu0 %v7623_v41, %s7783_s30  ;;  %5411 = vrot.lane.b32.xlu1 %v5211_v40, %s7781_s18 }
 0xaa8   : > { %v5146_v53 = vadd.f32 %v5145_v25, %v5144_v47  ;;  %v5153_v12 = vadd.f32 %v5152_v49, %v5151_v56 }
 0xaaa   : > { %v5147_v38 = vrot.slane %v5146_v53, 1  ;;  %v5154_v36 = vrot.slane %v5153_v12, 2 }
 0xaac   : > { %v5155_v24 = vadd.f32 %v5154_v36, %v5153_v12  ;;  %v7626_v60 = vpop.f32.mrb[134].mxu1  ;;  %v5148_v18 = vadd.f32 %v5147_v38, %v5146_v53 }
 0xaad   : > { %v5159_v50 = vsel %vm986_vm2, %v7626_v60, 0.0  ;;  %v5010_v31 = vpop.f32.mrb[135].mxu1  ;;  %5297 = vrot.lane.b32.xlu1 %v7626_v60, %s7783_s30 }
 0xaae   : > { %v5156_v43 = vrot.slane %v5155_v24, 1  ;;  %v5158_v61 = vsel %vm986_vm2, %v5010_v31, 0.0  ;;  %5295 = vrot.lane.b32.xlu0 %v5010_v31, %s7783_s30  ;;  %v5212_v62 = vmul.f32 0.0625, %v5148_v18 }
 0xaaf   : > { %v5160_v1 = vadd.f32 %v5159_v50, %v5158_v61 }
 0xab0   : > { %v7629_v0 = vpop.f32.mrb[136].mxu1  ;;  %v5157_v54 = vadd.f32 %v5156_v43, %v5155_v24 }
 0xab1   : > { %v5161_v27 = vrot.slane %v5160_v1, 4  ;;  %v5168_v32 = vsel %vm986_vm2, %v7629_v0, 0.0  ;;  %v5020_v35 = vpop.f32.mrb[137].mxu1 }
 0xab2   : > { %v5167_v41 = vsel %vm986_vm2, %v5020_v35, 0.0  ;;  %5413 = vrot.lane.b32.xlu0 %v5212_v62, %s7781_s18  ;;  %5299 = vrot.lane.b32.xlu1 %v5020_v35, %s7783_s30  ;;  %v5213_v14 = vmul.f32 0.0625, %v5157_v54 }
 0xab3   : > { %v5162_v33 = vadd.f32 %v5161_v27, %v5160_v1  ;;  %v5169_v6 = vadd.f32 %v5168_v32, %v5167_v41 }
 0xab4   : > { %v7632_v4 = vpop.f32.mrb[138].mxu1 }
 0xab5   : > { %v5163_v26 = vrot.slane %v5162_v33, 2  ;;  %v5170_v47 = vrot.slane %v5169_v6, 4  ;;  %v5177_v56 = vsel %vm986_vm2, %v7632_v4, 0.0  ;;  %v5030_v40 = vpop.f32.mrb[139].mxu1 }
 0xab6   : > { %v5176_v25 = vsel %vm986_vm2, %v5030_v40, 0.0  ;;  %5301 = vrot.lane.b32.xlu0 %v7629_v0, %s7783_s30  ;;  %5415 = vrot.lane.b32.xlu1 %v5213_v14, %s7781_s18 }
 0xab7   : > { %v5164_v49 = vadd.f32 %v5163_v26, %v5162_v33  ;;  %v5171_v53 = vadd.f32 %v5170_v47, %v5169_v6  ;;  %v5178_v12 = vadd.f32 %v5177_v56, %v5176_v25 }
 0xab8   : > { %v7635_v38 = vpop.f32.mrb[140].mxu1 }
 0xab9   : > { %v5165_v36 = vrot.slane %v5164_v49, 1  ;;  %v5172_v24 = vrot.slane %v5171_v53, 2  ;;  %v5179_v60 = vrot.slane %v5178_v12, 4  ;;  %v5186_v18 = vsel %vm986_vm2, %v7635_v38, 0.0  ;;  %v5040_v50 = vpop.f32.mrb[141].mxu1 }
 0xaba   : > { %v5185_v31 = vsel %vm986_vm2, %v5040_v50, 0.0  ;;  %5303 = vrot.lane.b32.xlu0 %v5030_v40, %s7783_s30  ;;  %5305 = vrot.lane.b32.xlu1 %v7632_v4, %s7783_s30 }
 0xabb   : > { %v5173_v43 = vadd.f32 %v5172_v24, %v5171_v53  ;;  %v5180_v61 = vadd.f32 %v5179_v60, %v5178_v12  ;;  %v5187_v62 = vadd.f32 %v5186_v18, %v5185_v31  ;;  %v5166_v19 = vadd.f32 %v5165_v36, %v5164_v49 }
 0xabc   : > { %v7638_v63 = vpop.f32.mrb[142].mxu1 }
 0xabd   : > { %v5174_v1 = vrot.slane %v5173_v43, 1  ;;  %v5181_v3 = vrot.slane %v5180_v61, 2  ;;  %v5188_v0 = vrot.slane %v5187_v62, 4  ;;  %v5195_v54 = vsel %vm986_vm2, %v7638_v63, 0.0  ;;  %v5050_v27 = vpop.f32.mrb[143].mxu1 }
 0xabe   : > { %v5194_v32 = vsel %vm986_vm2, %v5050_v27, 0.0  ;;  %v5214_v35 = vmul.f32 0.0625, %v5166_v19  ;;  %v9526_v19 = vpop.permute.xlu0 %5481 }
 0xabf   : > { %v5182_v41 = vadd.f32 %v5181_v3, %v5180_v61  ;;  %v5189_v14 = vadd.f32 %v5188_v0, %v5187_v62  ;;  %v5196_v33 = vadd.f32 %v5195_v54, %v5194_v32  ;;  %v5175_v6 = vadd.f32 %v5174_v1, %v5173_v43  ;;  %v7014_v43 = vld [vmem:[%s9890_s2 + $0xd0] sm:$0xff]  ;;  %v7015_v61 = vld [vmem:[%s9890_s2 + $0xd8] sm:$0xff] }
 0xac0   : > { %5417 = vrot.lane.b32.xlu0 %v5214_v35, %s7781_s18 }
 0xac1   : > { %v5183_v4 = vrot.slane %v5182_v41, 1  ;;  %v5190_v26 = vrot.slane %v5189_v14, 2  ;;  %v5197_v47 = vrot.slane %v5196_v33, 4  ;;  %v5215_v56 = vmul.f32 0.0625, %v5175_v6 }
 0xac3   : > { %v5191_v40 = vadd.f32 %v5190_v26, %v5189_v14  ;;  %v5198_v25 = vadd.f32 %v5197_v47, %v5196_v33  ;;  %5419 = vrot.lane.b32.xlu1 %v5215_v56, %s7781_s18  ;;  %v5184_v49 = vadd.f32 %v5183_v4, %v5182_v41 }
 0xac4   : > { %5309 = vrot.lane.b32.xlu0 %v7635_v38, %s7783_s30  ;;  %v7751_v38 = vpack.c.bf16 %v7015_v61, %v7014_v43 }
 0xac5   : > { %v5192_v53 = vrot.slane %v5191_v40, 1  ;;  %v5199_v12 = vrot.slane %v5198_v25, 2  ;;  %v5216_v36 = vmul.f32 0.0625, %v5184_v49 }
 0xac6   : > { %7752 = vmatprep.subr.bf16.mxu0 %v7751_v38 }
 0xac7   : > { %v5200_v24 = vadd.f32 %v5199_v12, %v5198_v25  ;;  %5307 = vrot.lane.b32.xlu1 %v5040_v50, %s7783_s30  ;;  %v5193_v60 = vadd.f32 %v5192_v53, %v5191_v40  ;;  %7754 = vmatpush3.bf16.msra.mxu0 %v7751_v38 }
 0xac8   : > { %5421 = vrot.lane.b32.xlu0 %v5216_v36, %s7781_s18 }
 0xac9   : > { %v5201_v18 = vrot.slane %v5200_v24, 1  ;;  %v5217_v31 = vmul.f32 0.0625, %v5193_v60  ;;  %v5254_v1 = vpop.permute.xlu1 %5253 }
 0xaca   : > { %v5252_v0 = vpop.permute.xlu0 %5251  ;;  %v5348_v35 = vadd.f32 %v5254_v1, %v9973_v29 }
 0xacb   : > { %v5202_v62 = vadd.f32 %v5201_v18, %v5200_v24  ;;  %5423 = vrot.lane.b32.xlu1 %v5217_v31, %s7781_s18  ;;  %v5347_v41 = vadd.f32 %v5252_v0, %v9974_v8 }
 0xacc   : > { %5311 = vrot.lane.b32.xlu0 %v5050_v27, %s7783_s30 }
 0xacd   : > { %v5218_v50 = vmul.f32 0.0625, %v5202_v62 }
 0xacf   : > { %5313 = vrot.lane.b32.xlu1 %v7638_v63, %s7783_s30 }
 0xad0   : > { %5425 = vrot.lane.b32.xlu0 %v5218_v50, %s7781_s18 }
 0xad5   : > { %v5258_v3 = vpop.permute.xlu1 %5257 }
 0xad6   : > { %v5350_v40 = vadd.f32 %v5258_v3, %v9975_v58 }
 0xad9   : > { %v5256_v32 = vpop.permute.xlu1 %5255 }
 0xada   : > { %v5262_v54 = vpop.permute.xlu0 %5261  ;;  %v5349_v25 = vadd.f32 %v5256_v32, %v9976_v16 }
 0xadb   : > { %v5352_v61 = vadd.f32 %v5262_v54, %v9977_v37 }
 0xadd   : > { %v5260_v6 = vpop.permute.xlu1 %5259 }
 0xade   : > { %v5396_v14 = vpop.permute.xlu0 %5395  ;;  %v5351_v38 = vadd.f32 %v5260_v6, %v9978_v17 }
 0xadf   : > { %v5443_v27 = vadd.f32 %v5396_v14, %v5347_v41  ;;  %v5444_v33 = vadd.f32 %v5396_v14, %v5348_v35 }
 0xae1   : > { %v5484_v4 = vadd.f32 %v9526_v19, %v5443_v27  ;;  %v5485_v63 = vadd.f32 %v9526_v19, %v5444_v33 }
 0xae2   : > { %v5266_v49 = vpop.permute.xlu1 %5265 }
 0xae3   : > { %v5516_v26 = vmax.f32 %v5484_v4, 0.0  ;;  %v5517_v47 = vmax.f32 %v5485_v63, 0.0  ;;  %v5264_v56 = vpop.permute.xlu0 %5263  ;;  %v5354_v27 = vadd.f32 %v5266_v49, %v9979_v52 }
 0xae4   : > { %v5353_v54 = vadd.f32 %v5264_v56, %v10005_v28 }
 0xae5   : > { %5587 = vrot.lane.b32.xlu0 %v5517_v47, %s7783_s30  ;;  %5585 = vrot.lane.b32.xlu1 %v5516_v26, %s7783_s30 }
 0xae7   : > { %v5398_v53 = vpop.permute.xlu0 %5397 }
 0xae8   : > { %v5445_v12 = vadd.f32 %v5398_v53, %v5349_v25  ;;  %v5446_v36 = vadd.f32 %v5398_v53, %v5350_v40 }
 0xaea   : > { %v5486_v24 = vadd.f32 %v9526_v19, %v5445_v12  ;;  %v5487_v60 = vadd.f32 %v9526_v19, %v5446_v36 }
 0xaeb   : > { %v5268_v18 = vpop.permute.xlu1 %5267  ;;  %v5270_v62 = vpop.permute.xlu0 %5269 }
 0xaec   : > { %v5518_v31 = vmax.f32 %v5486_v24, 0.0  ;;  %v5519_v43 = vmax.f32 %v5487_v60, 0.0  ;;  %v5355_v12 = vadd.f32 %v5268_v18, %v10007_v34  ;;  %v5356_v49 = vadd.f32 %v5270_v62, %v10006_v44 }
 0xaee   : > { %5591 = vrot.lane.b32.xlu0 %v5519_v43, %s7783_s30  ;;  %5589 = vrot.lane.b32.xlu1 %v5518_v31, %s7783_s30 }
 0xaef   : > { %v5400_v50 = vpop.permute.xlu1 %5399 }
 0xaf0   : > { %v5447_v1 = vadd.f32 %v5400_v50, %v5351_v38  ;;  %v5448_v3 = vadd.f32 %v5400_v50, %v5352_v61 }
 0xaf2   : > { %v5488_v0 = vadd.f32 %v9526_v19, %v5447_v1  ;;  %v5489_v32 = vadd.f32 %v9526_v19, %v5448_v3 }
 0xaf3   : > { %v5272_v35 = vpop.permute.xlu0 %5271  ;;  %v5274_v33 = vpop.permute.xlu1 %5273 }
 0xaf4   : > { %v5520_v41 = vmax.f32 %v5488_v0, 0.0  ;;  %v5521_v14 = vmax.f32 %v5489_v32, 0.0  ;;  %v5358_v18 = vadd.f32 %v5274_v33, %v10008_v9  ;;  %v5357_v62 = vadd.f32 %v5272_v35, %v10009_v46 }
 0xaf6   : > { %5595 = vrot.lane.b32.xlu0 %v5521_v14, %s7783_s30  ;;  %5593 = vrot.lane.b32.xlu1 %v5520_v41, %s7783_s30 }
 0xaf7   : > { %v5402_v6 = vpop.permute.xlu0 %5401 }
 0xaf8   : > { %v5449_v4 = vadd.f32 %v5402_v6, %v5353_v54  ;;  %v5450_v63 = vadd.f32 %v5402_v6, %v5354_v27 }
 0xafa   : > { %v5490_v26 = vadd.f32 %v9526_v19, %v5449_v4  ;;  %v5491_v47 = vadd.f32 %v9526_v19, %v5450_v63 }
 0xafb   : > { %v5276_v40 = vpop.permute.xlu1 %5275  ;;  %v5278_v56 = vpop.permute.xlu0 %5277 }
 0xafc   : > { %v5522_v25 = vmax.f32 %v5490_v26, 0.0  ;;  %v5523_v53 = vmax.f32 %v5491_v47, 0.0  ;;  %v5359_v54 = vadd.f32 %v5276_v40, %v10011_v59  ;;  %v5360_v6 = vadd.f32 %v5278_v56, %v10010_v10 }
 0xafe   : > { %5599 = vrot.lane.b32.xlu0 %v5523_v53, %s7783_s30  ;;  %5597 = vrot.lane.b32.xlu1 %v5522_v25, %s7783_s30 }
 0xaff   : > { %v5404_v36 = vpop.permute.xlu1 %5403 }
 0xb00   : > { %v5451_v24 = vadd.f32 %v5404_v36, %v5355_v12  ;;  %v5452_v60 = vadd.f32 %v5404_v36, %v5356_v49 }
 0xb02   : > { %v5492_v31 = vadd.f32 %v9526_v19, %v5451_v24  ;;  %v5493_v43 = vadd.f32 %v9526_v19, %v5452_v60 }
 0xb03   : > { %v5282_v61 = vpop.permute.xlu1 %5281  ;;  %v5280_v38 = vpop.permute.xlu0 %5279 }
 0xb04   : > { %v5524_v50 = vmax.f32 %v5492_v31, 0.0  ;;  %v5525_v1 = vmax.f32 %v5493_v43, 0.0  ;;  %v5362_v56 = vadd.f32 %v5282_v61, %v10012_v22  ;;  %v5361_v24 = vadd.f32 %v5280_v38, %v10013_v5 }
 0xb06   : > { %5603 = vrot.lane.b32.xlu0 %v5525_v1, %s7783_s30  ;;  %5601 = vrot.lane.b32.xlu1 %v5524_v50, %s7783_s30 }
 0xb07   : > { %v5406_v3 = vpop.permute.xlu0 %5405 }
 0xb08   : > { %v5453_v0 = vadd.f32 %v5406_v3, %v5357_v62  ;;  %v5454_v32 = vadd.f32 %v5406_v3, %v5358_v18  ;;  %v5284_v41 = vpop.permute.xlu1 %5283 }
 0xb09   : > { %v5363_v1 = vadd.f32 %v5284_v41, %v10015_v2 }
 0xb0a   : > { %v5494_v14 = vadd.f32 %v9526_v19, %v5453_v0  ;;  %v5495_v27 = vadd.f32 %v9526_v19, %v5454_v32 }
 0xb0b   : > { %v5286_v4 = vpop.permute.xlu0 %5285 }
 0xb0c   : > { %v5526_v33 = vmax.f32 %v5494_v14, 0.0  ;;  %v5527_v63 = vmax.f32 %v5495_v27, 0.0  ;;  %v5408_v35 = vpop.permute.xlu1 %5407  ;;  %v5364_v3 = vadd.f32 %v5286_v4, %v10014_v39 }
 0xb0d   : > { %v5455_v26 = vadd.f32 %v5408_v35, %v5359_v54  ;;  %v5456_v47 = vadd.f32 %v5408_v35, %v5360_v6 }
 0xb0e   : > { %5607 = vrot.lane.b32.xlu0 %v5527_v63, %s7783_s30  ;;  %5605 = vrot.lane.b32.xlu1 %v5526_v33, %s7783_s30 }
 0xb0f   : > { %v5496_v25 = vadd.f32 %v9526_v19, %v5455_v26  ;;  %v5497_v53 = vadd.f32 %v9526_v19, %v5456_v47 }
 0xb10   : > { %v5290_v12 = vpop.permute.xlu1 %5289 }
 0xb11   : > { %v5528_v49 = vmax.f32 %v5496_v25, 0.0  ;;  %v5529_v36 = vmax.f32 %v5497_v53, 0.0  ;;  %v5288_v40 = vpop.permute.xlu0 %5287  ;;  %v5366_v4 = vadd.f32 %v5290_v12, %v10016_v48 }
 0xb12   : > { %v5365_v26 = vadd.f32 %v5288_v40, %v10017_v7 }
 0xb13   : > { %5611 = vrot.lane.b32.xlu0 %v5529_v36, %s7783_s30  ;;  %5609 = vrot.lane.b32.xlu1 %v5528_v49, %s7783_s30 }
 0xb15   : > { %v5410_v60 = vpop.permute.xlu0 %5409  ;;  %v5292_v31 = vpop.permute.xlu1 %5291 }
 0xb16   : > { %v5457_v43 = vadd.f32 %v5410_v60, %v5361_v24  ;;  %v5458_v50 = vadd.f32 %v5410_v60, %v5362_v56  ;;  %v5367_v36 = vadd.f32 %v5292_v31, %v10019_v21 }
 0xb18   : > { %v5498_v18 = vadd.f32 %v9526_v19, %v5457_v43  ;;  %v5499_v62 = vadd.f32 %v9526_v19, %v5458_v50 }
 0xb19   : > { %v5412_v0 = vpop.permute.xlu1 %5411  ;;  %v5294_v27 = vpop.permute.xlu0 %5293 }
 0xb1a   : > { %v5530_v32 = vmax.f32 %v5498_v18, 0.0  ;;  %v5531_v14 = vmax.f32 %v5499_v62, 0.0  ;;  %v5459_v54 = vadd.f32 %v5412_v0, %v5363_v1  ;;  %v5460_v61 = vadd.f32 %v5412_v0, %v5364_v3 }
 0xb1b   : > { %v5368_v60 = vadd.f32 %v5294_v27, %v10018_v42 }
 0xb1c   : > { %v5500_v38 = vadd.f32 %v9526_v19, %v5459_v54  ;;  %5615 = vrot.lane.b32.xlu0 %v5531_v14, %s7783_s30  ;;  %5613 = vrot.lane.b32.xlu1 %v5530_v32, %s7783_s30  ;;  %v5501_v41 = vadd.f32 %v9526_v19, %v5460_v61 }
 0xb1e   : > { %v5532_v6 = vmax.f32 %v5500_v38, 0.0  ;;  %v5533_v33 = vmax.f32 %v5501_v41, 0.0 }
 0xb1f   : > { %v5298_v63 = vpop.permute.xlu1 %5297 }
 0xb20   : > { %v5296_v35 = vpop.permute.xlu0 %5295  ;;  %5617 = vrot.lane.b32.xlu1 %v5532_v6, %s7783_s30  ;;  %5619 = vrot.lane.b32.xlu0 %v5533_v33, %s7783_s30  ;;  %v5370_v14 = vadd.f32 %v5298_v63, %v10020_v15 }
 0xb21   : > { %v5369_v27 = vadd.f32 %v5296_v35, %v10021_v11 }
 0xb24   : > { %v5300_v47 = vpop.permute.xlu1 %5299  ;;  %v5414_v25 = vpop.permute.xlu0 %5413 }
 0xb25   : > { %v5461_v53 = vadd.f32 %v5414_v25, %v5365_v26  ;;  %v5462_v49 = vadd.f32 %v5414_v25, %v5366_v4  ;;  %v5371_v6 = vadd.f32 %v5300_v47, %v10023_v13 }
 0xb27   : > { %v5502_v56 = vadd.f32 %v9526_v19, %v5461_v53  ;;  %v5503_v24 = vadd.f32 %v9526_v19, %v5462_v49 }
 0xb28   : > { %v5302_v43 = vpop.permute.xlu0 %5301  ;;  %v5416_v50 = vpop.permute.xlu1 %5415 }
 0xb29   : > { %v5534_v1 = vmax.f32 %v5502_v56, 0.0  ;;  %v5535_v18 = vmax.f32 %v5503_v24, 0.0  ;;  %v5463_v62 = vadd.f32 %v5416_v50, %v5367_v36  ;;  %v5464_v12 = vadd.f32 %v5416_v50, %v5368_v60 }
 0xb2a   : > { %v5372_v33 = vadd.f32 %v5302_v43, %v10022_v23 }
 0xb2b   : > { %v5504_v40 = vadd.f32 %v9526_v19, %v5463_v62  ;;  %5623 = vrot.lane.b32.xlu0 %v5535_v18, %s7783_s30  ;;  %5621 = vrot.lane.b32.xlu1 %v5534_v1, %s7783_s30  ;;  %v5505_v31 = vadd.f32 %v9526_v19, %v5464_v12 }
 0xb2c   : > { %v5304_v3 = vpop.permute.xlu0 %5303  ;;  %v5306_v54 = vpop.permute.xlu1 %5305 }
 0xb2d   : > { %v5536_v0 = vmax.f32 %v5504_v40, 0.0  ;;  %v5537_v32 = vmax.f32 %v5505_v31, 0.0  ;;  %v5373_v60 = vadd.f32 %v5304_v3, %v10025_v51  ;;  %v5374_v47 = vadd.f32 %v5306_v54, %v10024_v20 }
 0xb2f   : > { %5625 = vrot.lane.b32.xlu1 %v5536_v0, %s7783_s30  ;;  %5627 = vrot.lane.b32.xlu0 %v5537_v32, %s7783_s30 }
 0xb32   : > { %v5418_v61 = vpop.permute.xlu0 %5417 }
 0xb33   : > { %v5465_v38 = vadd.f32 %v5418_v61, %v5369_v27  ;;  %v5466_v41 = vadd.f32 %v5418_v61, %v5370_v14 }
 0xb35   : > { %v5506_v4 = vadd.f32 %v9526_v19, %v5465_v38  ;;  %v5507_v26 = vadd.f32 %v9526_v19, %v5466_v41  ;;  %v5420_v25 = vpop.permute.xlu1 %5419 }
 0xb36   : > { %v5467_v53 = vadd.f32 %v5420_v25, %v5371_v6  ;;  %v5468_v49 = vadd.f32 %v5420_v25, %v5372_v33  ;;  %v5310_v36 = vpop.permute.xlu0 %5309 }
 0xb37   : > { %v5538_v56 = vmax.f32 %v5506_v4, 0.0  ;;  %v5539_v63 = vmax.f32 %v5507_v26, 0.0  ;;  %v5376_v40 = vadd.f32 %v5310_v36, %v10026_v55 }
 0xb38   : > { %v5508_v35 = vadd.f32 %v9526_v19, %v5467_v53  ;;  %v5509_v24 = vadd.f32 %v9526_v19, %v5468_v49 }
 0xb39   : > { %5631 = vrot.lane.b32.xlu0 %v5539_v63, %s7783_s30  ;;  %5629 = vrot.lane.b32.xlu1 %v5538_v56, %s7783_s30  ;;  %v5308_v43 = vpop.permute.xlu1 %5307 }
 0xb3a   : > { %v5540_v50 = vmax.f32 %v5508_v35, 0.0  ;;  %v5541_v1 = vmax.f32 %v5509_v24, 0.0  ;;  %v5422_v18 = vpop.permute.xlu0 %5421  ;;  %v5375_v31 = vadd.f32 %v5308_v43, %v10027_v45 }
 0xb3b   : > { %v5469_v62 = vadd.f32 %v5422_v18, %v5373_v60  ;;  %v5470_v12 = vadd.f32 %v5422_v18, %v5374_v47  ;;  %v7048_v47 = vld [vmem:[%s9891_s3 + $0x7] ss:$0 sm:$0xff] }
 0xb3d   : > { %v5510_v0 = vadd.f32 %v9526_v19, %v5469_v62  ;;  %v5511_v3 = vadd.f32 %v9526_v19, %v5470_v12  ;;  %5635 = vrot.lane.b32.xlu0 %v5541_v1, %s7783_s30  ;;  %5633 = vrot.lane.b32.xlu1 %v5540_v50, %s7783_s30  ;;  %v5424_v32 = vpop.permute.xlu1 %5423 }
 0xb3e   : > { %v5471_v14 = vadd.f32 %v5424_v32, %v5375_v31  ;;  %v5472_v27 = vadd.f32 %v5424_v32, %v5376_v40  ;;  %v5312_v54 = vpop.permute.xlu0 %5311 }
 0xb3f   : > { %v5542_v61 = vmax.f32 %v5510_v0, 0.0  ;;  %v5543_v38 = vmax.f32 %v5511_v3, 0.0  ;;  %v5377_v33 = vadd.f32 %v5312_v54, %v10029_v57 }
 0xb40   : > { %v5512_v41 = vadd.f32 %v9526_v19, %v5471_v14  ;;  %v5513_v6 = vadd.f32 %v9526_v19, %v5472_v27 }
 0xb41   : > { %5639 = vrot.lane.b32.xlu0 %v5543_v38, %s7783_s30  ;;  %5637 = vrot.lane.b32.xlu1 %v5542_v61, %s7783_s30  ;;  %v5314_v4 = vpop.permute.xlu1 %5313 }
 0xb42   : > { %v5544_v26 = vmax.f32 %v5512_v41, 0.0  ;;  %v5545_v25 = vmax.f32 %v5513_v6, 0.0  ;;  %v5378_v53 = vadd.f32 %v5314_v4, %v10028_v30  ;;  %v5426_v49 = vpop.permute.xlu0 %5425 }
 0xb43   : > { %v5473_v36 = vadd.f32 %v5426_v49, %v5377_v33 }
 0xb44   : > { %v5474_v56 = vadd.f32 %v5426_v49, %v5378_v53 }
 0xb45   : > { %v5514_v63 = vadd.f32 %v9526_v19, %v5473_v36  ;;  %5643 = vrot.lane.b32.xlu0 %v5545_v25, %s7783_s30  ;;  %5641 = vrot.lane.b32.xlu1 %v5544_v26, %s7783_s30 }
 0xb46   : > { %v5515_v35 = vadd.f32 %v9526_v19, %v5474_v56 }
 0xb47   : > { %v5546_v24 = vmax.f32 %v5514_v63, 0.0 }
 0xb48   : > { %v5547_v60 = vmax.f32 %v5515_v35, 0.0 }
 0xb49   : > { %5645 = vrot.lane.b32.xlu1 %v5546_v24, %s7783_s30 }
 0xb4a   : > { %5647 = vrot.lane.b32.xlu0 %v5547_v60, %s7783_s30 }
 0xb4e   : > { %6360 = vrot.lane.b32.xlu0 %v7048_v47, %s7782_s27 }
 0xb57   : > { %v5586_v43 = vpop.permute.xlu1 %5585  ;;  %v5588_v50 = vpop.permute.xlu0 %5587 }
 0xb58   : > { %7647 = vmatprep.mubr.msk.f32.mxu0 %vm664_vm1, %v5586_v43 }
 0xb59   : > { %7648 = vmatmul.mubr.msk.f32.vlgmr.msra.gmra.mrb[112].mxu0 %vm664_vm1, %v5588_v50 }
 0xb60   : > { %v5590_v1 = vpop.permute.xlu1 %5589  ;;  %v5592_v19 = vpop.permute.xlu0 %5591 }
 0xb61   : > { %7650 = vmatprep.mubr.msk.f32.mxu0 %vm664_vm1, %v5590_v1 }
 0xb62   : > { %7651 = vmatmul.mubr.msk.f32.gmra.mrb[114].mxu0 %vm664_vm1, %v5592_v19 }
 0xb68   : > { %v5594_v18 = vpop.permute.xlu1 %5593  ;;  %v5596_v62 = vpop.permute.xlu0 %5595 }
 0xb69   : > { %7653 = vmatprep.mubr.msk.f32.mxu0 %vm664_vm1, %v5594_v18 }
 0xb6a   : > { %7654 = vmatmul.mubr.msk.f32.gmra.mrb[116].mxu0 %vm664_vm1, %v5596_v62 }
 0xb70   : > { %v5598_v12 = vpop.permute.xlu1 %5597  ;;  %v5600_v40 = vpop.permute.xlu0 %5599 }
 0xb71   : > { %7656 = vmatprep.mubr.msk.f32.mxu0 %vm664_vm1, %v5598_v12 }
 0xb72   : > { %7657 = vmatmul.mubr.msk.f32.gmra.mrb[118].mxu0 %vm664_vm1, %v5600_v40 }
 0xb78   : > { %v5602_v31 = vpop.permute.xlu1 %5601  ;;  %v5604_v0 = vpop.permute.xlu0 %5603 }
 0xb79   : > { %7659 = vmatprep.mubr.msk.f32.mxu0 %vm664_vm1, %v5602_v31 }
 0xb7a   : > { %7660 = vmatmul.mubr.msk.f32.gmra.mrb[120].mxu0 %vm664_vm1, %v5604_v0 }
 0xb80   : > { %v5606_v3 = vpop.permute.xlu1 %5605  ;;  %v5608_v32 = vpop.permute.xlu0 %5607 }
 0xb81   : > { %7662 = vmatprep.mubr.msk.f32.mxu0 %vm664_vm1, %v5606_v3 }
 0xb82   : > { %7663 = vmatmul.mubr.msk.f32.gmra.mrb[122].mxu0 %vm664_vm1, %v5608_v32 }
 0xb85   : > { %v5610_v14 = vpop.permute.xlu1 %5609  ;;  %v5612_v27 = vpop.permute.xlu0 %5611 }
 0xb86   : > { %7665 = vmatprep.mubr.msk.f32.mxu0 %vm664_vm1, %v5610_v14 }
 0xb87   : > { %7666 = vmatmul.mubr.msk.f32.gmra.mrb[124].mxu0 %vm664_vm1, %v5612_v27 }
 0xb8e   : > { %v5614_v54 = vpop.permute.xlu1 %5613  ;;  %v5616_v61 = vpop.permute.xlu0 %5615 }
 0xb8f   : > { %7668 = vmatprep.mubr.msk.f32.mxu0 %vm664_vm1, %v5614_v54 }
 0xb90   : > { %7669 = vmatmul.mubr.msk.f32.gmra.mrb[126].mxu0 %vm664_vm1, %v5616_v61 }
 0xb92   : > { %v5618_v38 = vpop.permute.xlu1 %5617  ;;  %v5620_v41 = vpop.permute.xlu0 %5619 }
 0xb93   : > { %7671 = vmatprep.mubr.msk.f32.mxu0 %vm664_vm1, %v5618_v38  ;;  %v7784_v38 = vmov 96  }
 0xb94   : > { %7672 = vmatmul.mubr.msk.f32.gmra.mrb[128].mxu0 %vm664_vm1, %v5620_v41  ;;  %7771 = vset.pattern.permute.xlu1 %v7784_v38 }
 0xb95   : > { %7770 = vset.pattern.permute.xlu0 %v7784_v38 }
 0xb9d   : > { %v5622_v6 = vpop.permute.xlu1 %5621  ;;  %v5624_v33 = vpop.permute.xlu0 %5623 }
 0xb9e   : > { %7674 = vmatprep.mubr.msk.f32.mxu0 %vm664_vm1, %v5622_v6 }
 0xb9f   : > { %7675 = vmatmul.mubr.msk.f32.gmra.mrb[130].mxu0 %vm664_vm1, %v5624_v33 }
 0xba1   : > { %v5626_v4 = vpop.permute.xlu1 %5625  ;;  %v5628_v26 = vpop.permute.xlu0 %5627 }
 0xba2   : > { %7677 = vmatprep.mubr.msk.f32.mxu0 %vm664_vm1, %v5626_v4 }
 0xba3   : > { %7678 = vmatmul.mubr.msk.f32.gmra.mrb[132].mxu0 %vm664_vm1, %v5628_v26 }
 0xbab   : > { %v5630_v25 = vpop.permute.xlu1 %5629  ;;  %v5632_v53 = vpop.permute.xlu0 %5631 }
 0xbac   : > { %7680 = vmatprep.mubr.msk.f32.mxu0 %vm664_vm1, %v5630_v25 }
 0xbad   : > { %7681 = vmatmul.mubr.msk.f32.gmra.mrb[134].mxu0 %vm664_vm1, %v5632_v53 }
 0xbaf   : > { %v5634_v49 = vpop.permute.xlu1 %5633  ;;  %v5636_v36 = vpop.permute.xlu0 %5635 }
 0xbb0   : > { %7683 = vmatprep.mubr.msk.f32.mxu0 %vm664_vm1, %v5634_v49 }
 0xbb1   : > { %7684 = vmatmul.mubr.msk.f32.gmra.mrb[136].mxu0 %vm664_vm1, %v5636_v36 }
 0xbb3   : > { %v5638_v56 = vpop.permute.xlu1 %5637  ;;  %v5640_v63 = vpop.permute.xlu0 %5639 }
 0xbb4   : > { %7686 = vmatprep.mubr.msk.f32.mxu0 %vm664_vm1, %v5638_v56 }
 0xbb5   : > { %7687 = vmatmul.mubr.msk.f32.gmra.mrb[138].mxu0 %vm664_vm1, %v5640_v63 }
 0xbb7   : > { %v5642_v35 = vpop.permute.xlu1 %5641  ;;  %v5644_v24 = vpop.permute.xlu0 %5643 }
 0xbb8   : > { %7689 = vmatprep.mubr.msk.f32.mxu0 %vm664_vm1, %v5642_v35 }
 0xbb9   : > { %7690 = vmatmul.mubr.msk.f32.gmra.mrb[140].mxu0 %vm664_vm1, %v5644_v24 }
 0xbbb   : > { %v5646_v60 = vpop.permute.xlu1 %5645 }
 0xbbc   : > { %7692 = vmatprep.mubr.msk.f32.mxu0 %vm664_vm1, %v5646_v60  ;;  %v5648_v47 = vpop.permute.xlu0 %5647 }
 0xbbd   : > { %7693 = vmatmul.mubr.msk.f32.gmra.mrb[142].mxu0 %vm664_vm1, %v5648_v47 }
 0xc2c   : > { %v7649_v43 = vpop.f32.mrb[112].mxu0 }
 0xc2d   : > { %v5939_v50 = vsel %vm986_vm2, %v7649_v43, 0.0  ;;  %6132 = vrot.lane.b32.xlu0 %v7649_v43, %s7782_s27  ;;  %v5779_v1 = vpop.f32.mrb[113].mxu0 }
 0xc2e   : > { %v5938_v19 = vsel %vm986_vm2, %v5779_v1, 0.0  ;;  %6130 = vrot.lane.b32.xlu1 %v5779_v1, %s7782_s27 }
 0xc2f   : > { %v5940_v18 = vadd.f32 %v5939_v50, %v5938_v19 }
 0xc31   : > { %v5941_v62 = vrot.slane %v5940_v18, 4 }
 0xc33   : > { %v5942_v12 = vadd.f32 %v5941_v62, %v5940_v18 }
 0xc35   : > { %v5943_v40 = vrot.slane %v5942_v12, 2  ;;  %v7652_v31 = vpop.f32.mrb[114].mxu0 }
 0xc36   : > { %v5948_v0 = vsel %vm986_vm2, %v7652_v31, 0.0  ;;  %6136 = vrot.lane.b32.xlu0 %v7652_v31, %s7782_s27  ;;  %v5789_v3 = vpop.f32.mrb[115].mxu0 }
 0xc37   : > { %v5944_v32 = vadd.f32 %v5943_v40, %v5942_v12  ;;  %v5947_v14 = vsel %vm986_vm2, %v5789_v3, 0.0  ;;  %6134 = vrot.lane.b32.xlu1 %v5789_v3, %s7782_s27 }
 0xc38   : > { %v5949_v27 = vadd.f32 %v5948_v0, %v5947_v14 }
 0xc39   : > { %v5945_v54 = vrot.slane %v5944_v32, 1 }
 0xc3a   : > { %v5950_v61 = vrot.slane %v5949_v27, 4 }
 0xc3b   : > { %v5946_v33 = vadd.f32 %v5945_v54, %v5944_v32 }
 0xc3c   : > { %v5951_v41 = vadd.f32 %v5950_v61, %v5949_v27 }
 0xc3d   : > { %v7655_v6 = vpop.f32.mrb[116].mxu0  ;;  %v6082_v56 = vmul.f32 0.0625, %v5946_v33 }
 0xc3e   : > { %v5952_v4 = vrot.slane %v5951_v41, 2  ;;  %v5957_v26 = vsel %vm986_vm2, %v7655_v6, 0.0  ;;  %6140 = vrot.lane.b32.xlu0 %v7655_v6, %s7782_s27  ;;  %v5799_v25 = vpop.f32.mrb[117].mxu0 }
 0xc3f   : > { %v5956_v53 = vsel %vm986_vm2, %v5799_v25, 0.0  ;;  %6138 = vrot.lane.b32.xlu1 %v5799_v25, %s7782_s27 }
 0xc40   : > { %v5953_v49 = vadd.f32 %v5952_v4, %v5951_v41  ;;  %v5958_v36 = vadd.f32 %v5957_v26, %v5956_v53 }
 0xc42   : > { %v5954_v63 = vrot.slane %v5953_v49, 1  ;;  %v5959_v35 = vrot.slane %v5958_v36, 4 }
 0xc43   : > { %6274 = vrot.lane.b32.xlu1 %v6082_v56, %s7783_s30 }
 0xc44   : > { %v5960_v24 = vadd.f32 %v5959_v35, %v5958_v36  ;;  %v5955_v60 = vadd.f32 %v5954_v63, %v5953_v49 }
 0xc45   : > { %v7658_v47 = vpop.f32.mrb[118].mxu0 }
 0xc46   : > { %v5961_v43 = vrot.slane %v5960_v24, 2  ;;  %v5966_v50 = vsel %vm986_vm2, %v7658_v47, 0.0  ;;  %6144 = vrot.lane.b32.xlu0 %v7658_v47, %s7782_s27  ;;  %v5809_v1 = vpop.f32.mrb[119].mxu0  ;;  %v6083_v12 = vmul.f32 0.0625, %v5955_v60 }
 0xc47   : > { %v5965_v19 = vsel %vm986_vm2, %v5809_v1, 0.0  ;;  %6142 = vrot.lane.b32.xlu1 %v5809_v1, %s7782_s27 }
 0xc48   : > { %v5962_v18 = vadd.f32 %v5961_v43, %v5960_v24  ;;  %v5967_v62 = vadd.f32 %v5966_v50, %v5965_v19 }
 0xc4a   : > { %v5963_v40 = vrot.slane %v5962_v18, 1  ;;  %v5968_v31 = vrot.slane %v5967_v62, 4  ;;  %6276 = vrot.lane.b32.xlu0 %v6083_v12, %s7783_s30 }
 0xc4c   : > { %v5969_v0 = vadd.f32 %v5968_v31, %v5967_v62  ;;  %v5964_v32 = vadd.f32 %v5963_v40, %v5962_v18 }
 0xc4d   : > { %v7661_v3 = vpop.f32.mrb[120].mxu0 }
 0xc4e   : > { %v5970_v14 = vrot.slane %v5969_v0, 2  ;;  %v5975_v27 = vsel %vm986_vm2, %v7661_v3, 0.0  ;;  %6148 = vrot.lane.b32.xlu0 %v7661_v3, %s7782_s27  ;;  %v5819_v54 = vpop.f32.mrb[121].mxu0  ;;  %v6084_v6 = vmul.f32 0.0625, %v5964_v32 }
 0xc4f   : > { %v5974_v61 = vsel %vm986_vm2, %v5819_v54, 0.0  ;;  %6146 = vrot.lane.b32.xlu1 %v5819_v54, %s7782_s27 }
 0xc50   : > { %v5971_v38 = vadd.f32 %v5970_v14, %v5969_v0  ;;  %v5976_v41 = vadd.f32 %v5975_v27, %v5974_v61 }
 0xc52   : > { %v5972_v33 = vrot.slane %v5971_v38, 1  ;;  %v5977_v4 = vrot.slane %v5976_v41, 4 }
 0xc53   : > { %6278 = vrot.lane.b32.xlu1 %v6084_v6, %s7783_s30 }
 0xc54   : > { %v5978_v26 = vadd.f32 %v5977_v4, %v5976_v41  ;;  %v5973_v25 = vadd.f32 %v5972_v33, %v5971_v38 }
 0xc55   : > { %v7664_v53 = vpop.f32.mrb[122].mxu0 }
 0xc56   : > { %v5979_v49 = vrot.slane %v5978_v26, 2  ;;  %v5984_v36 = vsel %vm986_vm2, %v7664_v53, 0.0  ;;  %6152 = vrot.lane.b32.xlu0 %v7664_v53, %s7782_s27  ;;  %v5829_v56 = vpop.f32.mrb[123].mxu0  ;;  %v6085_v60 = vmul.f32 0.0625, %v5973_v25 }
 0xc57   : > { %v5983_v63 = vsel %vm986_vm2, %v5829_v56, 0.0  ;;  %6150 = vrot.lane.b32.xlu1 %v5829_v56, %s7782_s27 }
 0xc58   : > { %v5980_v35 = vadd.f32 %v5979_v49, %v5978_v26  ;;  %v5985_v24 = vadd.f32 %v5984_v36, %v5983_v63 }
 0xc5a   : > { %v5981_v47 = vrot.slane %v5980_v35, 1  ;;  %v5986_v43 = vrot.slane %v5985_v24, 4  ;;  %6280 = vrot.lane.b32.xlu0 %v6085_v60, %s7783_s30  ;;  %v7667_v50 = vpop.f32.mrb[124].mxu0 }
 0xc5b   : > { %v5993_v1 = vsel %vm986_vm2, %v7667_v50, 0.0  ;;  %v5839_v19 = vpop.f32.mrb[125].mxu0 }
 0xc5c   : > { %v5987_v18 = vadd.f32 %v5986_v43, %v5985_v24  ;;  %v5992_v62 = vsel %vm986_vm2, %v5839_v19, 0.0  ;;  %6154 = vrot.lane.b32.xlu1 %v5839_v19, %s7782_s27  ;;  %v5982_v12 = vadd.f32 %v5981_v47, %v5980_v35 }
 0xc5d   : > { %v5994_v40 = vadd.f32 %v5993_v1, %v5992_v62 }
 0xc5e   : > { %v5988_v31 = vrot.slane %v5987_v18, 2  ;;  %6156 = vrot.lane.b32.xlu0 %v7667_v50, %s7782_s27  ;;  %v6086_v0 = vmul.f32 0.0625, %v5982_v12 }
 0xc5f   : > { %v5995_v3 = vrot.slane %v5994_v40, 4 }
 0xc60   : > { %v5989_v32 = vadd.f32 %v5988_v31, %v5987_v18  ;;  %6282 = vrot.lane.b32.xlu1 %v6086_v0, %s7783_s30 }
 0xc61   : > { %v5996_v14 = vadd.f32 %v5995_v3, %v5994_v40 }
 0xc62   : > { %v5990_v27 = vrot.slane %v5989_v32, 1 }
 0xc63   : > { %v5997_v54 = vrot.slane %v5996_v14, 2  ;;  %v7670_v61 = vpop.f32.mrb[126].mxu0 }
 0xc64   : > { %v6002_v38 = vsel %vm986_vm2, %v7670_v61, 0.0  ;;  %6160 = vrot.lane.b32.xlu0 %v7670_v61, %s7782_s27  ;;  %v5849_v41 = vpop.f32.mrb[127].mxu0  ;;  %v5991_v6 = vadd.f32 %v5990_v27, %v5989_v32 }
 0xc65   : > { %v5998_v33 = vadd.f32 %v5997_v54, %v5996_v14  ;;  %v6001_v4 = vsel %vm986_vm2, %v5849_v41, 0.0  ;;  %6158 = vrot.lane.b32.xlu1 %v5849_v41, %s7782_s27 }
 0xc66   : > { %v6003_v26 = vadd.f32 %v6002_v38, %v6001_v4  ;;  %v6087_v25 = vmul.f32 0.0625, %v5991_v6 }
 0xc67   : > { %v5999_v53 = vrot.slane %v5998_v33, 1  ;;  %v7673_v49 = vpop.f32.mrb[128].mxu0 }
 0xc68   : > { %v6004_v36 = vrot.slane %v6003_v26, 4  ;;  %v6011_v56 = vsel %vm986_vm2, %v7673_v49, 0.0  ;;  %6284 = vrot.lane.b32.xlu0 %v6087_v25, %s7783_s30  ;;  %v5859_v63 = vpop.f32.mrb[129].mxu0 }
 0xc69   : > { %v6010_v35 = vsel %vm986_vm2, %v5859_v63, 0.0  ;;  %6162 = vrot.lane.b32.xlu1 %v5859_v63, %s7782_s27  ;;  %v6000_v24 = vadd.f32 %v5999_v53, %v5998_v33 }
 0xc6a   : > { %v6005_v60 = vadd.f32 %v6004_v36, %v6003_v26  ;;  %v6012_v47 = vadd.f32 %v6011_v56, %v6010_v35 }
 0xc6b   : > { %v6088_v43 = vmul.f32 0.0625, %v6000_v24 }
 0xc6c   : > { %v6006_v50 = vrot.slane %v6005_v60, 2  ;;  %v6013_v1 = vrot.slane %v6012_v47, 4  ;;  %6164 = vrot.lane.b32.xlu0 %v7673_v49, %s7782_s27 }
 0xc6d   : > { %6286 = vrot.lane.b32.xlu1 %v6088_v43, %s7783_s30 }
 0xc6e   : > { %v6007_v19 = vadd.f32 %v6006_v50, %v6005_v60  ;;  %v6014_v18 = vadd.f32 %v6013_v1, %v6012_v47 }
 0xc70   : > { %v6008_v62 = vrot.slane %v6007_v19, 1  ;;  %v6015_v12 = vrot.slane %v6014_v18, 2 }
 0xc72   : > { %v6016_v40 = vadd.f32 %v6015_v12, %v6014_v18  ;;  %v7676_v31 = vpop.f32.mrb[130].mxu0  ;;  %v6009_v0 = vadd.f32 %v6008_v62, %v6007_v19 }
 0xc73   : > { %v6020_v3 = vsel %vm986_vm2, %v7676_v31, 0.0  ;;  %6168 = vrot.lane.b32.xlu0 %v7676_v31, %s7782_s27  ;;  %v5869_v32 = vpop.f32.mrb[131].mxu0 }
 0xc74   : > { %v6017_v14 = vrot.slane %v6016_v40, 1  ;;  %v6019_v27 = vsel %vm986_vm2, %v5869_v32, 0.0  ;;  %6166 = vrot.lane.b32.xlu1 %v5869_v32, %s7782_s27  ;;  %v6089_v54 = vmul.f32 0.0625, %v6009_v0 }
 0xc75   : > { %v6021_v61 = vadd.f32 %v6020_v3, %v6019_v27 }
 0xc76   : > { %v7679_v38 = vpop.f32.mrb[132].mxu0  ;;  %v6018_v41 = vadd.f32 %v6017_v14, %v6016_v40 }
 0xc77   : > { %v6022_v6 = vrot.slane %v6021_v61, 4  ;;  %v6029_v33 = vsel %vm986_vm2, %v7679_v38, 0.0  ;;  %6288 = vrot.lane.b32.xlu0 %v6089_v54, %s7783_s30  ;;  %v5879_v4 = vpop.f32.mrb[133].mxu0 }
 0xc78   : > { %v6028_v26 = vsel %vm986_vm2, %v5879_v4, 0.0  ;;  %6170 = vrot.lane.b32.xlu1 %v5879_v4, %s7782_s27  ;;  %v6090_v25 = vmul.f32 0.0625, %v6018_v41 }
 0xc79   : > { %v6023_v53 = vadd.f32 %v6022_v6, %v6021_v61  ;;  %v6030_v49 = vadd.f32 %v6029_v33, %v6028_v26 }
 0xc7b   : > { %v6024_v36 = vrot.slane %v6023_v53, 2  ;;  %v6031_v56 = vrot.slane %v6030_v49, 4  ;;  %6172 = vrot.lane.b32.xlu0 %v7679_v38, %s7782_s27 }
 0xc7c   : > { %6290 = vrot.lane.b32.xlu1 %v6090_v25, %s7783_s30 }
 0xc7d   : > { %v6025_v63 = vadd.f32 %v6024_v36, %v6023_v53  ;;  %v6032_v35 = vadd.f32 %v6031_v56, %v6030_v49 }
 0xc7f   : > { %v6026_v24 = vrot.slane %v6025_v63, 1  ;;  %v6033_v60 = vrot.slane %v6032_v35, 2 }
 0xc80   : > { %v7682_v47 = vpop.f32.mrb[134].mxu0 }
 0xc81   : > { %v6034_v43 = vadd.f32 %v6033_v60, %v6032_v35  ;;  %v6038_v50 = vsel %vm986_vm2, %v7682_v47, 0.0  ;;  %6176 = vrot.lane.b32.xlu0 %v7682_v47, %s7782_s27  ;;  %v5889_v1 = vpop.f32.mrb[135].mxu0  ;;  %v6027_v19 = vadd.f32 %v6026_v24, %v6025_v63 }
 0xc82   : > { %v6037_v18 = vsel %vm986_vm2, %v5889_v1, 0.0  ;;  %6174 = vrot.lane.b32.xlu1 %v5889_v1, %s7782_s27 }
 0xc83   : > { %v6039_v62 = vadd.f32 %v6038_v50, %v6037_v18  ;;  %v6091_v12 = vmul.f32 0.0625, %v6027_v19  ;;  %v6035_v40 = vrot.slane %v6034_v43, 1 }
 0xc84   : > { %v7685_v31 = vpop.f32.mrb[136].mxu0 }
 0xc85   : > { %v6040_v0 = vrot.slane %v6039_v62, 4  ;;  %v6047_v3 = vsel %vm986_vm2, %v7685_v31, 0.0  ;;  %v5899_v32 = vpop.f32.mrb[137].mxu0  ;;  %6292 = vrot.lane.b32.xlu0 %v6091_v12, %s7783_s30  ;;  %v6036_v38 = vadd.f32 %v6035_v40, %v6034_v43 }
 0xc86   : > { %v6046_v14 = vsel %vm986_vm2, %v5899_v32, 0.0  ;;  %6178 = vrot.lane.b32.xlu1 %v5899_v32, %s7782_s27 }
 0xc87   : > { %v6041_v27 = vadd.f32 %v6040_v0, %v6039_v62  ;;  %v6048_v54 = vadd.f32 %v6047_v3, %v6046_v14  ;;  %v6092_v56 = vmul.f32 0.0625, %v6036_v38 }
 0xc88   : > { %v7688_v61 = vpop.f32.mrb[138].mxu0 }
 0xc89   : > { %v6042_v41 = vrot.slane %v6041_v27, 2  ;;  %v6049_v6 = vrot.slane %v6048_v54, 4  ;;  %v6056_v33 = vsel %vm986_vm2, %v7688_v61, 0.0  ;;  %v5909_v4 = vpop.f32.mrb[139].mxu0  ;;  %6180 = vrot.lane.b32.xlu0 %v7685_v31, %s7782_s27 }
 0xc8a   : > { %v6055_v26 = vsel %vm986_vm2, %v5909_v4, 0.0  ;;  %6182 = vrot.lane.b32.xlu1 %v5909_v4, %s7782_s27 }
 0xc8b   : > { %v6043_v25 = vadd.f32 %v6042_v41, %v6041_v27  ;;  %v6050_v53 = vadd.f32 %v6049_v6, %v6048_v54  ;;  %v6057_v49 = vadd.f32 %v6056_v33, %v6055_v26 }
 0xc8c   : > { %v7691_v36 = vpop.f32.mrb[140].mxu0 }
 0xc8d   : > { %v6051_v63 = vrot.slane %v6050_v53, 2  ;;  %v6058_v35 = vrot.slane %v6057_v49, 4  ;;  %v6065_v24 = vsel %vm986_vm2, %v7691_v36, 0.0  ;;  %v5919_v60 = vpop.f32.mrb[141].mxu0  ;;  %6184 = vrot.lane.b32.xlu0 %v7688_v61, %s7782_s27  ;;  %v6044_v43 = vrot.slane %v6043_v25, 1 }
 0xc8e   : > { %v6064_v47 = vsel %vm986_vm2, %v5919_v60, 0.0  ;;  %6294 = vrot.lane.b32.xlu1 %v6092_v56, %s7783_s30 }
 0xc8f   : > { %v6052_v50 = vadd.f32 %v6051_v63, %v6050_v53  ;;  %v6059_v1 = vadd.f32 %v6058_v35, %v6057_v49  ;;  %v6066_v19 = vadd.f32 %v6065_v24, %v6064_v47  ;;  %v6045_v54 = vadd.f32 %v6044_v43, %v6043_v25 }
 0xc90   : > { %v7694_v18 = vpop.f32.mrb[142].mxu0 }
 0xc91   : > { %v6053_v62 = vrot.slane %v6052_v50, 1  ;;  %v6060_v12 = vrot.slane %v6059_v1, 2  ;;  %v6067_v40 = vrot.slane %v6066_v19, 4  ;;  %v6074_v31 = vsel %vm986_vm2, %v7694_v18, 0.0  ;;  %6188 = vrot.lane.b32.xlu0 %v7691_v36, %s7782_s27  ;;  %v5929_v0 = vpop.f32.mrb[143].mxu0 }
 0xc92   : > { %6186 = vrot.lane.b32.xlu1 %v5919_v60, %s7782_s27  ;;  %v6073_v3 = vsel %vm986_vm2, %v5929_v0, 0.0  ;;  %v6093_v26 = vmul.f32 0.0625, %v6045_v54 }
 0xc93   : > { %v6061_v32 = vadd.f32 %v6060_v12, %v6059_v1  ;;  %v6068_v14 = vadd.f32 %v6067_v40, %v6066_v19  ;;  %v6075_v27 = vadd.f32 %v6074_v31, %v6073_v3  ;;  %v6054_v61 = vadd.f32 %v6053_v62, %v6052_v50  ;;  %v9741_v50 = vpop.permute.xlu0 %6360 }
 0xc95   : > { %v6062_v38 = vrot.slane %v6061_v32, 1  ;;  %v6069_v41 = vrot.slane %v6068_v14, 2  ;;  %v6076_v6 = vrot.slane %v6075_v27, 4  ;;  %6192 = vrot.lane.b32.xlu0 %v7694_v18, %s7782_s27  ;;  %v6094_v53 = vmul.f32 0.0625, %v6054_v61 }
 0xc96   : > { %6190 = vrot.lane.b32.xlu1 %v5929_v0, %s7782_s27  ;;  %s6759_s27 = sshll.u32 %s6752_s16, 1 }
 0xc97   : > { %v6070_v33 = vadd.f32 %v6069_v41, %v6068_v14  ;;  %v6077_v4 = vadd.f32 %v6076_v6, %v6075_v27  ;;  %v6063_v49 = vadd.f32 %v6062_v38, %v6061_v32  ;;  %p196_p4 = scmp.lt.s32.totalorder %s6759_s27, 3 }
 0xc99   : > { %v6071_v36 = vrot.slane %v6070_v33, 1  ;;  %v6078_v56 = vrot.slane %v6077_v4, 2  ;;  %6296 = vrot.lane.b32.xlu0 %v6093_v26, %s7783_s30  ;;  %v6095_v35 = vmul.f32 0.0625, %v6063_v49  ;;  %s10033_s27 = smov (!%p196_p4, %s6759_s27), 3 }
 0xc9a   : > { %6298 = vrot.lane.b32.xlu1 %v6094_v53, %s7783_s30  ;;  %s6760_s16 = sshll.u32 %s10033_s27, 3 }
 0xc9b   : > { %v6079_v25 = vadd.f32 %v6078_v56, %v6077_v4  ;;  %v6072_v63 = vadd.f32 %v6071_v36, %v6070_v33  ;;  %s9845_s13 = scalar_lea.vmem %s9892_s4, %s6760_s16 }
 0xc9d   : > { %v6080_v24 = vrot.slane %v6079_v25, 1  ;;  %v6096_v60 = vmul.f32 0.0625, %v6072_v63 }
 0xc9e   : > { %6300 = vrot.lane.b32.xlu1 %v6095_v35, %s7783_s30 }
 0xc9f   : > { %v6081_v47 = vadd.f32 %v6080_v24, %v6079_v25  ;;  %6302 = vrot.lane.b32.xlu0 %v6096_v60, %s7783_s30  ;;  %v6133_v19 = vpop.permute.xlu0 %6132 }
 0xca0   : > { %v6131_v1 = vpop.permute.xlu1 %6130  ;;  %v6227_v40 = vadd.f32 %v6133_v19, %v9973_v29 }
 0xca1   : > { %v6097_v43 = vmul.f32 0.0625, %v6081_v47  ;;  %v6226_v31 = vadd.f32 %v6131_v1, %v9974_v8 }
 0xca3   : > { %6304 = vrot.lane.b32.xlu1 %v6097_v43, %s7783_s30 }
 0xca8   : > { %v6137_v62 = vpop.permute.xlu0 %6136 }
 0xca9   : > { %v6135_v18 = vpop.permute.xlu1 %6134  ;;  %v6229_v38 = vadd.f32 %v6137_v62, %v9975_v58 }
 0xcaa   : > { %v6228_v41 = vadd.f32 %v6135_v18, %v9976_v16 }
 0xcb0   : > { %v6141_v0 = vpop.permute.xlu0 %6140 }
 0xcb1   : > { %v6139_v12 = vpop.permute.xlu1 %6138  ;;  %v6231_v49 = vadd.f32 %v6141_v0, %v9977_v37 }
 0xcb2   : > { %v6230_v36 = vadd.f32 %v6139_v12, %v9978_v17 }
 0xcb5   : > { %v6275_v3 = vpop.permute.xlu1 %6274 }
 0xcb6   : > { %v6322_v32 = vadd.f32 %v6275_v3, %v6226_v31  ;;  %v6323_v14 = vadd.f32 %v6275_v3, %v6227_v40 }
 0xcb8   : > { %v6363_v27 = vadd.f32 %v9741_v50, %v6322_v32  ;;  %v6364_v54 = vadd.f32 %v9741_v50, %v6323_v14  ;;  %v6145_v61 = vpop.permute.xlu0 %6144 }
 0xcb9   : > { %v6143_v33 = vpop.permute.xlu1 %6142  ;;  %v6233_v47 = vadd.f32 %v6145_v61, %v9979_v52 }
 0xcba   : > { %6428 = vperm.xlu0 %7770, %v6363_v27   ;;  %6431 = vperm.xlu1 %7771, %v6364_v54   ;;  %v6232_v43 = vadd.f32 %v6143_v33, %v10005_v28 }
 0xcbc   : > { %v6277_v6 = vpop.permute.xlu0 %6276 }
 0xcbd   : > { %v6324_v29 = vadd.f32 %v6277_v6, %v6228_v41  ;;  %v6325_v4 = vadd.f32 %v6277_v6, %v6229_v38 }
 0xcbf   : > { %v6365_v8 = vadd.f32 %v9741_v50, %v6324_v29  ;;  %v6366_v26 = vadd.f32 %v9741_v50, %v6325_v4 }
 0xcc0   : > { %v6149_v56 = vpop.permute.xlu0 %6148 }
 0xcc1   : > { %v6147_v53 = vpop.permute.xlu1 %6146  ;;  %6437 = vperm.xlu0 %7770, %v6366_v26   ;;  %6434 = vperm.xlu1 %7771, %v6365_v8   ;;  %v6235_v40 = vadd.f32 %v6149_v56, %v10006_v44 }
 0xcc2   : > { %v6234_v31 = vadd.f32 %v6147_v53, %v10007_v34 }
 0xcc5   : > { %v6279_v25 = vpop.permute.xlu1 %6278 }
 0xcc6   : > { %v6326_v58 = vadd.f32 %v6279_v25, %v6230_v36  ;;  %v6327_v63 = vadd.f32 %v6279_v25, %v6231_v49 }
 0xcc8   : > { %v6367_v16 = vadd.f32 %v9741_v50, %v6326_v58  ;;  %v6368_v35 = vadd.f32 %v9741_v50, %v6327_v63  ;;  %v6153_v24 = vpop.permute.xlu0 %6152 }
 0xcc9   : > { %v6151_v60 = vpop.permute.xlu1 %6150  ;;  %v6237_v54 = vadd.f32 %v6153_v24, %v10008_v9 }
 0xcca   : > { %6443 = vperm.xlu0 %7770, %v6368_v35   ;;  %6440 = vperm.xlu1 %7771, %v6367_v16   ;;  %v6236_v61 = vadd.f32 %v6151_v60, %v10009_v46 }
 0xccc   : > { %v6281_v1 = vpop.permute.xlu0 %6280 }
 0xccd   : > { %v6328_v37 = vadd.f32 %v6281_v1, %v6232_v43  ;;  %v6329_v19 = vadd.f32 %v6281_v1, %v6233_v47 }
 0xcce   : > { %v6155_v17 = vpop.permute.xlu1 %6154 }
 0xccf   : > { %v6369_v18 = vadd.f32 %v9741_v50, %v6328_v37  ;;  %v6370_v62 = vadd.f32 %v9741_v50, %v6329_v19  ;;  %v6238_v29 = vadd.f32 %v6155_v17, %v10011_v59 }
 0xcd0   : > { %v6157_v12 = vpop.permute.xlu0 %6156 }
 0xcd1   : > { %6449 = vperm.xlu0 %7770, %v6370_v62   ;;  %6446 = vperm.xlu1 %7771, %v6369_v18   ;;  %v6239_v4 = vadd.f32 %v6157_v12, %v10010_v10 }
 0xcd2   : > { %v6283_v0 = vpop.permute.xlu1 %6282 }
 0xcd3   : > { %v6330_v3 = vadd.f32 %v6283_v0, %v6234_v31  ;;  %v6331_v52 = vadd.f32 %v6283_v0, %v6235_v40 }
 0xcd5   : > { %v6371_v28 = vadd.f32 %v9741_v50, %v6330_v3  ;;  %v6372_v32 = vadd.f32 %v9741_v50, %v6331_v52 }
 0xcd6   : > { %v6161_v14 = vpop.permute.xlu0 %6160 }
 0xcd7   : > { %v6159_v27 = vpop.permute.xlu1 %6158  ;;  %6455 = vperm.xlu0 %7770, %v6372_v32   ;;  %6452 = vperm.xlu1 %7771, %v6371_v28   ;;  %v6241_v25 = vadd.f32 %v6161_v14, %v10012_v22 }
 0xcd8   : > { %v6240_v59 = vadd.f32 %v6159_v27, %v10013_v5 }
 0xcda   : > { %v6285_v44 = vpop.permute.xlu0 %6284 }
 0xcdb   : > { %v6332_v38 = vadd.f32 %v6285_v44, %v6236_v61  ;;  %v6333_v34 = vadd.f32 %v6285_v44, %v6237_v54  ;;  %v6163_v41 = vpop.permute.xlu1 %6162 }
 0xcdc   : > { %v6242_v60 = vadd.f32 %v6163_v41, %v10015_v2 }
 0xcdd   : > { %v6373_v6 = vadd.f32 %v9741_v50, %v6332_v38  ;;  %v6374_v33 = vadd.f32 %v9741_v50, %v6333_v34 }
 0xcde   : > { %v6165_v8 = vpop.permute.xlu0 %6164 }
 0xcdf   : > { %v6287_v26 = vpop.permute.xlu1 %6286  ;;  %6461 = vperm.xlu0 %7770, %v6374_v33   ;;  %6458 = vperm.xlu1 %7771, %v6373_v6   ;;  %v6243_v47 = vadd.f32 %v6165_v8, %v10014_v39 }
 0xce0   : > { %v6334_v53 = vadd.f32 %v6287_v26, %v6238_v29  ;;  %v6335_v9 = vadd.f32 %v6287_v26, %v6239_v4 }
 0xce2   : > { %v6375_v46 = vadd.f32 %v9741_v50, %v6334_v53  ;;  %v6376_v49 = vadd.f32 %v9741_v50, %v6335_v9 }
 0xce4   : > { %6467 = vperm.xlu0 %7770, %v6376_v49   ;;  %6464 = vperm.xlu1 %7771, %v6375_v46  }
 0xce5   : > { %v6169_v36 = vpop.permute.xlu0 %6168 }
 0xce6   : > { %v6167_v56 = vpop.permute.xlu1 %6166  ;;  %v6245_v62 = vadd.f32 %v6169_v36, %v10016_v48 }
 0xce7   : > { %v6244_v2 = vadd.f32 %v6167_v56, %v10017_v7 }
 0xce9   : > { %v6289_v58 = vpop.permute.xlu0 %6288 }
 0xcea   : > { %v6336_v10 = vadd.f32 %v6289_v58, %v6240_v59  ;;  %v6337_v63 = vadd.f32 %v6289_v58, %v6241_v25  ;;  %v6171_v16 = vpop.permute.xlu1 %6170 }
 0xceb   : > { %v6246_v32 = vadd.f32 %v6171_v16, %v10019_v21 }
 0xcec   : > { %v6377_v35 = vadd.f32 %v9741_v50, %v6336_v10  ;;  %v6378_v24 = vadd.f32 %v9741_v50, %v6337_v63 }
 0xced   : > { %v6173_v43 = vpop.permute.xlu0 %6172 }
 0xcee   : > { %v6291_v1 = vpop.permute.xlu1 %6290  ;;  %6473 = vperm.xlu0 %7770, %v6378_v24   ;;  %6470 = vperm.xlu1 %7771, %v6377_v35   ;;  %v6247_v14 = vadd.f32 %v6173_v43, %v10018_v42 }
 0xcef   : > { %v6338_v37 = vadd.f32 %v6291_v1, %v6242_v60  ;;  %v6339_v22 = vadd.f32 %v6291_v1, %v6243_v47 }
 0xcf1   : > { %v6379_v5 = vadd.f32 %v9741_v50, %v6338_v37  ;;  %v6380_v19 = vadd.f32 %v9741_v50, %v6339_v22 }
 0xcf3   : > { %v6177_v17 = vpop.permute.xlu0 %6176  ;;  %6479 = vperm.xlu0 %7770, %v6380_v19   ;;  %6476 = vperm.xlu1 %7771, %v6379_v5  }
 0xcf4   : > { %v6175_v18 = vpop.permute.xlu1 %6174  ;;  %v6249_v33 = vadd.f32 %v6177_v17, %v10020_v15 }
 0xcf5   : > { %v6248_v21 = vadd.f32 %v6175_v18, %v10021_v11 }
 0xcf7   : > { %v6293_v12 = vpop.permute.xlu0 %6292 }
 0xcf8   : > { %v6179_v39 = vpop.permute.xlu1 %6178  ;;  %v6340_v40 = vadd.f32 %v6293_v12, %v6244_v2  ;;  %v6341_v31 = vadd.f32 %v6293_v12, %v6245_v62  ;;  %v6523_v62 = vlaneseq }
 0xcf9   : > { %v6250_v42 = vadd.f32 %v6179_v39, %v10023_v13 }
 0xcfa   : > { %v6381_v0 = vadd.f32 %v9741_v50, %v6340_v40  ;;  %v6382_v3 = vadd.f32 %v9741_v50, %v6341_v31  ;;  %v6524_v39 = vand.u32 127, %v6523_v62 }
 0xcfb   : > { %v6181_v52 = vpop.permute.xlu0 %6180 }
 0xcfc   : > { %v6183_v28 = vpop.permute.xlu1 %6182  ;;  %6485 = vperm.xlu0 %7770, %v6382_v3   ;;  %6482 = vperm.xlu1 %7771, %v6381_v0   ;;  %v6251_v4 = vadd.f32 %v6181_v52, %v10022_v23  ;;  %v6526_v0 = vshrl.u32 %v6523_v62, 7  ;;  %v6529_v3 = vadd.s32 4294967288, %v6524_v39 }
 0xcfd   : > { %v6252_v56 = vadd.f32 %v6183_v28, %v10025_v51 }
 0xcff   : > { %v6185_v27 = vpop.permute.xlu0 %6184 }
 0xd00   : > { %v6295_v48 = vpop.permute.xlu1 %6294  ;;  %v6253_v15 = vadd.f32 %v6185_v27, %v10024_v20 }
 0xd01   : > { %v6342_v54 = vadd.f32 %v6295_v48, %v6246_v32  ;;  %v6343_v7 = vadd.f32 %v6295_v48, %v6247_v14  ;;  %v9811_v32 = vsub.s32 %v6524_v39, %v6526_v0 }
 0xd03   : > { %v6383_v61 = vadd.f32 %v9741_v50, %v6342_v54  ;;  %v6384_v44 = vadd.f32 %v9741_v50, %v6343_v7  ;;  %v6189_v38 = vpop.permute.xlu0 %6188 }
 0xd04   : > { %v6187_v34 = vpop.permute.xlu1 %6186  ;;  %v6255_v63 = vadd.f32 %v6189_v38, %v10026_v55 }
 0xd05   : > { %6491 = vperm.xlu0 %7770, %v6384_v44   ;;  %6488 = vperm.xlu1 %7771, %v6383_v61   ;;  %v6254_v10 = vadd.f32 %v6187_v34, %v10027_v45 }
 0xd07   : > { %v6193_v41 = vpop.permute.xlu0 %6192 }
 0xd08   : > { %v6191_v6 = vpop.permute.xlu1 %6190  ;;  %v6257_v47 = vadd.f32 %v6193_v41, %v10028_v30 }
 0xd09   : > { %v6256_v60 = vadd.f32 %v6191_v6, %v10029_v57 }
 0xd0b   : > { %v6297_v29 = vpop.permute.xlu0 %6296 }
 0xd0c   : > { %v6299_v8 = vpop.permute.xlu1 %6298  ;;  %v6344_v26 = vadd.f32 %v6297_v29, %v6248_v21  ;;  %v6345_v53 = vadd.f32 %v6297_v29, %v6249_v33 }
 0xd0d   : > { %v6346_v9 = vadd.f32 %v6299_v8, %v6250_v42  ;;  %v6347_v46 = vadd.f32 %v6299_v8, %v6251_v4 }
 0xd0e   : > { %v6385_v49 = vadd.f32 %v9741_v50, %v6344_v26  ;;  %v6386_v36 = vadd.f32 %v9741_v50, %v6345_v53 }
 0xd0f   : > { %v6387_v11 = vadd.f32 %v9741_v50, %v6346_v9  ;;  %v6388_v23 = vadd.f32 %v9741_v50, %v6347_v46 }
 0xd10   : > { %v6301_v25 = vpop.permute.xlu1 %6300  ;;  %6497 = vperm.xlu0 %7770, %v6386_v36   ;;  %6494 = vperm.xlu1 %7771, %v6385_v49  }
 0xd11   : > { %v6348_v13 = vadd.f32 %v6301_v25, %v6252_v56  ;;  %v6349_v59 = vadd.f32 %v6301_v25, %v6253_v15  ;;  %v6303_v58 = vpop.permute.xlu0 %6302 }
 0xd12   : > { %v6350_v16 = vadd.f32 %v6303_v58, %v6254_v10  ;;  %v6351_v35 = vadd.f32 %v6303_v58, %v6255_v63 }
 0xd13   : > { %v6389_v51 = vadd.f32 %v9741_v50, %v6348_v13  ;;  %v6390_v20 = vadd.f32 %v9741_v50, %v6349_v59 }
 0xd14   : > { %6503 = vperm.xlu0 %7770, %v6388_v23   ;;  %6500 = vperm.xlu1 %7771, %v6387_v11   ;;  %v6391_v43 = vadd.f32 %v9741_v50, %v6350_v16  ;;  %v6392_v45 = vadd.f32 %v9741_v50, %v6351_v35 }
 0xd15   : > { %v6305_v24 = vpop.permute.xlu1 %6304 }
 0xd16   : > { %v6352_v55 = vadd.f32 %v6305_v24, %v6256_v60  ;;  %v6353_v1 = vadd.f32 %v6305_v24, %v6257_v47 }
 0xd18   : > { %6509 = vperm.xlu0 %7770, %v6390_v20   ;;  %6506 = vperm.xlu1 %7771, %v6389_v51   ;;  %v6393_v37 = vadd.f32 %v9741_v50, %v6352_v55  ;;  %v6394_v22 = vadd.f32 %v9741_v50, %v6353_v1  ;;  %v9809_v50 = vsub.s32 %v6529_v3, %v6526_v0 }
 0xd1c   : > { %6515 = vperm.xlu0 %7770, %v6392_v45   ;;  %6512 = vperm.xlu1 %7771, %v6391_v43  }
 0xd20   : > { %6521 = vperm.xlu0 %7770, %v6394_v22   ;;  %6518 = vperm.xlu1 %7771, %v6393_v37  }
 0xd39   : > { %v6432_v5 = vpop.permute.xlu1 %6431  ;;  %v6429_v57 = vpop.permute.xlu0 %6428 }
 0xd3a   : > { %v6533_v7 = vrot.slane %v6432_v5, %v9809_v50  ;;  %v6528_v61 = vrot.slane %v6429_v57, %v9811_v32 }
 0xd3c   : > { %v6535_v53 = vsel %vm6534_vm3, %v6533_v7, %v6528_v61 }
 0xd40   : > { %v6435_v30 = vpop.permute.xlu1 %6434  ;;  %v6438_v19 = vpop.permute.xlu0 %6437 }
 0xd41   : > { %v6539_v14 = vrot.slane %v6435_v30, %v9811_v32  ;;  %v6543_v27 = vrot.slane %v6438_v19, %v9809_v50 }
 0xd43   : > { %v6544_v21 = vsel %vm6534_vm3, %v6543_v27, %v6539_v14 }
 0xd44   : > { %v6672_v46 = vsel %vm6671_vm4, %v6544_v21, %v6535_v53 }
 0xd49   : > { %v6441_v17 = vpop.permute.xlu1 %6440  ;;  %v6444_v18 = vpop.permute.xlu0 %6443 }
 0xd4a   : > { %v6548_v48 = vrot.slane %v6441_v17, %v9811_v32  ;;  %v6552_v54 = vrot.slane %v6444_v18, %v9809_v50 }
 0xd4c   : > { %v6553_v4 = vsel %vm6534_vm3, %v6552_v54, %v6548_v48 }
 0xd4d   : > { %v6674_v36 = vsel %vm6673_vm5, %v6553_v4, %v6672_v46 }
 0xd50   : > { %v6447_v2 = vpop.permute.xlu1 %6446  ;;  %v6450_v12 = vpop.permute.xlu0 %6449 }
 0xd51   : > { %v6557_v44 = vrot.slane %v6447_v2, %v9811_v32  ;;  %v6561_v38 = vrot.slane %v6450_v12, %v9809_v50 }
 0xd53   : > { %v6562_v9 = vsel %vm6534_vm3, %v6561_v38, %v6557_v44 }
 0xd54   : > { %v6676_v15 = vsel %vm6675_vm6, %v6562_v9, %v6674_v36 }
 0xd56   : > { %v6453_v40 = vpop.permute.xlu1 %6452  ;;  %v6456_v31 = vpop.permute.xlu0 %6455 }
 0xd57   : > { %v6566_v6 = vrot.slane %v6453_v40, %v9811_v32  ;;  %v6570_v33 = vrot.slane %v6456_v31, %v9809_v50 }
 0xd59   : > { %v6571_v49 = vsel %vm6534_vm3, %v6570_v33, %v6566_v6 }
 0xd5a   : > { %v6678_v13 = vsel %vm6677_vm7, %v6571_v49, %v6676_v15 }
 0xd5e   : > { %v6459_v52 = vpop.permute.xlu1 %6458  ;;  %v6462_v28 = vpop.permute.xlu0 %6461 }
 0xd5f   : > { %v6575_v29 = vrot.slane %v6459_v52, %v9811_v32  ;;  %v6579_v42 = vrot.slane %v6462_v28, %v9809_v50 }
 0xd61   : > { %v6580_v56 = vsel %vm6534_vm3, %v6579_v42, %v6575_v29 }
 0xd62   : > { %v6680_v10 = vsel %vm6679_vm8, %v6580_v56, %v6678_v13 }
 0xd63   : > { %v6465_v34 = vpop.permute.xlu1 %6464  ;;  %v6468_v41 = vpop.permute.xlu0 %6467 }
 0xd64   : > { %v6584_v8 = vrot.slane %v6465_v34, %v9811_v32  ;;  %v6588_v26 = vrot.slane %v6468_v41, %v9809_v50 }
 0xd66   : > { %v6589_v25 = vsel %vm6534_vm3, %v6588_v26, %v6584_v8 }
 0xd67   : > { %v6682_v63 = vsel %vm6681_vm9, %v6589_v25, %v6680_v10 }
 0xd6d   : > { %v6471_v11 = vpop.permute.xlu1 %6470  ;;  %v6474_v23 = vpop.permute.xlu0 %6473 }
 0xd6e   : > { %v6593_v59 = vrot.slane %v6471_v11, %v9811_v32  ;;  %v6597_v58 = vrot.slane %v6474_v23, %v9809_v50 }
 0xd70   : > { %v6598_v51 = vsel %vm6534_vm3, %v6597_v58, %v6593_v59 }
 0xd71   : > { %v6684_v20 = vsel %vm6683_vm10, %v6598_v51, %v6682_v63 }
 0xd72   : > { %6694 = vst.msk [vmem:[%s9845_s13] sm:$0xff] %vm237_vm0, %v6684_v20  ;;  %v6477_v16 = vpop.permute.xlu1 %6476  ;;  %v6480_v35 = vpop.permute.xlu0 %6479 }
 0xd73   : > { %v6602_v18 = vrot.slane %v6477_v16, %v9811_v32  ;;  %v6606_v62 = vrot.slane %v6480_v35, %v9809_v50 }
 0xd75   : > { %v6607_v27 = vsel %vm6534_vm3, %v6606_v62, %v6602_v18 }
 0xd7b   : > { %v6483_v24 = vpop.permute.xlu1 %6482  ;;  %v6486_v60 = vpop.permute.xlu0 %6485 }
 0xd7c   : > { %v6611_v22 = vrot.slane %v6483_v24, %v9811_v32  ;;  %v6615_v5 = vrot.slane %v6486_v60, %v9809_v50 }
 0xd7e   : > { %v6616_v31 = vsel %vm6534_vm3, %v6615_v5, %v6611_v22 }
 0xd7f   : > { %v6685_v61 = vsel %vm6671_vm4, %v6616_v31, %v6607_v27 }
 0xd84   : > { %v6489_v47 = vpop.permute.xlu1 %6488  ;;  %v6492_v43 = vpop.permute.xlu0 %6491 }
 0xd85   : > { %v6620_v57 = vrot.slane %v6489_v47, %v9811_v32  ;;  %v6624_v30 = vrot.slane %v6492_v43, %v9809_v50 }
 0xd87   : > { %v6625_v52 = vsel %vm6534_vm3, %v6624_v30, %v6620_v57 }
 0xd88   : > { %v6686_v38 = vsel %vm6673_vm5, %v6625_v52, %v6685_v61 }
 0xd8f   : > { %v6495_v45 = vpop.permute.xlu1 %6494  ;;  %v6498_v55 = vpop.permute.xlu0 %6497 }
 0xd90   : > { %v6629_v2 = vrot.slane %v6495_v45, %v9811_v32  ;;  %v6633_v12 = vrot.slane %v6498_v55, %v9809_v50 }
 0xd92   : > { %v6634_v48 = vsel %vm6534_vm3, %v6633_v12, %v6629_v2 }
 0xd93   : > { %v6501_v1 = vpop.permute.xlu1 %6500  ;;  %v6504_v37 = vpop.permute.xlu0 %6503  ;;  %v6687_v41 = vsel %vm6675_vm6, %v6634_v48, %v6686_v38 }
 0xd94   : > { %v6638_v39 = vrot.slane %v6501_v1, %v9811_v32  ;;  %v6642_v40 = vrot.slane %v6504_v37, %v9809_v50 }
 0xd96   : > { %v6643_v44 = vsel %vm6534_vm3, %v6642_v40, %v6638_v39 }
 0xd97   : > { %v6507_v19 = vpop.permute.xlu1 %6506  ;;  %v6510_v17 = vpop.permute.xlu0 %6509  ;;  %v6688_v29 = vsel %vm6677_vm7, %v6643_v44, %v6687_v41 }
 0xd98   : > { %v6647_v0 = vrot.slane %v6507_v19, %v9811_v32  ;;  %v6651_v3 = vrot.slane %v6510_v17, %v9809_v50 }
 0xd9a   : > { %v6652_v34 = vsel %vm6534_vm3, %v6651_v3, %v6647_v0 }
 0xd9b   : > { %v6513_v28 = vpop.permute.xlu1 %6512  ;;  %v6516_v14 = vpop.permute.xlu0 %6515  ;;  %v6689_v8 = vsel %vm6679_vm8, %v6652_v34, %v6688_v29 }
 0xd9c   : > { %v6656_v54 = vrot.slane %v6513_v28, %v9811_v32  ;;  %v6660_v7 = vrot.slane %v6516_v14, %v9809_v50 }
 0xd9e   : > { %v6661_v6 = vsel %vm6534_vm3, %v6660_v7, %v6656_v54 }
 0xd9f   : > { %v6519_v33 = vpop.permute.xlu1 %6518  ;;  %v6522_v21 = vpop.permute.xlu0 %6521  ;;  %v6690_v26 = vsel %vm6681_vm9, %v6661_v6, %v6689_v8 }
 0xda0   : > { %v6665_v42 = vrot.slane %v6519_v33, %v9811_v32  ;;  %v6669_v4 = vrot.slane %v6522_v21, %v9809_v50 }
 0xda2   : > { %v6670_v53 = vsel %vm6534_vm3, %v6669_v4, %v6665_v42 }
 0xda3   : > { %v6691_v9 = vsel %vm6683_vm10, %v6670_v53, %v6690_v26 }
 0xda4   : > { %6695 = vst.msk [vmem:[%s9845_s13 + $0x8] sm:$0xff] %vm237_vm0, %v6691_v9 }
 0xda5 PF: > { %s14_s15 = sadd.s32 1, %s7778_s15  }
 0xda6   : > { %p11_p5 = scmp.ge.s32.totalorder %s14_s15, 4  }
 0xda8   :  { %13 = sbr.rel (!%p11_p5) target bundleno = 1 (0x1), region = 72 }

</bundles_post_ra>
